<compile_context>
chip_gen: v7x
topology: tpu7x:2x2x1
jax: 0.10.0
libtpu: 0.0.40
codegen_flags: <defaults>
</compile_context>

<pallas_src>
import jax
import jax.numpy as jnp
from jax.experimental import pallas as pl
from jax.experimental.pallas import tpu as pltpu

K_SIZE = 2
CHANNELS_OUT = [512, 256, 128, 64, 1]
STRIDE = [1, 2, 2, 2, 2]
PADDING = [0, 1, 1, 1, 1]
ACTIVE = ["R", "R", "R", "R", "tanh"]
BN_EPS = 1e-5


# ----------------------------- fused Pallas kernel -----------------------------

def _generator_kernel(z_ref,
                      w1_ref, g1_ref, b1_ref,
                      w2_ref, g2_ref, b2_ref,
                      w3_ref, g3_ref, b3_ref,
                      w4_ref, g4_ref, b4_ref,
                      w5_ref,
                      o_ref):
    """Whole DCGAN generator, fused; all activations live in VMEM/vregs.

    Spatial layout: every post-layer-1 activation is 2x2; position p = 2*oh+ow
    is carried as a separate lane-dense (N, C) slab xs[p].  For the k=2, s=2,
    p=1 layers, output position p depends only on input position p through tap
    (3 - p), so no overlap-add is ever needed; only BatchNorm couples the four
    positions (batch statistics).
    """
    n = z_ref.shape[0]
    inv_cnt = 1.0 / (4.0 * n)          # BN count = N * H * W = 4 * N

    def bn_relu(xs, g_ref, b_ref):
        # Training-mode BatchNorm2d (biased variance) + ReLU, one-pass stats.
        g = g_ref[...]                                            # (1, C)
        b = b_ref[...]                                            # (1, C)
        total = xs[0] + xs[1] + xs[2] + xs[3]                     # (n, C)
        sq = xs[0] * xs[0] + xs[1] * xs[1] + xs[2] * xs[2] + xs[3] * xs[3]
        mean = jnp.sum(total, axis=0, keepdims=True) * inv_cnt    # (1, C)
        var = jnp.sum(sq, axis=0, keepdims=True) * inv_cnt - mean * mean
        scale = g * jax.lax.rsqrt(var + BN_EPS)                   # (1, C)
        shift = b - mean * scale                                  # (1, C)
        return [jnp.maximum(x * scale + shift, 0.0) for x in xs]

    z = z_ref[...]                                                # (n, z_dim)

    # Layer 1: 1x1 -> 2x2 (stride 1, pad 0): output position p uses tap p.
    xs = [jnp.dot(z, w1_ref[p], preferred_element_type=jnp.float32)
          for p in range(4)]
    xs = bn_relu(xs, g1_ref, b1_ref)

    # Layers 2-4: 2x2 -> 2x2 (stride 2, pad 1): out pos p <- in pos p, tap 3-p.
    for w_ref, g_ref, b_ref in ((w2_ref, g2_ref, b2_ref),
                                (w3_ref, g3_ref, b3_ref),
                                (w4_ref, g4_ref, b4_ref)):
        xs = [jnp.dot(xs[p], w_ref[3 - p], preferred_element_type=jnp.float32)
              for p in range(4)]
        xs = bn_relu(xs, g_ref, b_ref)

    # Layer 5 (Cout = 1) + tanh.  w5_ref is (4, 1, Cin): each tap is a
    # lane-dense (1, Cin) row, so the 1-channel matmul is multiply + lane-sum.
    # Output column p = 2*oh + ow; with Cout == 1 this is exactly NCHW order.
    for p in range(4):
        row = w5_ref[3 - p]                                       # (1, Cin)
        col = jnp.sum(xs[p] * row, axis=1, keepdims=True)         # (n, 1)
        o_ref[:, p:p + 1] = jnp.tanh(col)


def _vmem_spec(a):
    ndim = a.ndim
    return pl.BlockSpec(a.shape, lambda: (0,) * ndim)


def generator_forward_pallas(x_nchw, kparams):
    """x_nchw: (N, z_dim, 1, 1) latent.  Returns NCHW (N, 1, 2, 2)."""
    (w1, w2, w3, w4, w5), (g1, g2, g3, g4), (b1, b2, b3, b4) = kparams
    n, zc, hh, ww = x_nchw.shape
    if hh != 1 or ww != 1:
        raise ValueError("DCGAN latent must be (N, z_dim, 1, 1)")
    z2d = x_nchw.reshape(n, zc).astype(jnp.float32)

    args = (z2d, w1, g1, b1, w2, g2, b2, w3, g3, b3, w4, g4, b4, w5)
    out = pl.pallas_call(
        _generator_kernel,
        out_shape=jax.ShapeDtypeStruct((n, 4), jnp.float32),
        in_specs=[_vmem_spec(a) for a in args],
        out_specs=pl.BlockSpec((n, 4), lambda: (0, 0)),
        compiler_params=pltpu.CompilerParams(vmem_limit_bytes=32 * 1024 * 1024),
    )(*args)
    # Column p == 2*oh + ow and Cout == 1, so (N, 4) reshapes directly to NCHW.
    return out.reshape(n, 1, 2, 2)


# --------------------------- params & layout prep ---------------------------

def init_params(key, z_dim):
    """PyTorch-faithful init: conv W ~ N(0, 0.02), BN gamma ~ N(0, 0.02), beta=0."""
    channels_in = [z_dim, 512, 256, 128, 64]
    params = []
    for i in range(5):
        key, wk, gk = jax.random.split(key, 3)
        w = 0.02 * jax.random.normal(
            wk, (channels_in[i], CHANNELS_OUT[i], K_SIZE, K_SIZE), jnp.float32)
        if ACTIVE[i] == "R":
            gamma = 0.02 * jax.random.normal(gk, (CHANNELS_OUT[i],), jnp.float32)
            beta = jnp.zeros((CHANNELS_OUT[i],), jnp.float32)
        else:
            gamma, beta = None, None
        params.append((w, gamma, beta))
    return params


def prepare_kernel_params(params):
    """PyTorch-layout params -> kernel layout, computed ONCE outside the forward.

    ConvTranspose2d weight (Cin, Cout, kH, kW) -> tap-major (kH*kW, Cin, Cout),
    tap index t = kh*2 + kw, so each w[t] is a contiguous lane-dense slab.
    Last layer (Cout == 1) is stored as (kH*kW, 1, Cin) so its taps are
    lane-dense rows.  BN gamma/beta -> (1, C) lane-dense rows.
    """
    n_layers = len(params)
    ws, gs, bs = [], [], []
    for i, (w, gamma, beta) in enumerate(params):
        cin, cout = w.shape[0], w.shape[1]
        if i == n_layers - 1:
            ws.append(jnp.transpose(w, (2, 3, 1, 0)).reshape(K_SIZE * K_SIZE, cout, cin))
        else:
            ws.append(jnp.transpose(w, (2, 3, 0, 1)).reshape(K_SIZE * K_SIZE, cin, cout))
        if gamma is not None:
            gs.append(gamma.reshape(1, cout))
            bs.append(beta.reshape(1, cout))
    return tuple(ws), tuple(gs), tuple(bs)


# ------------------------- pure-JAX reference (check) -------------------------

def reference_forward(x_nchw, params):
    """Direct port of the PyTorch module semantics (for the sanity check only)."""
    x = jnp.transpose(x_nchw, (0, 2, 3, 1)).astype(jnp.float32)   # NCHW -> NHWC
    for i, (w, gamma, beta) in enumerate(params):
        n, h, wd, cin = x.shape
        cout = w.shape[1]
        stride, padding = STRIDE[i], PADDING[i]
        y = jnp.einsum("nhwc,cokl->nhwokl", x, w)                 # (N,H,W,Cout,2,2)
        hf = (h - 1) * stride + K_SIZE
        wf = (wd - 1) * stride + K_SIZE
        full = jnp.zeros((n, hf, wf, cout), jnp.float32)
        for kh in range(K_SIZE):
            for kw in range(K_SIZE):
                full = full.at[:, kh:kh + (h - 1) * stride + 1:stride,
                               kw:kw + (wd - 1) * stride + 1:stride, :].add(y[..., kh, kw])
        if padding > 0:
            full = full[:, padding:hf - padding, padding:wf - padding, :]
        x = full
        if ACTIVE[i] == "R":
            x2 = x.reshape(-1, cout)
            mean = jnp.mean(x2, axis=0)
            var = jnp.mean((x2 - mean) ** 2, axis=0)              # biased (training)
            x2 = (x2 - mean) * jax.lax.rsqrt(var + BN_EPS) * gamma + beta
            x = jnp.maximum(x2, 0.0).reshape(x.shape)
        else:
            x = jnp.tanh(x)
    return jnp.transpose(x, (0, 3, 1, 2))                          # NHWC -> NCHW


# ------------------------------------ main ------------------------------------

if __name__ == "__main__":
    key = jax.random.PRNGKey(0)
    z_dim = 64
    pkey, xkey = jax.random.split(key)

    params = init_params(pkey, z_dim)               # PyTorch layout
    kparams = prepare_kernel_params(params)         # kernel layout, prepared once

    # Classic DCGAN latent: (N, z_dim, 1, 1) NCHW, matching the PyTorch module.
    x = jax.random.normal(xkey, (2, z_dim, 1, 1), jnp.float32)

    fwd = jax.jit(generator_forward_pallas)
    out = jax.block_until_ready(fwd(x, kparams))

    ref = jax.block_until_ready(jax.jit(reference_forward)(x, params))
    assert out.shape == (2, 1, 2, 2), out.shape
    assert jnp.allclose(out, ref, rtol=1e-3, atol=2e-4), (
        "mismatch vs pure-JAX reference, max abs err = %e"
        % float(jnp.max(jnp.abs(out - ref))))

    print("KERNEL_OK")
</pallas_src>

<mosaic_0001>
module attributes {stable_mosaic.version = 11 : i64} {
  func.func @_generator_kernel(%arg0: memref<2x64xf32, #tpu.memory_space<vmem>>, %arg1: memref<4x64x512xf32, #tpu.memory_space<vmem>>, %arg2: memref<1x512xf32, #tpu.memory_space<vmem>>, %arg3: memref<1x512xf32, #tpu.memory_space<vmem>>, %arg4: memref<4x512x256xf32, #tpu.memory_space<vmem>>, %arg5: memref<1x256xf32, #tpu.memory_space<vmem>>, %arg6: memref<1x256xf32, #tpu.memory_space<vmem>>, %arg7: memref<4x256x128xf32, #tpu.memory_space<vmem>>, %arg8: memref<1x128xf32, #tpu.memory_space<vmem>>, %arg9: memref<1x128xf32, #tpu.memory_space<vmem>>, %arg10: memref<4x128x64xf32, #tpu.memory_space<vmem>>, %arg11: memref<1x64xf32, #tpu.memory_space<vmem>>, %arg12: memref<1x64xf32, #tpu.memory_space<vmem>>, %arg13: memref<4x1x64xf32, #tpu.memory_space<vmem>>, %arg14: memref<2x4xf32, #tpu.memory_space<vmem>>) attributes {dimension_semantics = [], scalar_prefetch = 0 : i64, scratch_operands = 0 : i64, tpu.core_type = #tpu.core_type<tc>} {
    %c0 = arith.constant 0 : index
    %c0_0 = arith.constant 0 : index
    %0 = vector.load %arg0[%c0, %c0_0] : memref<2x64xf32, #tpu.memory_space<vmem>>, vector<2x64xf32>
    %c0_1 = arith.constant 0 : index
    %c0_2 = arith.constant 0 : index
    %c0_3 = arith.constant 0 : index
    %1 = vector.load %arg1[%c0_1, %c0_2, %c0_3] : memref<4x64x512xf32, #tpu.memory_space<vmem>>, vector<1x64x512xf32>
    %2 = vector.shape_cast %1 : vector<1x64x512xf32> to vector<64x512xf32>
    %cst = arith.constant dense<0.000000e+00> : vector<2x512xf32>
    %3 = tpu.matmul %0, %2, %cst {dimension_numbers = #tpu.dot_dimension_numbers<[1], [0], [0], [1], [0, 0, 1, 1], [], []>} : vector<2x64xf32>, vector<64x512xf32>, vector<2x512xf32> -> vector<2x512xf32>
    %c1 = arith.constant 1 : index
    %c0_4 = arith.constant 0 : index
    %c0_5 = arith.constant 0 : index
    %4 = vector.load %arg1[%c1, %c0_4, %c0_5] : memref<4x64x512xf32, #tpu.memory_space<vmem>>, vector<1x64x512xf32>
    %5 = vector.shape_cast %4 : vector<1x64x512xf32> to vector<64x512xf32>
    %cst_6 = arith.constant dense<0.000000e+00> : vector<2x512xf32>
    %6 = tpu.matmul %0, %5, %cst_6 {dimension_numbers = #tpu.dot_dimension_numbers<[1], [0], [0], [1], [0, 0, 1, 1], [], []>} : vector<2x64xf32>, vector<64x512xf32>, vector<2x512xf32> -> vector<2x512xf32>
    %c2 = arith.constant 2 : index
    %c0_7 = arith.constant 0 : index
    %c0_8 = arith.constant 0 : index
    %7 = vector.load %arg1[%c2, %c0_7, %c0_8] : memref<4x64x512xf32, #tpu.memory_space<vmem>>, vector<1x64x512xf32>
    %8 = vector.shape_cast %7 : vector<1x64x512xf32> to vector<64x512xf32>
    %cst_9 = arith.constant dense<0.000000e+00> : vector<2x512xf32>
    %9 = tpu.matmul %0, %8, %cst_9 {dimension_numbers = #tpu.dot_dimension_numbers<[1], [0], [0], [1], [0, 0, 1, 1], [], []>} : vector<2x64xf32>, vector<64x512xf32>, vector<2x512xf32> -> vector<2x512xf32>
    %c3 = arith.constant 3 : index
    %c0_10 = arith.constant 0 : index
    %c0_11 = arith.constant 0 : index
    %10 = vector.load %arg1[%c3, %c0_10, %c0_11] : memref<4x64x512xf32, #tpu.memory_space<vmem>>, vector<1x64x512xf32>
    %11 = vector.shape_cast %10 : vector<1x64x512xf32> to vector<64x512xf32>
    %cst_12 = arith.constant dense<0.000000e+00> : vector<2x512xf32>
    %12 = tpu.matmul %0, %11, %cst_12 {dimension_numbers = #tpu.dot_dimension_numbers<[1], [0], [0], [1], [0, 0, 1, 1], [], []>} : vector<2x64xf32>, vector<64x512xf32>, vector<2x512xf32> -> vector<2x512xf32>
    %c0_13 = arith.constant 0 : index
    %c0_14 = arith.constant 0 : index
    %13 = vector.load %arg2[%c0_13, %c0_14] : memref<1x512xf32, #tpu.memory_space<vmem>>, vector<1x512xf32>
    %c0_15 = arith.constant 0 : index
    %c0_16 = arith.constant 0 : index
    %14 = vector.load %arg3[%c0_15, %c0_16] : memref<1x512xf32, #tpu.memory_space<vmem>>, vector<1x512xf32>
    %15 = arith.addf %3, %6 : vector<2x512xf32>
    %16 = arith.addf %15, %9 : vector<2x512xf32>
    %17 = arith.addf %16, %12 : vector<2x512xf32>
    %18 = arith.mulf %3, %3 : vector<2x512xf32>
    %19 = arith.mulf %6, %6 : vector<2x512xf32>
    %20 = arith.addf %18, %19 : vector<2x512xf32>
    %21 = arith.mulf %9, %9 : vector<2x512xf32>
    %22 = arith.addf %20, %21 : vector<2x512xf32>
    %23 = arith.mulf %12, %12 : vector<2x512xf32>
    %24 = arith.addf %22, %23 : vector<2x512xf32>
    %cst_17 = arith.constant dense<0.000000e+00> : vector<512xf32>
    %25 = vector.multi_reduction <add>, %17, %cst_17 [0] : vector<2x512xf32> to vector<512xf32>
    %26 = vector.shape_cast %25 : vector<512xf32> to vector<1x512xf32>
    %cst_18 = arith.constant 1.250000e-01 : f32
    %27 = vector.broadcast %cst_18 : f32 to vector<1x512xf32>
    %28 = arith.mulf %26, %27 : vector<1x512xf32>
    %cst_19 = arith.constant dense<0.000000e+00> : vector<512xf32>
    %29 = vector.multi_reduction <add>, %24, %cst_19 [0] : vector<2x512xf32> to vector<512xf32>
    %30 = vector.shape_cast %29 : vector<512xf32> to vector<1x512xf32>
    %cst_20 = arith.constant 1.250000e-01 : f32
    %31 = vector.broadcast %cst_20 : f32 to vector<1x512xf32>
    %32 = arith.mulf %30, %31 : vector<1x512xf32>
    %33 = arith.mulf %28, %28 : vector<1x512xf32>
    %34 = arith.subf %32, %33 : vector<1x512xf32>
    %cst_21 = arith.constant 9.99999974E-6 : f32
    %35 = vector.broadcast %cst_21 : f32 to vector<1x512xf32>
    %36 = arith.addf %34, %35 : vector<1x512xf32>
    %37 = math.rsqrt %36 : vector<1x512xf32>
    %38 = arith.mulf %13, %37 : vector<1x512xf32>
    %39 = arith.mulf %28, %38 : vector<1x512xf32>
    %40 = arith.subf %14, %39 : vector<1x512xf32>
    %41 = vector.broadcast %38 : vector<1x512xf32> to vector<2x512xf32>
    %42 = arith.mulf %3, %41 : vector<2x512xf32>
    %43 = vector.broadcast %40 : vector<1x512xf32> to vector<2x512xf32>
    %44 = arith.addf %42, %43 : vector<2x512xf32>
    %cst_22 = arith.constant 0.000000e+00 : f32
    %45 = vector.broadcast %cst_22 : f32 to vector<2x512xf32>
    %46 = arith.maximumf %44, %45 : vector<2x512xf32>
    %47 = vector.broadcast %38 : vector<1x512xf32> to vector<2x512xf32>
    %48 = arith.mulf %6, %47 : vector<2x512xf32>
    %49 = vector.broadcast %40 : vector<1x512xf32> to vector<2x512xf32>
    %50 = arith.addf %48, %49 : vector<2x512xf32>
    %cst_23 = arith.constant 0.000000e+00 : f32
    %51 = vector.broadcast %cst_23 : f32 to vector<2x512xf32>
    %52 = arith.maximumf %50, %51 : vector<2x512xf32>
    %53 = vector.broadcast %38 : vector<1x512xf32> to vector<2x512xf32>
    %54 = arith.mulf %9, %53 : vector<2x512xf32>
    %55 = vector.broadcast %40 : vector<1x512xf32> to vector<2x512xf32>
    %56 = arith.addf %54, %55 : vector<2x512xf32>
    %cst_24 = arith.constant 0.000000e+00 : f32
    %57 = vector.broadcast %cst_24 : f32 to vector<2x512xf32>
    %58 = arith.maximumf %56, %57 : vector<2x512xf32>
    %59 = vector.broadcast %38 : vector<1x512xf32> to vector<2x512xf32>
    %60 = arith.mulf %12, %59 : vector<2x512xf32>
    %61 = vector.broadcast %40 : vector<1x512xf32> to vector<2x512xf32>
    %62 = arith.addf %60, %61 : vector<2x512xf32>
    %cst_25 = arith.constant 0.000000e+00 : f32
    %63 = vector.broadcast %cst_25 : f32 to vector<2x512xf32>
    %64 = arith.maximumf %62, %63 : vector<2x512xf32>
    %c3_26 = arith.constant 3 : index
    %c0_27 = arith.constant 0 : index
    %c0_28 = arith.constant 0 : index
    %65 = vector.load %arg4[%c3_26, %c0_27, %c0_28] : memref<4x512x256xf32, #tpu.memory_space<vmem>>, vector<1x512x256xf32>
    %66 = vector.shape_cast %65 : vector<1x512x256xf32> to vector<512x256xf32>
    %cst_29 = arith.constant dense<0.000000e+00> : vector<2x256xf32>
    %67 = tpu.matmul %46, %66, %cst_29 {dimension_numbers = #tpu.dot_dimension_numbers<[1], [0], [0], [1], [0, 0, 1, 1], [], []>} : vector<2x512xf32>, vector<512x256xf32>, vector<2x256xf32> -> vector<2x256xf32>
    %c2_30 = arith.constant 2 : index
    %c0_31 = arith.constant 0 : index
    %c0_32 = arith.constant 0 : index
    %68 = vector.load %arg4[%c2_30, %c0_31, %c0_32] : memref<4x512x256xf32, #tpu.memory_space<vmem>>, vector<1x512x256xf32>
    %69 = vector.shape_cast %68 : vector<1x512x256xf32> to vector<512x256xf32>
    %cst_33 = arith.constant dense<0.000000e+00> : vector<2x256xf32>
    %70 = tpu.matmul %52, %69, %cst_33 {dimension_numbers = #tpu.dot_dimension_numbers<[1], [0], [0], [1], [0, 0, 1, 1], [], []>} : vector<2x512xf32>, vector<512x256xf32>, vector<2x256xf32> -> vector<2x256xf32>
    %c1_34 = arith.constant 1 : index
    %c0_35 = arith.constant 0 : index
    %c0_36 = arith.constant 0 : index
    %71 = vector.load %arg4[%c1_34, %c0_35, %c0_36] : memref<4x512x256xf32, #tpu.memory_space<vmem>>, vector<1x512x256xf32>
    %72 = vector.shape_cast %71 : vector<1x512x256xf32> to vector<512x256xf32>
    %cst_37 = arith.constant dense<0.000000e+00> : vector<2x256xf32>
    %73 = tpu.matmul %58, %72, %cst_37 {dimension_numbers = #tpu.dot_dimension_numbers<[1], [0], [0], [1], [0, 0, 1, 1], [], []>} : vector<2x512xf32>, vector<512x256xf32>, vector<2x256xf32> -> vector<2x256xf32>
    %c0_38 = arith.constant 0 : index
    %c0_39 = arith.constant 0 : index
    %c0_40 = arith.constant 0 : index
    %74 = vector.load %arg4[%c0_38, %c0_39, %c0_40] : memref<4x512x256xf32, #tpu.memory_space<vmem>>, vector<1x512x256xf32>
    %75 = vector.shape_cast %74 : vector<1x512x256xf32> to vector<512x256xf32>
    %cst_41 = arith.constant dense<0.000000e+00> : vector<2x256xf32>
    %76 = tpu.matmul %64, %75, %cst_41 {dimension_numbers = #tpu.dot_dimension_numbers<[1], [0], [0], [1], [0, 0, 1, 1], [], []>} : vector<2x512xf32>, vector<512x256xf32>, vector<2x256xf32> -> vector<2x256xf32>
    %c0_42 = arith.constant 0 : index
    %c0_43 = arith.constant 0 : index
    %77 = vector.load %arg5[%c0_42, %c0_43] : memref<1x256xf32, #tpu.memory_space<vmem>>, vector<1x256xf32>
    %c0_44 = arith.constant 0 : index
    %c0_45 = arith.constant 0 : index
    %78 = vector.load %arg6[%c0_44, %c0_45] : memref<1x256xf32, #tpu.memory_space<vmem>>, vector<1x256xf32>
    %79 = arith.addf %67, %70 : vector<2x256xf32>
    %80 = arith.addf %79, %73 : vector<2x256xf32>
    %81 = arith.addf %80, %76 : vector<2x256xf32>
    %82 = arith.mulf %67, %67 : vector<2x256xf32>
    %83 = arith.mulf %70, %70 : vector<2x256xf32>
    %84 = arith.addf %82, %83 : vector<2x256xf32>
    %85 = arith.mulf %73, %73 : vector<2x256xf32>
    %86 = arith.addf %84, %85 : vector<2x256xf32>
    %87 = arith.mulf %76, %76 : vector<2x256xf32>
    %88 = arith.addf %86, %87 : vector<2x256xf32>
    %cst_46 = arith.constant dense<0.000000e+00> : vector<256xf32>
    %89 = vector.multi_reduction <add>, %81, %cst_46 [0] : vector<2x256xf32> to vector<256xf32>
    %90 = vector.shape_cast %89 : vector<256xf32> to vector<1x256xf32>
    %cst_47 = arith.constant 1.250000e-01 : f32
    %91 = vector.broadcast %cst_47 : f32 to vector<1x256xf32>
    %92 = arith.mulf %90, %91 : vector<1x256xf32>
    %cst_48 = arith.constant dense<0.000000e+00> : vector<256xf32>
    %93 = vector.multi_reduction <add>, %88, %cst_48 [0] : vector<2x256xf32> to vector<256xf32>
    %94 = vector.shape_cast %93 : vector<256xf32> to vector<1x256xf32>
    %cst_49 = arith.constant 1.250000e-01 : f32
    %95 = vector.broadcast %cst_49 : f32 to vector<1x256xf32>
    %96 = arith.mulf %94, %95 : vector<1x256xf32>
    %97 = arith.mulf %92, %92 : vector<1x256xf32>
    %98 = arith.subf %96, %97 : vector<1x256xf32>
    %cst_50 = arith.constant 9.99999974E-6 : f32
    %99 = vector.broadcast %cst_50 : f32 to vector<1x256xf32>
    %100 = arith.addf %98, %99 : vector<1x256xf32>
    %101 = math.rsqrt %100 : vector<1x256xf32>
    %102 = arith.mulf %77, %101 : vector<1x256xf32>
    %103 = arith.mulf %92, %102 : vector<1x256xf32>
    %104 = arith.subf %78, %103 : vector<1x256xf32>
    %105 = vector.broadcast %102 : vector<1x256xf32> to vector<2x256xf32>
    %106 = arith.mulf %67, %105 : vector<2x256xf32>
    %107 = vector.broadcast %104 : vector<1x256xf32> to vector<2x256xf32>
    %108 = arith.addf %106, %107 : vector<2x256xf32>
    %cst_51 = arith.constant 0.000000e+00 : f32
    %109 = vector.broadcast %cst_51 : f32 to vector<2x256xf32>
    %110 = arith.maximumf %108, %109 : vector<2x256xf32>
    %111 = vector.broadcast %102 : vector<1x256xf32> to vector<2x256xf32>
    %112 = arith.mulf %70, %111 : vector<2x256xf32>
    %113 = vector.broadcast %104 : vector<1x256xf32> to vector<2x256xf32>
    %114 = arith.addf %112, %113 : vector<2x256xf32>
    %cst_52 = arith.constant 0.000000e+00 : f32
    %115 = vector.broadcast %cst_52 : f32 to vector<2x256xf32>
    %116 = arith.maximumf %114, %115 : vector<2x256xf32>
    %117 = vector.broadcast %102 : vector<1x256xf32> to vector<2x256xf32>
    %118 = arith.mulf %73, %117 : vector<2x256xf32>
    %119 = vector.broadcast %104 : vector<1x256xf32> to vector<2x256xf32>
    %120 = arith.addf %118, %119 : vector<2x256xf32>
    %cst_53 = arith.constant 0.000000e+00 : f32
    %121 = vector.broadcast %cst_53 : f32 to vector<2x256xf32>
    %122 = arith.maximumf %120, %121 : vector<2x256xf32>
    %123 = vector.broadcast %102 : vector<1x256xf32> to vector<2x256xf32>
    %124 = arith.mulf %76, %123 : vector<2x256xf32>
    %125 = vector.broadcast %104 : vector<1x256xf32> to vector<2x256xf32>
    %126 = arith.addf %124, %125 : vector<2x256xf32>
    %cst_54 = arith.constant 0.000000e+00 : f32
    %127 = vector.broadcast %cst_54 : f32 to vector<2x256xf32>
    %128 = arith.maximumf %126, %127 : vector<2x256xf32>
    %c3_55 = arith.constant 3 : index
    %c0_56 = arith.constant 0 : index
    %c0_57 = arith.constant 0 : index
    %129 = vector.load %arg7[%c3_55, %c0_56, %c0_57] : memref<4x256x128xf32, #tpu.memory_space<vmem>>, vector<1x256x128xf32>
    %130 = vector.shape_cast %129 : vector<1x256x128xf32> to vector<256x128xf32>
    %cst_58 = arith.constant dense<0.000000e+00> : vector<2x128xf32>
    %131 = tpu.matmul %110, %130, %cst_58 {dimension_numbers = #tpu.dot_dimension_numbers<[1], [0], [0], [1], [0, 0, 1, 1], [], []>} : vector<2x256xf32>, vector<256x128xf32>, vector<2x128xf32> -> vector<2x128xf32>
    %c2_59 = arith.constant 2 : index
    %c0_60 = arith.constant 0 : index
    %c0_61 = arith.constant 0 : index
    %132 = vector.load %arg7[%c2_59, %c0_60, %c0_61] : memref<4x256x128xf32, #tpu.memory_space<vmem>>, vector<1x256x128xf32>
    %133 = vector.shape_cast %132 : vector<1x256x128xf32> to vector<256x128xf32>
    %cst_62 = arith.constant dense<0.000000e+00> : vector<2x128xf32>
    %134 = tpu.matmul %116, %133, %cst_62 {dimension_numbers = #tpu.dot_dimension_numbers<[1], [0], [0], [1], [0, 0, 1, 1], [], []>} : vector<2x256xf32>, vector<256x128xf32>, vector<2x128xf32> -> vector<2x128xf32>
    %c1_63 = arith.constant 1 : index
    %c0_64 = arith.constant 0 : index
    %c0_65 = arith.constant 0 : index
    %135 = vector.load %arg7[%c1_63, %c0_64, %c0_65] : memref<4x256x128xf32, #tpu.memory_space<vmem>>, vector<1x256x128xf32>
    %136 = vector.shape_cast %135 : vector<1x256x128xf32> to vector<256x128xf32>
    %cst_66 = arith.constant dense<0.000000e+00> : vector<2x128xf32>
    %137 = tpu.matmul %122, %136, %cst_66 {dimension_numbers = #tpu.dot_dimension_numbers<[1], [0], [0], [1], [0, 0, 1, 1], [], []>} : vector<2x256xf32>, vector<256x128xf32>, vector<2x128xf32> -> vector<2x128xf32>
    %c0_67 = arith.constant 0 : index
    %c0_68 = arith.constant 0 : index
    %c0_69 = arith.constant 0 : index
    %138 = vector.load %arg7[%c0_67, %c0_68, %c0_69] : memref<4x256x128xf32, #tpu.memory_space<vmem>>, vector<1x256x128xf32>
    %139 = vector.shape_cast %138 : vector<1x256x128xf32> to vector<256x128xf32>
    %cst_70 = arith.constant dense<0.000000e+00> : vector<2x128xf32>
    %140 = tpu.matmul %128, %139, %cst_70 {dimension_numbers = #tpu.dot_dimension_numbers<[1], [0], [0], [1], [0, 0, 1, 1], [], []>} : vector<2x256xf32>, vector<256x128xf32>, vector<2x128xf32> -> vector<2x128xf32>
    %c0_71 = arith.constant 0 : index
    %c0_72 = arith.constant 0 : index
    %141 = vector.load %arg8[%c0_71, %c0_72] : memref<1x128xf32, #tpu.memory_space<vmem>>, vector<1x128xf32>
    %c0_73 = arith.constant 0 : index
    %c0_74 = arith.constant 0 : index
    %142 = vector.load %arg9[%c0_73, %c0_74] : memref<1x128xf32, #tpu.memory_space<vmem>>, vector<1x128xf32>
    %143 = arith.addf %131, %134 : vector<2x128xf32>
    %144 = arith.addf %143, %137 : vector<2x128xf32>
    %145 = arith.addf %144, %140 : vector<2x128xf32>
    %146 = arith.mulf %131, %131 : vector<2x128xf32>
    %147 = arith.mulf %134, %134 : vector<2x128xf32>
    %148 = arith.addf %146, %147 : vector<2x128xf32>
    %149 = arith.mulf %137, %137 : vector<2x128xf32>
    %150 = arith.addf %148, %149 : vector<2x128xf32>
    %151 = arith.mulf %140, %140 : vector<2x128xf32>
    %152 = arith.addf %150, %151 : vector<2x128xf32>
    %cst_75 = arith.constant dense<0.000000e+00> : vector<128xf32>
    %153 = vector.multi_reduction <add>, %145, %cst_75 [0] : vector<2x128xf32> to vector<128xf32>
    %154 = vector.shape_cast %153 : vector<128xf32> to vector<1x128xf32>
    %cst_76 = arith.constant 1.250000e-01 : f32
    %155 = vector.broadcast %cst_76 : f32 to vector<1x128xf32>
    %156 = arith.mulf %154, %155 : vector<1x128xf32>
    %cst_77 = arith.constant dense<0.000000e+00> : vector<128xf32>
    %157 = vector.multi_reduction <add>, %152, %cst_77 [0] : vector<2x128xf32> to vector<128xf32>
    %158 = vector.shape_cast %157 : vector<128xf32> to vector<1x128xf32>
    %cst_78 = arith.constant 1.250000e-01 : f32
    %159 = vector.broadcast %cst_78 : f32 to vector<1x128xf32>
    %160 = arith.mulf %158, %159 : vector<1x128xf32>
    %161 = arith.mulf %156, %156 : vector<1x128xf32>
    %162 = arith.subf %160, %161 : vector<1x128xf32>
    %cst_79 = arith.constant 9.99999974E-6 : f32
    %163 = vector.broadcast %cst_79 : f32 to vector<1x128xf32>
    %164 = arith.addf %162, %163 : vector<1x128xf32>
    %165 = math.rsqrt %164 : vector<1x128xf32>
    %166 = arith.mulf %141, %165 : vector<1x128xf32>
    %167 = arith.mulf %156, %166 : vector<1x128xf32>
    %168 = arith.subf %142, %167 : vector<1x128xf32>
    %169 = vector.broadcast %166 : vector<1x128xf32> to vector<2x128xf32>
    %170 = arith.mulf %131, %169 : vector<2x128xf32>
    %171 = vector.broadcast %168 : vector<1x128xf32> to vector<2x128xf32>
    %172 = arith.addf %170, %171 : vector<2x128xf32>
    %cst_80 = arith.constant 0.000000e+00 : f32
    %173 = vector.broadcast %cst_80 : f32 to vector<2x128xf32>
    %174 = arith.maximumf %172, %173 : vector<2x128xf32>
    %175 = vector.broadcast %166 : vector<1x128xf32> to vector<2x128xf32>
    %176 = arith.mulf %134, %175 : vector<2x128xf32>
    %177 = vector.broadcast %168 : vector<1x128xf32> to vector<2x128xf32>
    %178 = arith.addf %176, %177 : vector<2x128xf32>
    %cst_81 = arith.constant 0.000000e+00 : f32
    %179 = vector.broadcast %cst_81 : f32 to vector<2x128xf32>
    %180 = arith.maximumf %178, %179 : vector<2x128xf32>
    %181 = vector.broadcast %166 : vector<1x128xf32> to vector<2x128xf32>
    %182 = arith.mulf %137, %181 : vector<2x128xf32>
    %183 = vector.broadcast %168 : vector<1x128xf32> to vector<2x128xf32>
    %184 = arith.addf %182, %183 : vector<2x128xf32>
    %cst_82 = arith.constant 0.000000e+00 : f32
    %185 = vector.broadcast %cst_82 : f32 to vector<2x128xf32>
    %186 = arith.maximumf %184, %185 : vector<2x128xf32>
    %187 = vector.broadcast %166 : vector<1x128xf32> to vector<2x128xf32>
    %188 = arith.mulf %140, %187 : vector<2x128xf32>
    %189 = vector.broadcast %168 : vector<1x128xf32> to vector<2x128xf32>
    %190 = arith.addf %188, %189 : vector<2x128xf32>
    %cst_83 = arith.constant 0.000000e+00 : f32
    %191 = vector.broadcast %cst_83 : f32 to vector<2x128xf32>
    %192 = arith.maximumf %190, %191 : vector<2x128xf32>
    %c3_84 = arith.constant 3 : index
    %c0_85 = arith.constant 0 : index
    %c0_86 = arith.constant 0 : index
    %193 = vector.load %arg10[%c3_84, %c0_85, %c0_86] : memref<4x128x64xf32, #tpu.memory_space<vmem>>, vector<1x128x64xf32>
    %194 = vector.shape_cast %193 : vector<1x128x64xf32> to vector<128x64xf32>
    %cst_87 = arith.constant dense<0.000000e+00> : vector<2x64xf32>
    %195 = tpu.matmul %174, %194, %cst_87 {dimension_numbers = #tpu.dot_dimension_numbers<[1], [0], [0], [1], [0, 0, 1, 1], [], []>} : vector<2x128xf32>, vector<128x64xf32>, vector<2x64xf32> -> vector<2x64xf32>
    %c2_88 = arith.constant 2 : index
    %c0_89 = arith.constant 0 : index
    %c0_90 = arith.constant 0 : index
    %196 = vector.load %arg10[%c2_88, %c0_89, %c0_90] : memref<4x128x64xf32, #tpu.memory_space<vmem>>, vector<1x128x64xf32>
    %197 = vector.shape_cast %196 : vector<1x128x64xf32> to vector<128x64xf32>
    %cst_91 = arith.constant dense<0.000000e+00> : vector<2x64xf32>
    %198 = tpu.matmul %180, %197, %cst_91 {dimension_numbers = #tpu.dot_dimension_numbers<[1], [0], [0], [1], [0, 0, 1, 1], [], []>} : vector<2x128xf32>, vector<128x64xf32>, vector<2x64xf32> -> vector<2x64xf32>
    %c1_92 = arith.constant 1 : index
    %c0_93 = arith.constant 0 : index
    %c0_94 = arith.constant 0 : index
    %199 = vector.load %arg10[%c1_92, %c0_93, %c0_94] : memref<4x128x64xf32, #tpu.memory_space<vmem>>, vector<1x128x64xf32>
    %200 = vector.shape_cast %199 : vector<1x128x64xf32> to vector<128x64xf32>
    %cst_95 = arith.constant dense<0.000000e+00> : vector<2x64xf32>
    %201 = tpu.matmul %186, %200, %cst_95 {dimension_numbers = #tpu.dot_dimension_numbers<[1], [0], [0], [1], [0, 0, 1, 1], [], []>} : vector<2x128xf32>, vector<128x64xf32>, vector<2x64xf32> -> vector<2x64xf32>
    %c0_96 = arith.constant 0 : index
    %c0_97 = arith.constant 0 : index
    %c0_98 = arith.constant 0 : index
    %202 = vector.load %arg10[%c0_96, %c0_97, %c0_98] : memref<4x128x64xf32, #tpu.memory_space<vmem>>, vector<1x128x64xf32>
    %203 = vector.shape_cast %202 : vector<1x128x64xf32> to vector<128x64xf32>
    %cst_99 = arith.constant dense<0.000000e+00> : vector<2x64xf32>
    %204 = tpu.matmul %192, %203, %cst_99 {dimension_numbers = #tpu.dot_dimension_numbers<[1], [0], [0], [1], [0, 0, 1, 1], [], []>} : vector<2x128xf32>, vector<128x64xf32>, vector<2x64xf32> -> vector<2x64xf32>
    %c0_100 = arith.constant 0 : index
    %c0_101 = arith.constant 0 : index
    %205 = vector.load %arg11[%c0_100, %c0_101] : memref<1x64xf32, #tpu.memory_space<vmem>>, vector<1x64xf32>
    %c0_102 = arith.constant 0 : index
    %c0_103 = arith.constant 0 : index
    %206 = vector.load %arg12[%c0_102, %c0_103] : memref<1x64xf32, #tpu.memory_space<vmem>>, vector<1x64xf32>
    %207 = arith.addf %195, %198 : vector<2x64xf32>
    %208 = arith.addf %207, %201 : vector<2x64xf32>
    %209 = arith.addf %208, %204 : vector<2x64xf32>
    %210 = arith.mulf %195, %195 : vector<2x64xf32>
    %211 = arith.mulf %198, %198 : vector<2x64xf32>
    %212 = arith.addf %210, %211 : vector<2x64xf32>
    %213 = arith.mulf %201, %201 : vector<2x64xf32>
    %214 = arith.addf %212, %213 : vector<2x64xf32>
    %215 = arith.mulf %204, %204 : vector<2x64xf32>
    %216 = arith.addf %214, %215 : vector<2x64xf32>
    %cst_104 = arith.constant dense<0.000000e+00> : vector<64xf32>
    %217 = vector.multi_reduction <add>, %209, %cst_104 [0] : vector<2x64xf32> to vector<64xf32>
    %218 = vector.shape_cast %217 : vector<64xf32> to vector<1x64xf32>
    %cst_105 = arith.constant 1.250000e-01 : f32
    %219 = vector.broadcast %cst_105 : f32 to vector<1x64xf32>
    %220 = arith.mulf %218, %219 : vector<1x64xf32>
    %cst_106 = arith.constant dense<0.000000e+00> : vector<64xf32>
    %221 = vector.multi_reduction <add>, %216, %cst_106 [0] : vector<2x64xf32> to vector<64xf32>
    %222 = vector.shape_cast %221 : vector<64xf32> to vector<1x64xf32>
    %cst_107 = arith.constant 1.250000e-01 : f32
    %223 = vector.broadcast %cst_107 : f32 to vector<1x64xf32>
    %224 = arith.mulf %222, %223 : vector<1x64xf32>
    %225 = arith.mulf %220, %220 : vector<1x64xf32>
    %226 = arith.subf %224, %225 : vector<1x64xf32>
    %cst_108 = arith.constant 9.99999974E-6 : f32
    %227 = vector.broadcast %cst_108 : f32 to vector<1x64xf32>
    %228 = arith.addf %226, %227 : vector<1x64xf32>
    %229 = math.rsqrt %228 : vector<1x64xf32>
    %230 = arith.mulf %205, %229 : vector<1x64xf32>
    %231 = arith.mulf %220, %230 : vector<1x64xf32>
    %232 = arith.subf %206, %231 : vector<1x64xf32>
    %233 = vector.broadcast %230 : vector<1x64xf32> to vector<2x64xf32>
    %234 = arith.mulf %195, %233 : vector<2x64xf32>
    %235 = vector.broadcast %232 : vector<1x64xf32> to vector<2x64xf32>
    %236 = arith.addf %234, %235 : vector<2x64xf32>
    %cst_109 = arith.constant 0.000000e+00 : f32
    %237 = vector.broadcast %cst_109 : f32 to vector<2x64xf32>
    %238 = arith.maximumf %236, %237 : vector<2x64xf32>
    %239 = vector.broadcast %230 : vector<1x64xf32> to vector<2x64xf32>
    %240 = arith.mulf %198, %239 : vector<2x64xf32>
    %241 = vector.broadcast %232 : vector<1x64xf32> to vector<2x64xf32>
    %242 = arith.addf %240, %241 : vector<2x64xf32>
    %cst_110 = arith.constant 0.000000e+00 : f32
    %243 = vector.broadcast %cst_110 : f32 to vector<2x64xf32>
    %244 = arith.maximumf %242, %243 : vector<2x64xf32>
    %245 = vector.broadcast %230 : vector<1x64xf32> to vector<2x64xf32>
    %246 = arith.mulf %201, %245 : vector<2x64xf32>
    %247 = vector.broadcast %232 : vector<1x64xf32> to vector<2x64xf32>
    %248 = arith.addf %246, %247 : vector<2x64xf32>
    %cst_111 = arith.constant 0.000000e+00 : f32
    %249 = vector.broadcast %cst_111 : f32 to vector<2x64xf32>
    %250 = arith.maximumf %248, %249 : vector<2x64xf32>
    %251 = vector.broadcast %230 : vector<1x64xf32> to vector<2x64xf32>
    %252 = arith.mulf %204, %251 : vector<2x64xf32>
    %253 = vector.broadcast %232 : vector<1x64xf32> to vector<2x64xf32>
    %254 = arith.addf %252, %253 : vector<2x64xf32>
    %cst_112 = arith.constant 0.000000e+00 : f32
    %255 = vector.broadcast %cst_112 : f32 to vector<2x64xf32>
    %256 = arith.maximumf %254, %255 : vector<2x64xf32>
    %c3_113 = arith.constant 3 : index
    %c0_114 = arith.constant 0 : index
    %c0_115 = arith.constant 0 : index
    %257 = vector.load %arg13[%c3_113, %c0_114, %c0_115] : memref<4x1x64xf32, #tpu.memory_space<vmem>>, vector<1x1x64xf32>
    %258 = vector.shape_cast %257 : vector<1x1x64xf32> to vector<1x64xf32>
    %259 = vector.broadcast %258 : vector<1x64xf32> to vector<2x64xf32>
    %260 = arith.mulf %238, %259 : vector<2x64xf32>
    %cst_116 = arith.constant dense<0.000000e+00> : vector<2xf32>
    %261 = vector.multi_reduction <add>, %260, %cst_116 [1] : vector<2x64xf32> to vector<2xf32>
    %262 = vector.shape_cast %261 : vector<2xf32> to vector<2x1xf32>
    %263 = math.tanh %262 : vector<2x1xf32>
    %c0_117 = arith.constant 0 : index
    %c0_118 = arith.constant 0 : index
    %264 = vector.load %arg14[%c0_117, %c0_118] : memref<2x4xf32, #tpu.memory_space<vmem>>, vector<2x1xf32>
    tpu.vector_store %arg14[%c0_117, %c0_118], %263 {strides = array<i32>} : memref<2x4xf32, #tpu.memory_space<vmem>>, vector<2x1xf32>,
    %c2_119 = arith.constant 2 : index
    %c0_120 = arith.constant 0 : index
    %c0_121 = arith.constant 0 : index
    %265 = vector.load %arg13[%c2_119, %c0_120, %c0_121] : memref<4x1x64xf32, #tpu.memory_space<vmem>>, vector<1x1x64xf32>
    %266 = vector.shape_cast %265 : vector<1x1x64xf32> to vector<1x64xf32>
    %267 = vector.broadcast %266 : vector<1x64xf32> to vector<2x64xf32>
    %268 = arith.mulf %244, %267 : vector<2x64xf32>
    %cst_122 = arith.constant dense<0.000000e+00> : vector<2xf32>
    %269 = vector.multi_reduction <add>, %268, %cst_122 [1] : vector<2x64xf32> to vector<2xf32>
    %270 = vector.shape_cast %269 : vector<2xf32> to vector<2x1xf32>
    %271 = math.tanh %270 : vector<2x1xf32>
    %c0_123 = arith.constant 0 : index
    %c1_124 = arith.constant 1 : index
    %272 = vector.load %arg14[%c0_123, %c1_124] : memref<2x4xf32, #tpu.memory_space<vmem>>, vector<2x1xf32>
    tpu.vector_store %arg14[%c0_123, %c1_124], %271 {strides = array<i32>} : memref<2x4xf32, #tpu.memory_space<vmem>>, vector<2x1xf32>,
    %c1_125 = arith.constant 1 : index
    %c0_126 = arith.constant 0 : index
    %c0_127 = arith.constant 0 : index
    %273 = vector.load %arg13[%c1_125, %c0_126, %c0_127] : memref<4x1x64xf32, #tpu.memory_space<vmem>>, vector<1x1x64xf32>
    %274 = vector.shape_cast %273 : vector<1x1x64xf32> to vector<1x64xf32>
    %275 = vector.broadcast %274 : vector<1x64xf32> to vector<2x64xf32>
    %276 = arith.mulf %250, %275 : vector<2x64xf32>
    %cst_128 = arith.constant dense<0.000000e+00> : vector<2xf32>
    %277 = vector.multi_reduction <add>, %276, %cst_128 [1] : vector<2x64xf32> to vector<2xf32>
    %278 = vector.shape_cast %277 : vector<2xf32> to vector<2x1xf32>
    %279 = math.tanh %278 : vector<2x1xf32>
    %c0_129 = arith.constant 0 : index
    %c2_130 = arith.constant 2 : index
    %280 = vector.load %arg14[%c0_129, %c2_130] : memref<2x4xf32, #tpu.memory_space<vmem>>, vector<2x1xf32>
    tpu.vector_store %arg14[%c0_129, %c2_130], %279 {strides = array<i32>} : memref<2x4xf32, #tpu.memory_space<vmem>>, vector<2x1xf32>,
    %c0_131 = arith.constant 0 : index
    %c0_132 = arith.constant 0 : index
    %c0_133 = arith.constant 0 : index
    %281 = vector.load %arg13[%c0_131, %c0_132, %c0_133] : memref<4x1x64xf32, #tpu.memory_space<vmem>>, vector<1x1x64xf32>
    %282 = vector.shape_cast %281 : vector<1x1x64xf32> to vector<1x64xf32>
    %283 = vector.broadcast %282 : vector<1x64xf32> to vector<2x64xf32>
    %284 = arith.mulf %256, %283 : vector<2x64xf32>
    %cst_134 = arith.constant dense<0.000000e+00> : vector<2xf32>
    %285 = vector.multi_reduction <add>, %284, %cst_134 [1] : vector<2x64xf32> to vector<2xf32>
    %286 = vector.shape_cast %285 : vector<2xf32> to vector<2x1xf32>
    %287 = math.tanh %286 : vector<2x1xf32>
    %c0_135 = arith.constant 0 : index
    %c3_136 = arith.constant 3 : index
    %288 = vector.load %arg14[%c0_135, %c3_136] : memref<2x4xf32, #tpu.memory_space<vmem>>, vector<2x1xf32>
    tpu.vector_store %arg14[%c0_135, %c3_136], %287 {strides = array<i32>} : memref<2x4xf32, #tpu.memory_space<vmem>>, vector<2x1xf32>,
    return
  }
}

</mosaic_0001>

<bundles_post_ra>
// kernel: generator_forward_pallas.1
= control target key start
LH: loop header
LB: loop body
LE: loop exit
PB: predicated region body
PF: predicated region fallthrough
CT: control target
= control target key end

     0   :  { %19 = vsyncpa [#allocation3], 0  ;;  %s5781_s0 = inlined_call_operand.hbm [shape: f32[2,64], index: 0, kind: input, shape index: {}]   ;;  %s5782_s1 = inlined_call_operand.hbm [shape: f32[4,64,512], index: 1, kind: input, shape index: {}]   ;;  %s5783_s2 = inlined_call_operand.hbm [shape: f32[1,512], index: 2, kind: input, shape index: {}]   ;;  %s5784_s3 = inlined_call_operand.hbm [shape: f32[1,512], index: 3, kind: input, shape index: {}]   ;;  %s5785_s4 = inlined_call_operand.hbm [shape: f32[4,512,256], index: 4, kind: input, shape index: {}]   ;;  %s5786_s5 = inlined_call_operand.hbm [shape: f32[1,256], index: 5, kind: input, shape index: {}]   ;;  %s5787_s6 = inlined_call_operand.hbm [shape: f32[1,256], index: 6, kind: input, shape index: {}]   ;;  %s5788_s7 = inlined_call_operand.hbm [shape: f32[4,256,128], index: 7, kind: input, shape index: {}]   ;;  %s5789_s8 = inlined_call_operand.hbm [shape: f32[1,128], index: 8, kind: input, shape index: {}]   ;;  %s5790_s9 = inlined_call_operand.hbm [shape: f32[1,128], index: 9, kind: input, shape index: {}]   ;;  %s5791_s10 = inlined_call_operand.vmem [shape: f32[4,128,64], index: 10, kind: input, shape index: {}]   ;;  %s5792_s11 = inlined_call_operand.hbm [shape: f32[1,64], index: 11, kind: input, shape index: {}]   ;;  %s5793_s12 = inlined_call_operand.hbm [shape: f32[1,64], index: 12, kind: input, shape index: {}]   ;;  %s5794_s13 = inlined_call_operand.hbm [shape: f32[4,1,64], index: 13, kind: input, shape index: {}]   ;;  %s5795_s14 = inlined_call_operand.vmem [shape: f32[2,4], index: 14, kind: output, shape index: {}]  }
   0x1   :  { %20 = vsyncpa [#allocation5], 0 }
   0x2   :  { %21 = vsyncpa [#allocation8], 0 }
   0x3   :  { %22 = vsyncpa [#allocation11], 0 }
   0x4   :  { %23 = vsyncpa [#allocation14], 0 }
   0x5   :  { %24 = vsyncpa [#allocation17], 0 }
   0x6   :  { %25 = vsyncpa [#allocation20], 0  ;;  %s4992_s29 = smov [#allocation4]   ;;  %s4692_s17 = scalar_lea.hbm %s5782_s1, 16384 }
   0x7   :  { %s41_s30 = sshll.u32 %s4992_s29, 4  ;;  %p4693_p0 = scmp.ne.s32.totalorder %s5782_s1, %s4692_s17  ;;  %s42_s30 = int_to_ptr.vmem [resolvable:$true] %s41_s30 }
   0x8   :  { %p4696_p1 = scmp.lt.u32.totalorder %s4692_s17, %s5782_s1 }
   0xa   :  { %p4698_p2 = pnand %p4696_p1, %p4693_p0 }
   0xc   :  { %4701 = shalt.err (!%p4698_p2)
}
   0xd   :  { %s4702_s22 = scalar_lea.vmem %s42_s30, 16384  ;;  %p4707_p4 = scmp.lt.s32.totalorder %s42_s30, %s42_s30 }
   0xe   :  { %p4703_p3 = scmp.ne.s32.totalorder %s42_s30, %s4702_s22  ;;  %p4708_p5 = scmp.lt.s32.totalorder %s4702_s22, %s4702_s22 }
  0x10   :  { %p4709_p6 = por %p4708_p5, %p4707_p4 }
  0x12   :  { %p4710_p7 = pnand %p4709_p6, %p4703_p3 }
  0x14   :  { %4713 = shalt.err (!%p4710_p7)
}
  0x15   :  { %s4993_s23 = smov 512   ;;  %s4994_s24 = smov 32  }
  0x16   :  { %47 = dma.hbm_to_vmem [thread:$0]  %s5782_s1, 16384, %s42_s30, [#allocation5], %s4993_s23, %s4993_s23, %s4994_s24  }
  0x17   :  { %s4995_s27 = smov [#allocation7]   ;;  %s4996_s29 = smov [#allocation10]  }
  0x18   :  { %s64_s28 = sshll.u32 %s4995_s27, 4  ;;  %s86_s15 = sshll.u32 %s4996_s29, 4  ;;  %s65_s28 = int_to_ptr.vmem [resolvable:$true] %s64_s28  ;;  %s87_s15 = int_to_ptr.vmem [resolvable:$true] %s86_s15 }
  0x19   :  { %s4714_s18 = scalar_lea.hbm %s5784_s3, 64 }
  0x1a   :  { %p4715_p8 = scmp.ne.s32.totalorder %s5784_s3, %s4714_s18  ;;  %p4718_p9 = scmp.lt.u32.totalorder %s4714_s18, %s5784_s3 }
  0x1c   :  { %p4720_p10 = pnand %p4718_p9, %p4715_p8 }
  0x1e   :  { %4723 = shalt.err (!%p4720_p10)
}
  0x1f   :  { %s4724_s1 = scalar_lea.vmem %s65_s28, 64  ;;  %p4729_p12 = scmp.lt.s32.totalorder %s65_s28, %s65_s28 }
  0x20   :  { %p4725_p11 = scmp.ne.s32.totalorder %s65_s28, %s4724_s1  ;;  %p4730_p13 = scmp.lt.s32.totalorder %s4724_s1, %s4724_s1 }
  0x22   :  { %p4731_p0 = por %p4730_p13, %p4729_p12 }
  0x24   :  { %p4732_p1 = pnand %p4731_p0, %p4725_p11 }
  0x26   :  { %4735 = shalt.err (!%p4732_p1)
}
  0x27   :  { %67 = dma.hbm_to_vmem [thread:$0]  %s5784_s3, 64, %s65_s28, [#allocation8]  }
  0x28   :  { %s4736_s26 = scalar_lea.hbm %s5786_s5, 32 }
  0x29   :  { %p4737_p2 = scmp.ne.s32.totalorder %s5786_s5, %s4736_s26  ;;  %p4740_p3 = scmp.lt.u32.totalorder %s4736_s26, %s5786_s5 }
  0x2b   :  { %p4742_p4 = pnand %p4740_p3, %p4737_p2 }
  0x2d   :  { %4745 = shalt.err (!%p4742_p4)
}
  0x2e   :  { %s4746_s18 = scalar_lea.vmem %s87_s15, 32  ;;  %p4751_p6 = scmp.lt.s32.totalorder %s87_s15, %s87_s15 }
  0x2f   :  { %p4747_p5 = scmp.ne.s32.totalorder %s87_s15, %s4746_s18  ;;  %p4752_p7 = scmp.lt.s32.totalorder %s4746_s18, %s4746_s18 }
  0x31   :  { %p4753_p8 = por %p4752_p7, %p4751_p6 }
  0x33   :  { %p4754_p9 = pnand %p4753_p8, %p4747_p5 }
  0x35   :  { %4757 = shalt.err (!%p4754_p9)
}
  0x36   :  { %89 = dma.hbm_to_vmem [thread:$0]  %s5786_s5, 32, %s87_s15, [#allocation11]  }
  0x37   :  { %s4997_s19 = smov [#allocation13]   ;;  %s4758_s1 = scalar_lea.hbm %s5788_s7, 16384 }
  0x38   :  { %s105_s20 = sshll.u32 %s4997_s19, 4  ;;  %p4759_p10 = scmp.ne.s32.totalorder %s5788_s7, %s4758_s1  ;;  %s106_s20 = int_to_ptr.vmem [resolvable:$true] %s105_s20 }
  0x39   :  { %p4762_p11 = scmp.lt.u32.totalorder %s4758_s1, %s5788_s7 }
  0x3b   :  { %p4764_p12 = pnand %p4762_p11, %p4759_p10 }
  0x3d   :  { %4767 = shalt.err (!%p4764_p12)
}
  0x3e   :  { %s4768_s26 = scalar_lea.vmem %s106_s20, 16384  ;;  %p4773_p0 = scmp.lt.s32.totalorder %s106_s20, %s106_s20 }
  0x3f   :  { %p4769_p13 = scmp.ne.s32.totalorder %s106_s20, %s4768_s26  ;;  %p4774_p1 = scmp.lt.s32.totalorder %s4768_s26, %s4768_s26 }
  0x41   :  { %p4775_p2 = por %p4774_p1, %p4773_p0 }
  0x43   :  { %p4776_p3 = pnand %p4775_p2, %p4769_p13 }
  0x45   :  { %4779 = shalt.err (!%p4776_p3)
}
  0x46   :  { %s4998_s5 = smov 128   ;;  %s4999_s15 = smov 8  }
  0x47   :  { %111 = dma.hbm_to_vmem [thread:$0]  %s5788_s7, 16384, %s106_s20, [#allocation14], %s4998_s5, %s4998_s5, %s4999_s15  }
  0x48   :  { %s5000_s16 = smov [#allocation16]   ;;  %s5001_s18 = smov [#allocation19]  }
  0x49   :  { %s128_s17 = sshll.u32 %s5000_s16, 4  ;;  %s150_s3 = sshll.u32 %s5001_s18, 4  ;;  %s129_s17 = int_to_ptr.vmem [resolvable:$true] %s128_s17  ;;  %s151_s3 = int_to_ptr.vmem [resolvable:$true] %s150_s3 }
  0x4a   :  { %s4780_s21 = scalar_lea.hbm %s5790_s9, 16 }
  0x4b   :  { %p4781_p4 = scmp.ne.s32.totalorder %s5790_s9, %s4780_s21  ;;  %p4784_p5 = scmp.lt.u32.totalorder %s4780_s21, %s5790_s9 }
  0x4d   :  { %p4786_p6 = pnand %p4784_p5, %p4781_p4 }
  0x4f   :  { %4789 = shalt.err (!%p4786_p6)
}
  0x50   :  { %s4790_s7 = scalar_lea.vmem %s129_s17, 16  ;;  %s4794_s20 = scalar_lea.vmem %s129_s17, 32 }
  0x51   :  { %p4791_p7 = scmp.ne.s32.totalorder %s129_s17, %s4790_s7  ;;  %p4795_p8 = scmp.lt.s32.totalorder %s129_s17, %s129_s17 }
  0x52   :  { %p4796_p9 = scmp.lt.s32.totalorder %s4794_s20, %s4790_s7 }
  0x54   :  { %p4797_p10 = por %p4796_p9, %p4795_p8 }
  0x56   :  { %p4798_p11 = pnand %p4797_p10, %p4791_p7 }
  0x58   :  { %4801 = shalt.err (!%p4798_p11)
}
  0x59   :  { %131 = dma.hbm_to_vmem [thread:$0]  %s5790_s9, 16, %s129_s17, [#allocation17]  }
  0x5a   :  { %s4802_s15 = scalar_lea.hbm %s5793_s12, 16 }
  0x5b   :  { %p4803_p12 = scmp.ne.s32.totalorder %s5793_s12, %s4802_s15  ;;  %p4806_p13 = scmp.lt.u32.totalorder %s4802_s15, %s5793_s12 }
  0x5d   :  { %p4808_p0 = pnand %p4806_p13, %p4803_p12 }
  0x5f   :  { %4811 = shalt.err (!%p4808_p0)
}
  0x60   :  { %s4812_s28 = scalar_lea.vmem %s151_s3, 16  ;;  %s4816_s19 = scalar_lea.vmem %s151_s3, 32 }
  0x61   :  { %p4813_p1 = scmp.ne.s32.totalorder %s151_s3, %s4812_s28  ;;  %p4817_p2 = scmp.lt.s32.totalorder %s151_s3, %s151_s3 }
  0x62   :  { %p4818_p3 = scmp.lt.s32.totalorder %s4816_s19, %s4812_s28 }
  0x64   :  { %p4819_p4 = por %p4818_p3, %p4817_p2 }
  0x66   :  { %p4820_p5 = pnand %p4819_p4, %p4813_p1 }
  0x68   :  { %4823 = shalt.err (!%p4820_p5)
}
  0x69   :  { %153 = dma.hbm_to_vmem [thread:$0]  %s5793_s12, 16, %s151_s3, [#allocation20]  }
  0x6a   :  { %s5002_s21 = smov [#allocation2]   ;;  %s5003_s1 = smov [#allocation6]  }
  0x6b   :  { %s32_s22 = sshll.u32 %s5002_s21, 4  ;;  %s54_s30 = sshll.u32 %s5003_s1, 4  ;;  %s33_s22 = int_to_ptr.vmem [resolvable:$true] %s32_s22  ;;  %s55_s30 = int_to_ptr.vmem [resolvable:$true] %s54_s30 }
  0x6c   :  { %s4824_s20 = scalar_lea.hbm %s5781_s0, 32 }
  0x6d   :  { %p4825_p6 = scmp.ne.s32.totalorder %s5781_s0, %s4824_s20  ;;  %p4828_p7 = scmp.lt.u32.totalorder %s4824_s20, %s5781_s0 }
  0x6f   :  { %p4830_p8 = pnand %p4828_p7, %p4825_p6 }
  0x71   :  { %4833 = shalt.err (!%p4830_p8)
}
  0x72   :  { %s4834_s12 = scalar_lea.vmem %s33_s22, 32  ;;  %p4839_p10 = scmp.lt.s32.totalorder %s33_s22, %s33_s22 }
  0x73   :  { %p4835_p9 = scmp.ne.s32.totalorder %s33_s22, %s4834_s12  ;;  %p4840_p11 = scmp.lt.s32.totalorder %s4834_s12, %s4834_s12 }
  0x75   :  { %p4841_p12 = por %p4840_p11, %p4839_p10 }
  0x77   :  { %p4842_p13 = pnand %p4841_p12, %p4835_p9 }
  0x79   :  { %4845 = shalt.err (!%p4842_p13)
}
  0x7a   :  { %35 = dma.hbm_to_vmem [thread:$0]  %s5781_s0, 32, %s33_s22, [#allocation3]  }
  0x7b   :  { %s4846_s16 = scalar_lea.hbm %s5783_s2, 64 }
  0x7c   :  { %p4847_p0 = scmp.ne.s32.totalorder %s5783_s2, %s4846_s16  ;;  %p4850_p1 = scmp.lt.u32.totalorder %s4846_s16, %s5783_s2 }
  0x7e   :  { %p4852_p2 = pnand %p4850_p1, %p4847_p0 }
  0x80   :  { %4855 = shalt.err (!%p4852_p2)
}
  0x81   :  { %s4856_s17 = scalar_lea.vmem %s55_s30, 64  ;;  %p4861_p4 = scmp.lt.s32.totalorder %s55_s30, %s55_s30 }
  0x82   :  { %p4857_p3 = scmp.ne.s32.totalorder %s55_s30, %s4856_s17  ;;  %p4862_p5 = scmp.lt.s32.totalorder %s4856_s17, %s4856_s17 }
  0x84   :  { %p4863_p6 = por %p4862_p5, %p4861_p4 }
  0x86   :  { %p4864_p7 = pnand %p4863_p6, %p4857_p3 }
  0x88   :  { %4867 = shalt.err (!%p4864_p7)
}
  0x89   :  { %57 = dma.hbm_to_vmem [thread:$0]  %s5783_s2, 64, %s55_s30, [#allocation5]  }
  0x8a   :  { %s5004_s22 = smov [#allocation9]   ;;  %s4868_s20 = scalar_lea.hbm %s5785_s4, 65536 }
  0x8b   :  { %s73_s1 = sshll.u32 %s5004_s22, 4  ;;  %p4869_p8 = scmp.ne.s32.totalorder %s5785_s4, %s4868_s20  ;;  %s74_s1 = int_to_ptr.vmem [resolvable:$true] %s73_s1 }
  0x8c   :  { %p4872_p9 = scmp.lt.u32.totalorder %s4868_s20, %s5785_s4 }
  0x8e   :  { %p4874_p10 = pnand %p4872_p9, %p4869_p8 }
  0x90   :  { %4877 = shalt.err (!%p4874_p10)
}
  0x91   :  { %s4878_s12 = scalar_lea.vmem %s74_s1, 65536  ;;  %p4883_p12 = scmp.lt.s32.totalorder %s74_s1, %s74_s1 }
  0x92   :  { %p4879_p11 = scmp.ne.s32.totalorder %s74_s1, %s4878_s12  ;;  %p4884_p13 = scmp.lt.s32.totalorder %s4878_s12, %s4878_s12 }
  0x94   :  { %p4885_p0 = por %p4884_p13, %p4883_p12 }
  0x96   :  { %p4886_p1 = pnand %p4885_p0, %p4879_p11 }
  0x98   :  { %4889 = shalt.err (!%p4886_p1)
}
  0x99   :  { %s5005_s2 = smov 256   ;;  %s5006_s30 = smov 16  }
  0x9a   :  { %79 = dma.hbm_to_vmem [thread:$0]  %s5785_s4, 65536, %s74_s1, [#allocation8], %s5005_s2, %s5005_s2, %s5006_s30  }
  0x9b   :  { %s5007_s27 = smov [#allocation12]   ;;  %s5008_s16 = smov [#allocation15]  }
  0x9c   :  { %s96_s29 = sshll.u32 %s5007_s27, 4  ;;  %s118_s18 = sshll.u32 %s5008_s16, 4  ;;  %s97_s29 = int_to_ptr.vmem [resolvable:$true] %s96_s29  ;;  %s119_s18 = int_to_ptr.vmem [resolvable:$true] %s118_s18 }
  0x9d   :  { %s4890_s9 = scalar_lea.hbm %s5787_s6, 32 }
  0x9e   :  { %p4891_p2 = scmp.ne.s32.totalorder %s5787_s6, %s4890_s9  ;;  %p4894_p3 = scmp.lt.u32.totalorder %s4890_s9, %s5787_s6 }
  0xa0   :  { %p4896_p4 = pnand %p4894_p3, %p4891_p2 }
  0xa2   :  { %4899 = shalt.err (!%p4896_p4)
}
  0xa3   :  { %s4900_s4 = scalar_lea.vmem %s97_s29, 32  ;;  %p4905_p6 = scmp.lt.s32.totalorder %s97_s29, %s97_s29 }
  0xa4   :  { %p4901_p5 = scmp.ne.s32.totalorder %s97_s29, %s4900_s4  ;;  %p4906_p7 = scmp.lt.s32.totalorder %s4900_s4, %s4900_s4 }
  0xa6   :  { %p4907_p8 = por %p4906_p7, %p4905_p6 }
  0xa8   :  { %p4908_p9 = pnand %p4907_p8, %p4901_p5 }
  0xaa   :  { %4911 = shalt.err (!%p4908_p9)
}
  0xab   :  { %99 = dma.hbm_to_vmem [thread:$0]  %s5787_s6, 32, %s97_s29, [#allocation11]  }
  0xac   :  { %s4912_s24 = scalar_lea.hbm %s5789_s8, 16 }
  0xad   :  { %p4913_p10 = scmp.ne.s32.totalorder %s5789_s8, %s4912_s24  ;;  %p4916_p11 = scmp.lt.u32.totalorder %s4912_s24, %s5789_s8 }
  0xaf   :  { %p4918_p12 = pnand %p4916_p11, %p4913_p10 }
  0xb1   :  { %4921 = shalt.err (!%p4918_p12)
}
  0xb2   :  { %s4922_s2 = scalar_lea.vmem %s119_s18, 16  ;;  %s4926_s3 = scalar_lea.vmem %s119_s18, 32 }
  0xb3   :  { %p4923_p13 = scmp.ne.s32.totalorder %s119_s18, %s4922_s2  ;;  %p4927_p0 = scmp.lt.s32.totalorder %s119_s18, %s119_s18 }
  0xb4   :  { %p4928_p1 = scmp.lt.s32.totalorder %s4926_s3, %s4922_s2 }
  0xb6   :  { %p4929_p2 = por %p4928_p1, %p4927_p0 }
  0xb8   :  { %p4930_p3 = pnand %p4929_p2, %p4923_p13 }
  0xba   :  { %4933 = shalt.err (!%p4930_p3)
}
  0xbb   :  { %121 = dma.hbm_to_vmem [thread:$0]  %s5789_s8, 16, %s119_s18, [#allocation14]  }
  0xbc   :  { %s5009_s27 = smov [#allocation18]   ;;  %s5010_s16 = smov [#allocation21]  }
  0xbd   :  { %s140_s29 = sshll.u32 %s5009_s27, 4  ;;  %s159_s28 = sshll.u32 %s5010_s16, 4  ;;  %s141_s29 = int_to_ptr.vmem [resolvable:$true] %s140_s29  ;;  %s160_s28 = int_to_ptr.vmem [resolvable:$true] %s159_s28 }
  0xbe   :  { %s4934_s17 = scalar_lea.hbm %s5792_s11, 16 }
  0xbf   :  { %p4935_p4 = scmp.ne.s32.totalorder %s5792_s11, %s4934_s17  ;;  %p4938_p5 = scmp.lt.u32.totalorder %s4934_s17, %s5792_s11 }
  0xc1   :  { %p4940_p6 = pnand %p4938_p5, %p4935_p4 }
  0xc3   :  { %4943 = shalt.err (!%p4940_p6)
}
  0xc4   :  { %s4944_s8 = scalar_lea.vmem %s141_s29, 16  ;;  %s4948_s18 = scalar_lea.vmem %s141_s29, 32 }
  0xc5   :  { %p4945_p7 = scmp.ne.s32.totalorder %s141_s29, %s4944_s8  ;;  %p4949_p8 = scmp.lt.s32.totalorder %s141_s29, %s141_s29 }
  0xc6   :  { %p4950_p9 = scmp.lt.s32.totalorder %s4948_s18, %s4944_s8 }
  0xc8   :  { %p4951_p10 = por %p4950_p9, %p4949_p8 }
  0xca   :  { %p4952_p11 = pnand %p4951_p10, %p4945_p7 }
  0xcc   :  { %4955 = shalt.err (!%p4952_p11)
}
  0xcd   :  { %143 = dma.hbm_to_vmem [thread:$0]  %s5792_s11, 16, %s141_s29, [#allocation17]  }
  0xce   :  { %s4956_s24 = scalar_lea.hbm %s5794_s13, 64 }
  0xcf   :  { %p4957_p12 = scmp.ne.s32.totalorder %s5794_s13, %s4956_s24  ;;  %p4960_p13 = scmp.lt.u32.totalorder %s4956_s24, %s5794_s13 }
  0xd1   :  { %p4962_p0 = pnand %p4960_p13, %p4957_p12 }
  0xd3   :  { %4965 = shalt.err (!%p4962_p0)
}
  0xd4   :  { %s4966_s2 = scalar_lea.vmem %s160_s28, 64  ;;  %p4971_p2 = scmp.lt.s32.totalorder %s160_s28, %s160_s28 }
  0xd5   :  { %p4967_p1 = scmp.ne.s32.totalorder %s160_s28, %s4966_s2  ;;  %p4972_p3 = scmp.lt.s32.totalorder %s4966_s2, %s4966_s2 }
  0xd7   :  { %p4973_p4 = por %p4972_p3, %p4971_p2 }
  0xd9   :  { %p4974_p5 = pnand %p4973_p4, %p4967_p1 }
  0xdb   :  { %4977 = shalt.err (!%p4974_p5)
}
  0xdc   :  { %s5011_s11 = smov 1  }
  0xdd   :  { %165 = dma.hbm_to_vmem [thread:$0]  %s5794_s13, 64, %s160_s28, [#allocation20], %s5006_s30, %s5006_s30, %s5011_s11  }
  0xde   :  { %4978 = dma.done.wait [#allocation3], 32  }
  0xdf   :  { %4979 = vsyncadd [#allocation3], 4294967264 }
  0xe0   :  { %4980 = dma.done.wait [#allocation5], 16448  }
  0xe1   :  { %4981 = vsyncadd [#allocation5], 4294950848 }
  0xe2   :  { %4982 = dma.done.wait [#allocation8], 65600  }
  0xe3   :  { %4983 = vsyncadd [#allocation8], 4294901696 }
  0xe4   :  { %4984 = dma.done.wait [#allocation11], 64  }
  0xe5   :  { %4985 = vsyncadd [#allocation11], 4294967232 }
  0xe6   :  { %4986 = dma.done.wait [#allocation14], 16400  }
  0xe7   :  { %4987 = vsyncadd [#allocation14], 4294950896 }
  0xe8   :  { %4988 = dma.done.wait [#allocation17], 32  }
  0xe9   :  { %4989 = vsyncadd [#allocation17], 4294967264 }
  0xea   :  { %4990 = dma.done.wait [#allocation20], 80  }
  0xeb   :  { %4991 = vsyncadd [#allocation20], 4294967216  ;;  %v5012_v0 = vmov 0.0   ;;  %v207_v1 = vld [vmem:[#allocation4 + $0x8] sm:$0xff]  ;;  %v209_v3 = vld [vmem:[#allocation4 + $0x18] sm:$0xff]  ;;  %vm238_vm0 = vcmask 523264  }
  0xec   :  { %306 = vmatprep.mubr.f32.mxu0 %v5012_v0  ;;  %377 = vmatprep.mubr.f32.mxu1 %v5012_v0  ;;  %v211_v2 = vld [vmem:[#allocation4 + $0x28] sm:$0xff]  ;;  %v213_v5 = vld [vmem:[#allocation4 + $0x38] sm:$0xff]  ;;  %v206_v6 = vld [vmem:[#allocation4] sm:$0xff]  ;;  %vm951_vm1 = vcmask 1041408   ;;  %vm5015_vm2 = vmmov 0   ;;  %vm3246_vm3 = vcmask 517120  }
  0xed   :  { %v3772_v4 = vpack.c.bf16 %v211_v2, %v207_v1  ;;  %v210_v7 = vld [vmem:[#allocation4 + $0x20] sm:$0xff]  ;;  %v3788_v8 = vpack.c.bf16 %v213_v5, %v209_v3  ;;  %v208_v10 = vld [vmem:[#allocation4 + $0x10] sm:$0xff]  ;;  %v215_v12 = vld [vmem:[#allocation4 + $0x48] sm:$0xff]  ;;  %vm3307_vm4 = vcmask 1024   ;;  %vm3322_vm5 = vcmask 9224  }
  0xee   :  { %v3774_v9 = vpack.c.bf16 %v210_v7, %v206_v6  ;;  %v212_v11 = vld [vmem:[#allocation4 + $0x30] sm:$0xff]  ;;  %v219_v14 = vld [vmem:[#allocation4 + $0x68] sm:$0xff]  ;;  %v217_v15 = vld [vmem:[#allocation4 + $0x58] sm:$0xff]  ;;  %vm3337_vm6 = vcmask 17424   ;;  %vm3351_vm7 = vcmask 25624  }
  0xef   :  { %3773 = vmatprep.subr.bf16.mxu0 %v3772_v4  ;;  %v3790_v13 = vpack.c.bf16 %v212_v11, %v208_v10  ;;  %v221_v16 = vld [vmem:[#allocation4 + $0x78] sm:$0xff]  ;;  %3789 = vmatprep.subr.bf16.mxu1 %v3788_v8  ;;  %v3776_v17 = vpack.c.bf16 %v219_v14, %v215_v12  ;;  %v214_v19 = vld [vmem:[#allocation4 + $0x40] sm:$0xff]  ;;  %v216_v21 = vld [vmem:[#allocation4 + $0x50] sm:$0xff] }
  0xf0   :  { %3775 = vmatpush1.bf16.msra.mxu0 %v3774_v9  ;;  %v3792_v18 = vpack.c.bf16 %v221_v16, %v217_v15  ;;  %v218_v20 = vld [vmem:[#allocation4 + $0x60] sm:$0xff]  ;;  %v220_v23 = vld [vmem:[#allocation4 + $0x70] sm:$0xff]  ;;  %v223_v24 = vld [vmem:[#allocation4 + $0x88] sm:$0xff] }
  0xf1   :  { %3791 = vmatpush1.bf16.msra.mxu1 %v3790_v13  ;;  %v3778_v22 = vpack.c.bf16 %v218_v20, %v214_v19  ;;  %v227_v25 = vld [vmem:[#allocation4 + $0xa8] sm:$0xff]  ;;  %3777 = vmatprep.subr.bf16.mxu0 %v3776_v17  ;;  %v3794_v26 = vpack.c.bf16 %v220_v23, %v216_v21  ;;  %v225_v28 = vld [vmem:[#allocation4 + $0x98] sm:$0xff]  ;;  %v222_v30 = vld [vmem:[#allocation4 + $0x80] sm:$0xff] }
  0xf2   :  { %3793 = vmatprep.subr.bf16.mxu1 %v3792_v18  ;;  %v3780_v27 = vpack.c.bf16 %v227_v25, %v223_v24  ;;  %v229_v29 = vld [vmem:[#allocation4 + $0xb8] sm:$0xff]  ;;  %v226_v32 = vld [vmem:[#allocation4 + $0xa0] sm:$0xff]  ;;  %v224_v33 = vld [vmem:[#allocation4 + $0x90] sm:$0xff] }
  0xf3   :  { %v3796_v31 = vpack.c.bf16 %v229_v29, %v225_v28  ;;  %v228_v34 = vld [vmem:[#allocation4 + $0xb0] sm:$0xff]  ;;  %v3782_v35 = vpack.c.bf16 %v226_v32, %v222_v30  ;;  %v231_v36 = vld [vmem:[#allocation4 + $0xc8] sm:$0xff]  ;;  %v233_v38 = vld [vmem:[#allocation4 + $0xd8] sm:$0xff] }
  0xf4   :  { %3779 = vmatpush1.bf16.msra.mxu0 %v3778_v22  ;;  %v235_v37 = vld [vmem:[#allocation4 + $0xe8] sm:$0xff]  ;;  %v3798_v39 = vpack.c.bf16 %v228_v34, %v224_v33  ;;  %v237_v41 = vld [vmem:[#allocation4 + $0xf8] sm:$0xff]  ;;  %v230_v42 = vld [vmem:[#allocation4 + $0xc0] sm:$0xff] }
  0xf5   :  { %3795 = vmatpush1.bf16.msra.mxu1 %v3794_v26  ;;  %3781 = vmatprep.subr.bf16.mxu0 %v3780_v27  ;;  %v3784_v40 = vpack.c.bf16 %v235_v37, %v231_v36  ;;  %v234_v43 = vld [vmem:[#allocation4 + $0xe0] sm:$0xff]  ;;  %v3800_v44 = vpack.c.bf16 %v237_v41, %v233_v38  ;;  %v232_v45 = vld [vmem:[#allocation4 + $0xd0] sm:$0xff]  ;;  %v386_v47 = vld [vmem:[#allocation4 + $0x108] sm:$0xff] }
  0xf6   :  { %3797 = vmatprep.subr.bf16.mxu1 %v3796_v31  ;;  %v236_v46 = vld [vmem:[#allocation4 + $0xf0] sm:$0xff]  ;;  %v390_v48 = vld [vmem:[#allocation4 + $0x128] sm:$0xff]  ;;  %v388_v49 = vld [vmem:[#allocation4 + $0x118] sm:$0xff]  ;;  %v3786_v50 = vpack.c.bf16 %v234_v43, %v230_v42 }
  0xf7   :  { %v392_v51 = vld [vmem:[#allocation4 + $0x138] sm:$0xff]  ;;  %v3802_v52 = vpack.c.bf16 %v236_v46, %v232_v45  ;;  %v3804_v53 = vpack.c.bf16 %v390_v48, %v386_v47  ;;  %v385_v54 = vld [vmem:[#allocation4 + $0x100] sm:$0xff]  ;;  %v387_v56 = vld [vmem:[#allocation4 + $0x110] sm:$0xff] }
  0xf8   :  { %3783 = vmatpush1.bf16.msra.mxu0 %v3782_v35  ;;  %v389_v55 = vld [vmem:[#allocation4 + $0x120] sm:$0xff]  ;;  %v3820_v57 = vpack.c.bf16 %v392_v51, %v388_v49  ;;  %v391_v58 = vld [vmem:[#allocation4 + $0x130] sm:$0xff]  ;;  %v394_v59 = vld [vmem:[#allocation4 + $0x148] sm:$0xff] }
  0xf9   :  { %3799 = vmatpush1.bf16.msra.mxu1 %v3798_v39  ;;  %3785 = vmatprep.subr.bf16.mxu0 %v3784_v40  ;;  %v398_v60 = vld [vmem:[#allocation4 + $0x168] sm:$0xff]  ;;  %v396_v61 = vld [vmem:[#allocation4 + $0x158] sm:$0xff]  ;;  %v3806_v1 = vpack.c.bf16 %v389_v55, %v385_v54  ;;  %v3822_v2 = vpack.c.bf16 %v391_v58, %v387_v56  ;;  %v393_v4 = vld [vmem:[#allocation4 + $0x140] sm:$0xff] }
  0xfa   :  { %3801 = vmatprep.subr.bf16.mxu1 %v3800_v44  ;;  %v400_v62 = vld [vmem:[#allocation4 + $0x178] sm:$0xff]  ;;  %v3808_v3 = vpack.c.bf16 %v398_v60, %v394_v59  ;;  %v397_v5 = vld [vmem:[#allocation4 + $0x160] sm:$0xff]  ;;  %v395_v6 = vld [vmem:[#allocation4 + $0x150] sm:$0xff] }
  0xfb   :  { %v5252_v63 = vld [vmem:[#allocation2] sm:$0x3]  ;;  %v3824_v7 = vpack.c.bf16 %v400_v62, %v396_v61  ;;  %v399_v8 = vld [vmem:[#allocation4 + $0x170] sm:$0xff]  ;;  %v402_v9 = vld [vmem:[#allocation4 + $0x188] sm:$0xff]  ;;  %v3810_v13 = vpack.c.bf16 %v397_v5, %v393_v4 }
  0xfc   :  { %3787 = vmatpush1.bf16.msra.mxu0 %v3786_v50  ;;  %v406_v10 = vld [vmem:[#allocation4 + $0x1a8] sm:$0xff]  ;;  %v404_v11 = vld [vmem:[#allocation4 + $0x198] sm:$0xff]  ;;  %v3826_v14 = vpack.c.bf16 %v399_v8, %v395_v6  ;;  %v401_v16 = vld [vmem:[#allocation4 + $0x180] sm:$0xff] }
  0xfd   :  { %3803 = vmatpush1.bf16.msra.mxu1 %v3802_v52  ;;  %3805 = vmatprep.subr.bf16.mxu0 %v3804_v53  ;;  %v408_v12 = vld [vmem:[#allocation4 + $0x1b8] sm:$0xff]  ;;  %v3812_v15 = vpack.c.bf16 %v406_v10, %v402_v9  ;;  %v405_v17 = vld [vmem:[#allocation4 + $0x1a0] sm:$0xff]  ;;  %v403_v18 = vld [vmem:[#allocation4 + $0x190] sm:$0xff] }
  0xfe   :  { %3821 = vmatprep.subr.bf16.mxu1 %v3820_v57  ;;  %v3828_v19 = vpack.c.bf16 %v408_v12, %v404_v11  ;;  %v407_v20 = vld [vmem:[#allocation4 + $0x1b0] sm:$0xff]  ;;  %v410_v21 = vld [vmem:[#allocation4 + $0x1c8] sm:$0xff]  ;;  %v412_v23 = vld [vmem:[#allocation4 + $0x1d8] sm:$0xff]  ;;  %v3814_v25 = vpack.c.bf16 %v405_v17, %v401_v16 }
  0xff   :  { %3364 = vmatmul.mubr.msk.f32.vlgmr.msra.gmra.mrb[0].mxu0 %vm238_vm0, %v5252_v63  ;;  %v414_v22 = vld [vmem:[#allocation4 + $0x1e8] sm:$0xff]  ;;  %v416_v24 = vld [vmem:[#allocation4 + $0x1f8] sm:$0xff]  ;;  %v3830_v26 = vpack.c.bf16 %v407_v20, %v403_v18  ;;  %v409_v28 = vld [vmem:[#allocation4 + $0x1c0] sm:$0xff] }
 0x100   :  { %3365 = vmatmul.mubr.msk.f32.vlgmr.msra.gmra.mrb[0].mxu1 %vm238_vm0, %v5252_v63  ;;  %3807 = vmatpush1.bf16.msra.mxu0 %v3806_v1  ;;  %v3816_v27 = vpack.c.bf16 %v414_v22, %v410_v21  ;;  %v413_v29 = vld [vmem:[#allocation4 + $0x1e0] sm:$0xff]  ;;  %v411_v30 = vld [vmem:[#allocation4 + $0x1d0] sm:$0xff]  ;;  %v3832_v31 = vpack.c.bf16 %v416_v24, %v412_v23  ;;  %v561_v33 = vld [vmem:[#allocation4 + $0x208] sm:$0xff] }
 0x101   :  { %3823 = vmatpush1.bf16.msra.mxu1 %v3822_v2  ;;  %3809 = vmatprep.subr.bf16.mxu0 %v3808_v3  ;;  %v415_v32 = vld [vmem:[#allocation4 + $0x1f0] sm:$0xff]  ;;  %v565_v34 = vld [vmem:[#allocation4 + $0x228] sm:$0xff]  ;;  %v563_v35 = vld [vmem:[#allocation4 + $0x218] sm:$0xff]  ;;  %v3818_v37 = vpack.c.bf16 %v413_v29, %v409_v28 }
 0x102   :  { %3825 = vmatprep.subr.bf16.mxu1 %v3824_v7  ;;  %481 = vmatprep.mubr.f32.mxu0 %v5012_v0  ;;  %v567_v36 = vld [vmem:[#allocation4 + $0x238] sm:$0xff]  ;;  %v3834_v38 = vpack.c.bf16 %v415_v32, %v411_v30  ;;  %v3836_v39 = vpack.c.bf16 %v565_v34, %v561_v33  ;;  %v560_v40 = vld [vmem:[#allocation4 + $0x200] sm:$0xff]  ;;  %v562_v42 = vld [vmem:[#allocation4 + $0x210] sm:$0xff] }
 0x103   :  { %552 = vmatprep.mubr.f32.mxu1 %v5012_v0  ;;  %v564_v41 = vld [vmem:[#allocation4 + $0x220] sm:$0xff]  ;;  %v3852_v43 = vpack.c.bf16 %v567_v36, %v563_v35  ;;  %v566_v44 = vld [vmem:[#allocation4 + $0x230] sm:$0xff]  ;;  %v569_v45 = vld [vmem:[#allocation4 + $0x248] sm:$0xff] }
 0x104   :  { %3811 = vmatpush1.bf16.msra.mxu0 %v3810_v13  ;;  %v573_v46 = vld [vmem:[#allocation4 + $0x268] sm:$0xff]  ;;  %v571_v47 = vld [vmem:[#allocation4 + $0x258] sm:$0xff]  ;;  %v3838_v49 = vpack.c.bf16 %v564_v41, %v560_v40  ;;  %v3854_v50 = vpack.c.bf16 %v566_v44, %v562_v42  ;;  %v568_v52 = vld [vmem:[#allocation4 + $0x240] sm:$0xff] }
 0x105   :  { %3827 = vmatpush1.bf16.msra.mxu1 %v3826_v14  ;;  %3813 = vmatprep.subr.bf16.mxu0 %v3812_v15  ;;  %v575_v48 = vld [vmem:[#allocation4 + $0x278] sm:$0xff]  ;;  %v3840_v51 = vpack.c.bf16 %v573_v46, %v569_v45  ;;  %v572_v53 = vld [vmem:[#allocation4 + $0x260] sm:$0xff]  ;;  %v570_v54 = vld [vmem:[#allocation4 + $0x250] sm:$0xff] }
 0x106   :  { %3829 = vmatprep.subr.bf16.mxu1 %v3828_v19  ;;  %v3856_v55 = vpack.c.bf16 %v575_v48, %v571_v47  ;;  %v574_v56 = vld [vmem:[#allocation4 + $0x270] sm:$0xff]  ;;  %v577_v57 = vld [vmem:[#allocation4 + $0x288] sm:$0xff]  ;;  %v579_v59 = vld [vmem:[#allocation4 + $0x298] sm:$0xff]  ;;  %v3842_v61 = vpack.c.bf16 %v572_v53, %v568_v52 }
 0x107   :  { %v581_v58 = vld [vmem:[#allocation4 + $0x2a8] sm:$0xff]  ;;  %v583_v60 = vld [vmem:[#allocation4 + $0x2b8] sm:$0xff]  ;;  %v3858_v62 = vpack.c.bf16 %v574_v56, %v570_v54  ;;  %v576_v2 = vld [vmem:[#allocation4 + $0x280] sm:$0xff] }
 0x108   :  { %3815 = vmatpush1.bf16.msra.mxu0 %v3814_v25  ;;  %v3844_v1 = vpack.c.bf16 %v581_v58, %v577_v57  ;;  %v580_v3 = vld [vmem:[#allocation4 + $0x2a0] sm:$0xff]  ;;  %v578_v4 = vld [vmem:[#allocation4 + $0x290] sm:$0xff]  ;;  %v3860_v5 = vpack.c.bf16 %v583_v60, %v579_v59  ;;  %v585_v7 = vld [vmem:[#allocation4 + $0x2c8] sm:$0xff] }
 0x109   :  { %3831 = vmatpush1.bf16.msra.mxu1 %v3830_v26  ;;  %3817 = vmatprep.subr.bf16.mxu0 %v3816_v27  ;;  %v582_v6 = vld [vmem:[#allocation4 + $0x2b0] sm:$0xff]  ;;  %v589_v8 = vld [vmem:[#allocation4 + $0x2e8] sm:$0xff]  ;;  %v587_v9 = vld [vmem:[#allocation4 + $0x2d8] sm:$0xff]  ;;  %v3846_v11 = vpack.c.bf16 %v580_v3, %v576_v2 }
 0x10a   :  { %3833 = vmatprep.subr.bf16.mxu1 %v3832_v31  ;;  %v591_v10 = vld [vmem:[#allocation4 + $0x2f8] sm:$0xff]  ;;  %v3862_v12 = vpack.c.bf16 %v582_v6, %v578_v4  ;;  %v3848_v13 = vpack.c.bf16 %v589_v8, %v585_v7  ;;  %v584_v14 = vld [vmem:[#allocation4 + $0x2c0] sm:$0xff]  ;;  %v586_v16 = vld [vmem:[#allocation4 + $0x2d0] sm:$0xff] }
 0x10b   :  { %v588_v15 = vld [vmem:[#allocation4 + $0x2e0] sm:$0xff]  ;;  %v3864_v17 = vpack.c.bf16 %v591_v10, %v587_v9  ;;  %v590_v18 = vld [vmem:[#allocation4 + $0x2f0] sm:$0xff]  ;;  %v736_v19 = vld [vmem:[#allocation4 + $0x308] sm:$0xff] }
 0x10c   :  { %3819 = vmatpush1.bf16.msra.mxu0 %v3818_v37  ;;  %v740_v20 = vld [vmem:[#allocation4 + $0x328] sm:$0xff]  ;;  %v738_v21 = vld [vmem:[#allocation4 + $0x318] sm:$0xff]  ;;  %v3850_v23 = vpack.c.bf16 %v588_v15, %v584_v14  ;;  %v3866_v24 = vpack.c.bf16 %v590_v18, %v586_v16  ;;  %v735_v26 = vld [vmem:[#allocation4 + $0x300] sm:$0xff] }
 0x10d   :  { %3835 = vmatpush1.bf16.msra.mxu1 %v3834_v38  ;;  %3837 = vmatprep.subr.bf16.mxu0 %v3836_v39  ;;  %v742_v22 = vld [vmem:[#allocation4 + $0x338] sm:$0xff]  ;;  %v3868_v25 = vpack.c.bf16 %v740_v20, %v736_v19  ;;  %v739_v27 = vld [vmem:[#allocation4 + $0x320] sm:$0xff]  ;;  %v737_v28 = vld [vmem:[#allocation4 + $0x310] sm:$0xff] }
 0x10e   :  { %3853 = vmatprep.subr.bf16.mxu1 %v3852_v43  ;;  %v3884_v29 = vpack.c.bf16 %v742_v22, %v738_v21  ;;  %v741_v30 = vld [vmem:[#allocation4 + $0x330] sm:$0xff]  ;;  %v744_v31 = vld [vmem:[#allocation4 + $0x348] sm:$0xff]  ;;  %v746_v33 = vld [vmem:[#allocation4 + $0x358] sm:$0xff]  ;;  %v3870_v35 = vpack.c.bf16 %v739_v27, %v735_v26 }
 0x10f   :  { %3366 = vmatmul.mubr.msk.f32.vlgmr.msra.gmra.mrb[2].mxu0 %vm238_vm0, %v5252_v63  ;;  %v748_v32 = vld [vmem:[#allocation4 + $0x368] sm:$0xff]  ;;  %v750_v34 = vld [vmem:[#allocation4 + $0x378] sm:$0xff]  ;;  %v3886_v36 = vpack.c.bf16 %v741_v30, %v737_v28  ;;  %v743_v38 = vld [vmem:[#allocation4 + $0x340] sm:$0xff] }
 0x110   :  { %3367 = vmatmul.mubr.msk.f32.vlgmr.msra.gmra.mrb[2].mxu1 %vm238_vm0, %v5252_v63  ;;  %3839 = vmatpush1.bf16.msra.mxu0 %v3838_v49  ;;  %v3872_v37 = vpack.c.bf16 %v748_v32, %v744_v31  ;;  %v747_v39 = vld [vmem:[#allocation4 + $0x360] sm:$0xff]  ;;  %v745_v40 = vld [vmem:[#allocation4 + $0x350] sm:$0xff]  ;;  %v3888_v41 = vpack.c.bf16 %v750_v34, %v746_v33  ;;  %v752_v43 = vld [vmem:[#allocation4 + $0x388] sm:$0xff] }
 0x111   :  { %3855 = vmatpush1.bf16.msra.mxu1 %v3854_v50  ;;  %3841 = vmatprep.subr.bf16.mxu0 %v3840_v51  ;;  %v749_v42 = vld [vmem:[#allocation4 + $0x370] sm:$0xff]  ;;  %v756_v44 = vld [vmem:[#allocation4 + $0x3a8] sm:$0xff]  ;;  %v754_v45 = vld [vmem:[#allocation4 + $0x398] sm:$0xff]  ;;  %v3874_v47 = vpack.c.bf16 %v747_v39, %v743_v38 }
 0x112   :  { %3857 = vmatprep.subr.bf16.mxu1 %v3856_v55  ;;  %656 = vmatprep.mubr.f32.mxu0 %v5012_v0  ;;  %v758_v46 = vld [vmem:[#allocation4 + $0x3b8] sm:$0xff]  ;;  %v3890_v48 = vpack.c.bf16 %v749_v42, %v745_v40  ;;  %v3876_v49 = vpack.c.bf16 %v756_v44, %v752_v43  ;;  %v751_v50 = vld [vmem:[#allocation4 + $0x380] sm:$0xff]  ;;  %v753_v52 = vld [vmem:[#allocation4 + $0x390] sm:$0xff] }
 0x113   :  { %727 = vmatprep.mubr.f32.mxu1 %v5012_v0  ;;  %v755_v51 = vld [vmem:[#allocation4 + $0x3a0] sm:$0xff]  ;;  %v3892_v53 = vpack.c.bf16 %v758_v46, %v754_v45  ;;  %v757_v54 = vld [vmem:[#allocation4 + $0x3b0] sm:$0xff]  ;;  %v760_v55 = vld [vmem:[#allocation4 + $0x3c8] sm:$0xff] }
 0x114   :  { %3843 = vmatpush1.bf16.msra.mxu0 %v3842_v61  ;;  %v764_v56 = vld [vmem:[#allocation4 + $0x3e8] sm:$0xff]  ;;  %v762_v57 = vld [vmem:[#allocation4 + $0x3d8] sm:$0xff]  ;;  %v3878_v59 = vpack.c.bf16 %v755_v51, %v751_v50  ;;  %v3894_v60 = vpack.c.bf16 %v757_v54, %v753_v52  ;;  %v761_v3 = vld [vmem:[#allocation4 + $0x3d0] sm:$0xff] }
 0x115   :  { %3859 = vmatpush1.bf16.msra.mxu1 %v3858_v62  ;;  %3845 = vmatprep.subr.bf16.mxu0 %v3844_v1  ;;  %v766_v58 = vld [vmem:[#allocation4 + $0x3f8] sm:$0xff]  ;;  %v3880_v61 = vpack.c.bf16 %v764_v56, %v760_v55  ;;  %v759_v62 = vld [vmem:[#allocation4 + $0x3c0] sm:$0xff]  ;;  %v765_v4 = vld [vmem:[#allocation4 + $0x3f0] sm:$0xff] }
 0x116   :  { %3861 = vmatprep.subr.bf16.mxu1 %v3860_v5  ;;  %v763_v1 = vld [vmem:[#allocation4 + $0x3e0] sm:$0xff]  ;;  %v3896_v2 = vpack.c.bf16 %v766_v58, %v762_v57  ;;  %v3898_v6 = vpack.c.bf16 %v765_v4, %v761_v3  ;;  %v1188_v7 = vld [vmem:[#allocation9 + $0xc08] sm:$0xff]  ;;  %v1458_v16 = vld [vmem:[#allocation9 + $0x800] sm:$0xff] }
 0x117   :  { %v3882_v5 = vpack.c.bf16 %v763_v1, %v759_v62  ;;  %v1190_v8 = vld [vmem:[#allocation9 + $0xc18] sm:$0xff]  ;;  %v1459_v9 = vld [vmem:[#allocation9 + $0x808] sm:$0xff]  ;;  %v1462_v27 = vld [vmem:[#allocation9 + $0x820] sm:$0xff] }
 0x118   :  { %3847 = vmatpush1.bf16.msra.mxu0 %v3846_v11  ;;  %v3900_v10 = vpack.c.bf16 %v1190_v8, %v1188_v7  ;;  %v1461_v11 = vld [vmem:[#allocation9 + $0x818] sm:$0xff]  ;;  %v1192_v19 = vld [vmem:[#allocation9 + $0xc28] sm:$0xff]  ;;  %v1464_v28 = vld [vmem:[#allocation9 + $0x830] sm:$0xff] }
 0x119   :  { %3863 = vmatpush1.bf16.msra.mxu1 %v3862_v12  ;;  %3849 = vmatprep.subr.bf16.mxu0 %v3848_v13  ;;  %v1187_v12 = vld [vmem:[#allocation9 + $0xc00] sm:$0xff]  ;;  %v1189_v13 = vld [vmem:[#allocation9 + $0xc10] sm:$0xff]  ;;  %v4028_v14 = vpack.c.bf16 %v1461_v11, %v1459_v9  ;;  %v1194_v20 = vld [vmem:[#allocation9 + $0xc38] sm:$0xff] }
 0x11a   :  { %3865 = vmatprep.subr.bf16.mxu1 %v3864_v17  ;;  %v3902_v15 = vpack.c.bf16 %v1189_v13, %v1187_v12  ;;  %v1460_v17 = vld [vmem:[#allocation9 + $0x810] sm:$0xff]  ;;  %v1463_v21 = vld [vmem:[#allocation9 + $0x828] sm:$0xff]  ;;  %v1465_v22 = vld [vmem:[#allocation9 + $0x838] sm:$0xff] }
 0x11b   :  { %v4030_v18 = vpack.c.bf16 %v1460_v17, %v1458_v16  ;;  %v1196_v30 = vld [vmem:[#allocation9 + $0xc48] sm:$0xff]  ;;  %v1198_v31 = vld [vmem:[#allocation9 + $0xc58] sm:$0xff]  ;;  %v1466_v39 = vld [vmem:[#allocation9 + $0x840] sm:$0xff] }
 0x11c   :  { %3851 = vmatpush1.bf16.msra.mxu0 %v3850_v23  ;;  %v1191_v23 = vld [vmem:[#allocation9 + $0xc20] sm:$0xff]  ;;  %v1467_v32 = vld [vmem:[#allocation9 + $0x848] sm:$0xff]  ;;  %v3908_v33 = vpack.c.bf16 %v1198_v31, %v1196_v30  ;;  %v1469_v34 = vld [vmem:[#allocation9 + $0x858] sm:$0xff] }
 0x11d   :  { %3867 = vmatpush1.bf16.msra.mxu1 %v3866_v24  ;;  %3869 = vmatprep.subr.bf16.mxu0 %v3868_v25  ;;  %v1193_v24 = vld [vmem:[#allocation9 + $0xc30] sm:$0xff]  ;;  %v4032_v25 = vpack.c.bf16 %v1465_v22, %v1463_v21  ;;  %v1200_v42 = vld [vmem:[#allocation9 + $0xc68] sm:$0xff]  ;;  %v1202_v43 = vld [vmem:[#allocation9 + $0xc78] sm:$0xff] }
 0x11e   :  { %3885 = vmatprep.subr.bf16.mxu1 %v3884_v29  ;;  %v3906_v26 = vpack.c.bf16 %v1193_v24, %v1191_v23  ;;  %v4034_v29 = vpack.c.bf16 %v1464_v28, %v1462_v27  ;;  %v1468_v40 = vld [vmem:[#allocation9 + $0x850] sm:$0xff]  ;;  %v1471_v44 = vld [vmem:[#allocation9 + $0x868] sm:$0xff]  ;;  %v3912_v45 = vpack.c.bf16 %v1202_v43, %v1200_v42  ;;  %v1473_v46 = vld [vmem:[#allocation9 + $0x878] sm:$0xff] }
 0x11f   :  { %3368 = vmatmul.mubr.msk.f32.vlgmr.msra.gmra.mrb[4].mxu0 %vm238_vm0, %v5252_v63  ;;  %v1470_v51 = vld [vmem:[#allocation9 + $0x860] sm:$0xff]  ;;  %v1472_v52 = vld [vmem:[#allocation9 + $0x870] sm:$0xff]  ;;  %v1204_v54 = vld [vmem:[#allocation9 + $0xc88] sm:$0xff] }
 0x120   :  { %3369 = vmatmul.mubr.msk.f32.vlgmr.msra.gmra.mrb[4].mxu1 %vm238_vm0, %v5252_v63  ;;  %3871 = vmatpush1.bf16.msra.mxu0 %v3870_v35  ;;  %v1195_v35 = vld [vmem:[#allocation9 + $0xc40] sm:$0xff]  ;;  %v1206_v55 = vld [vmem:[#allocation9 + $0xc98] sm:$0xff]  ;;  %v1475_v56 = vld [vmem:[#allocation9 + $0x888] sm:$0xff] }
 0x121   :  { %3887 = vmatpush1.bf16.msra.mxu1 %v3886_v36  ;;  %3873 = vmatprep.subr.bf16.mxu0 %v3872_v37  ;;  %v1197_v36 = vld [vmem:[#allocation9 + $0xc50] sm:$0xff]  ;;  %v4036_v37 = vpack.c.bf16 %v1469_v34, %v1467_v32  ;;  %v3916_v57 = vpack.c.bf16 %v1206_v55, %v1204_v54  ;;  %v1477_v58 = vld [vmem:[#allocation9 + $0x898] sm:$0xff]  ;;  %v1474_v1 = vld [vmem:[#allocation9 + $0x880] sm:$0xff] }
 0x122   :  { %3889 = vmatprep.subr.bf16.mxu1 %v3888_v41  ;;  %831 = vmatprep.mubr.f32.mxu0 %v5012_v0  ;;  %v3910_v38 = vpack.c.bf16 %v1197_v36, %v1195_v35  ;;  %v4038_v41 = vpack.c.bf16 %v1468_v40, %v1466_v39  ;;  %v1208_v4 = vld [vmem:[#allocation9 + $0xca8] sm:$0xff]  ;;  %v1481_v8 = vld [vmem:[#allocation9 + $0x8b8] sm:$0xff]  ;;  %v1207_v9 = vld [vmem:[#allocation9 + $0xca0] sm:$0xff] }
 0x123   :  { %902 = vmatprep.mubr.f32.mxu1 %v5012_v0  ;;  %v1478_v13 = vld [vmem:[#allocation9 + $0x8a0] sm:$0xff]  ;;  %v1212_v16 = vld [vmem:[#allocation9 + $0xcc8] sm:$0xff]  ;;  %v1214_v17 = vld [vmem:[#allocation9 + $0xcd8] sm:$0xff] }
 0x124   :  { %3875 = vmatpush1.bf16.msra.mxu0 %v3874_v47  ;;  %v1199_v47 = vld [vmem:[#allocation9 + $0xc60] sm:$0xff]  ;;  %v1216_v27 = vld [vmem:[#allocation9 + $0xce8] sm:$0xff]  ;;  %v1218_v28 = vld [vmem:[#allocation9 + $0xcf8] sm:$0xff] }
 0x125   :  { %3891 = vmatpush1.bf16.msra.mxu1 %v3890_v48  ;;  %3877 = vmatprep.subr.bf16.mxu0 %v3876_v49  ;;  %v1201_v48 = vld [vmem:[#allocation9 + $0xc70] sm:$0xff]  ;;  %v4040_v49 = vpack.c.bf16 %v1473_v46, %v1471_v44  ;;  %v1211_v21 = vld [vmem:[#allocation9 + $0xcc0] sm:$0xff]  ;;  %v3928_v30 = vpack.c.bf16 %v1218_v28, %v1216_v27  ;;  %v1489_v31 = vld [vmem:[#allocation9 + $0x8f8] sm:$0xff] }
 0x126   :  { %3893 = vmatprep.subr.bf16.mxu1 %v3892_v53  ;;  %v3914_v50 = vpack.c.bf16 %v1201_v48, %v1199_v47  ;;  %v4042_v53 = vpack.c.bf16 %v1472_v52, %v1470_v51  ;;  %v1482_v24 = vld [vmem:[#allocation9 + $0x8c0] sm:$0xff]  ;;  %v1220_v39 = vld [vmem:[#allocation9 + $0xd08] sm:$0xff]  ;;  %v1222_v40 = vld [vmem:[#allocation9 + $0xd18] sm:$0xff] }
 0x127   :  { %v1215_v32 = vld [vmem:[#allocation9 + $0xce0] sm:$0xff]  ;;  %v3932_v42 = vpack.c.bf16 %v1222_v40, %v1220_v39  ;;  %v1493_v43 = vld [vmem:[#allocation9 + $0x918] sm:$0xff]  ;;  %v1224_v51 = vld [vmem:[#allocation9 + $0xd28] sm:$0xff] }
 0x128   :  { %3879 = vmatpush1.bf16.msra.mxu0 %v3878_v59  ;;  %v1203_v59 = vld [vmem:[#allocation9 + $0xc80] sm:$0xff]  ;;  %v1226_v52 = vld [vmem:[#allocation9 + $0xd38] sm:$0xff] }
 0x129   :  { %3895 = vmatpush1.bf16.msra.mxu1 %v3894_v60  ;;  %3881 = vmatprep.subr.bf16.mxu0 %v3880_v61  ;;  %v1205_v60 = vld [vmem:[#allocation9 + $0xc90] sm:$0xff]  ;;  %v4044_v61 = vpack.c.bf16 %v1477_v58, %v1475_v56  ;;  %v1486_v36 = vld [vmem:[#allocation9 + $0x8e0] sm:$0xff]  ;;  %v3936_v54 = vpack.c.bf16 %v1226_v52, %v1224_v51  ;;  %v1497_v55 = vld [vmem:[#allocation9 + $0x938] sm:$0xff] }
 0x12a   :  { %3897 = vmatprep.subr.bf16.mxu1 %v3896_v2  ;;  %v3918_v62 = vpack.c.bf16 %v1205_v60, %v1203_v59  ;;  %v1476_v2 = vld [vmem:[#allocation9 + $0x890] sm:$0xff]  ;;  %v1219_v44 = vld [vmem:[#allocation9 + $0xd00] sm:$0xff]  ;;  %v1509_v28 = vld [vmem:[#allocation9 + $0x998] sm:$0xff] }
 0x12b   :  { %v4046_v3 = vpack.c.bf16 %v1476_v2, %v1474_v1  ;;  %v1490_v48 = vld [vmem:[#allocation9 + $0x900] sm:$0xff]  ;;  %v1228_v1 = vld [vmem:[#allocation9 + $0xd48] sm:$0xff]  ;;  %v1230_v2 = vld [vmem:[#allocation9 + $0xd58] sm:$0xff] }
 0x12c   :  { %3883 = vmatpush1.bf16.msra.mxu0 %v3882_v5  ;;  %v1210_v5 = vld [vmem:[#allocation9 + $0xcb8] sm:$0xff]  ;;  %v1223_v56 = vld [vmem:[#allocation9 + $0xd20] sm:$0xff] }
 0x12d   :  { %3899 = vmatpush1.bf16.msra.mxu1 %v3898_v6  ;;  %3901 = vmatprep.subr.bf16.mxu0 %v3900_v10  ;;  %v1479_v6 = vld [vmem:[#allocation9 + $0x8a8] sm:$0xff]  ;;  %v3920_v7 = vpack.c.bf16 %v1210_v5, %v1208_v4  ;;  %v1209_v10 = vld [vmem:[#allocation9 + $0xcb0] sm:$0xff]  ;;  %v1494_v60 = vld [vmem:[#allocation9 + $0x920] sm:$0xff]  ;;  %v3940_v4 = vpack.c.bf16 %v1230_v2, %v1228_v1 }
 0x12e   :  { %4029 = vmatprep.subr.bf16.mxu1 %v4028_v14  ;;  %v4048_v11 = vpack.c.bf16 %v1481_v8, %v1479_v6  ;;  %v3922_v12 = vpack.c.bf16 %v1209_v10, %v1207_v9  ;;  %v1480_v14 = vld [vmem:[#allocation9 + $0x8b0] sm:$0xff]  ;;  %v1501_v5 = vld [vmem:[#allocation9 + $0x958] sm:$0xff]  ;;  %v1227_v6 = vld [vmem:[#allocation9 + $0xd40] sm:$0xff] }
 0x12f   :  { %3370 = vmatmul.mubr.msk.f32.vlgmr.msra.gmra.mrb[6].mxu0 %vm238_vm0, %v5252_v63  ;;  %v1498_v10 = vld [vmem:[#allocation9 + $0x940] sm:$0xff]  ;;  %v1513_v40 = vld [vmem:[#allocation9 + $0x9b8] sm:$0xff] }
 0x130   :  { %3371 = vmatmul.mubr.msk.f32.vlgmr.msra.gmra.mrb[6].mxu1 %vm238_vm0, %v5252_v63  ;;  %3903 = vmatpush1.bf16.msra.mxu0 %v3902_v15  ;;  %v3904_v63 = vpack.c.bf16 %v1194_v20, %v1192_v19  ;;  %v4050_v15 = vpack.c.bf16 %v1480_v14, %v1478_v13  ;;  %v3924_v19 = vpack.c.bf16 %v1214_v17, %v1212_v16  ;;  %v1485_v20 = vld [vmem:[#allocation9 + $0x8d8] sm:$0xff]  ;;  %v1232_v13 = vld [vmem:[#allocation9 + $0xd68] sm:$0xff] }
 0x131   :  { %4031 = vmatpush1.bf16.msra.mxu1 %v4030_v18  ;;  %v1483_v18 = vld [vmem:[#allocation9 + $0x8c8] sm:$0xff]  ;;  %v1234_v14 = vld [vmem:[#allocation9 + $0xd78] sm:$0xff] }
 0x132   :  { %3905 = vmatprep.subr.bf16.mxu0 %v3904_v63  ;;  %4033 = vmatprep.subr.bf16.mxu1 %v4032_v25  ;;  %v1213_v63 = vld [vmem:[#allocation9 + $0xcd0] sm:$0xff]  ;;  %v4052_v22 = vpack.c.bf16 %v1485_v20, %v1483_v18  ;;  %v1503_v16 = vld [vmem:[#allocation9 + $0x968] sm:$0xff]  ;;  %v1505_v17 = vld [vmem:[#allocation9 + $0x978] sm:$0xff] }
 0x133   :  { %v3926_v23 = vpack.c.bf16 %v1213_v63, %v1211_v21  ;;  %v1484_v25 = vld [vmem:[#allocation9 + $0x8d0] sm:$0xff]  ;;  %v1231_v18 = vld [vmem:[#allocation9 + $0xd60] sm:$0xff]  ;;  %v1517_v52 = vld [vmem:[#allocation9 + $0x9d8] sm:$0xff] }
 0x134   :  { %3907 = vmatpush1.bf16.msra.mxu0 %v3906_v26  ;;  %v4054_v26 = vpack.c.bf16 %v1484_v25, %v1482_v24  ;;  %v1233_v20 = vld [vmem:[#allocation9 + $0xd70] sm:$0xff]  ;;  %v1502_v21 = vld [vmem:[#allocation9 + $0x960] sm:$0xff]  ;;  %v1236_v24 = vld [vmem:[#allocation9 + $0xd88] sm:$0xff] }
 0x135   :  { %4035 = vmatpush1.bf16.msra.mxu1 %v4034_v29  ;;  %3909 = vmatprep.subr.bf16.mxu0 %v3908_v33  ;;  %v1487_v29 = vld [vmem:[#allocation9 + $0x8e8] sm:$0xff]  ;;  %v1217_v33 = vld [vmem:[#allocation9 + $0xcf0] sm:$0xff]  ;;  %v1238_v25 = vld [vmem:[#allocation9 + $0xd98] sm:$0xff] }
 0x136   :  { %4037 = vmatprep.subr.bf16.mxu1 %v4036_v37  ;;  %v4056_v34 = vpack.c.bf16 %v1489_v31, %v1487_v29  ;;  %v3930_v35 = vpack.c.bf16 %v1217_v33, %v1215_v32  ;;  %v1488_v37 = vld [vmem:[#allocation9 + $0x8f0] sm:$0xff]  ;;  %v3948_v27 = vpack.c.bf16 %v1238_v25, %v1236_v24  ;;  %v1235_v29 = vld [vmem:[#allocation9 + $0xd80] sm:$0xff]  ;;  %v1521_v1 = vld [vmem:[#allocation9 + $0x9f8] sm:$0xff] }
 0x137   :  { %v1504_v63 = vld [vmem:[#allocation9 + $0x970] sm:$0xff]  ;;  %v1506_v33 = vld [vmem:[#allocation9 + $0x980] sm:$0xff] }
 0x138   :  { %3911 = vmatpush1.bf16.msra.mxu0 %v3910_v38  ;;  %v4058_v38 = vpack.c.bf16 %v1488_v37, %v1486_v36  ;;  %v1240_v36 = vld [vmem:[#allocation9 + $0xda8] sm:$0xff]  ;;  %v1242_v37 = vld [vmem:[#allocation9 + $0xdb8] sm:$0xff] }
 0x139   :  { %4039 = vmatpush1.bf16.msra.mxu1 %v4038_v41  ;;  %3913 = vmatprep.subr.bf16.mxu0 %v3912_v45  ;;  %v1491_v41 = vld [vmem:[#allocation9 + $0x908] sm:$0xff]  ;;  %v1221_v45 = vld [vmem:[#allocation9 + $0xd10] sm:$0xff]  ;;  %v3952_v39 = vpack.c.bf16 %v1242_v37, %v1240_v36 }
 0x13a   :  { %4041 = vmatprep.subr.bf16.mxu1 %v4040_v49  ;;  %v4060_v46 = vpack.c.bf16 %v1493_v43, %v1491_v41  ;;  %v3934_v47 = vpack.c.bf16 %v1221_v45, %v1219_v44  ;;  %v1492_v49 = vld [vmem:[#allocation9 + $0x910] sm:$0xff]  ;;  %v1239_v41 = vld [vmem:[#allocation9 + $0xda0] sm:$0xff] }
 0x13b   :  { %v1510_v45 = vld [vmem:[#allocation9 + $0x9a0] sm:$0xff] }
 0x13c   :  { %3915 = vmatpush1.bf16.msra.mxu0 %v3914_v50  ;;  %v4062_v50 = vpack.c.bf16 %v1492_v49, %v1490_v48  ;;  %v1244_v48 = vld [vmem:[#allocation9 + $0xdc8] sm:$0xff]  ;;  %v1246_v49 = vld [vmem:[#allocation9 + $0xdd8] sm:$0xff] }
 0x13d   :  { %4043 = vmatpush1.bf16.msra.mxu1 %v4042_v53  ;;  %3917 = vmatprep.subr.bf16.mxu0 %v3916_v57  ;;  %v1495_v53 = vld [vmem:[#allocation9 + $0x928] sm:$0xff]  ;;  %v1225_v57 = vld [vmem:[#allocation9 + $0xd30] sm:$0xff]  ;;  %v3956_v51 = vpack.c.bf16 %v1246_v49, %v1244_v48 }
 0x13e   :  { %4045 = vmatprep.subr.bf16.mxu1 %v4044_v61  ;;  %v4064_v58 = vpack.c.bf16 %v1497_v55, %v1495_v53  ;;  %v3938_v59 = vpack.c.bf16 %v1225_v57, %v1223_v56  ;;  %v1496_v61 = vld [vmem:[#allocation9 + $0x930] sm:$0xff]  ;;  %v1243_v53 = vld [vmem:[#allocation9 + $0xdc0] sm:$0xff] }
 0x13f   :  { %v1514_v57 = vld [vmem:[#allocation9 + $0x9c0] sm:$0xff] }
 0x140   :  { %3919 = vmatpush1.bf16.msra.mxu0 %v3918_v62  ;;  %v4066_v62 = vpack.c.bf16 %v1496_v61, %v1494_v60  ;;  %v1250_v61 = vld [vmem:[#allocation9 + $0xdf8] sm:$0xff] }
 0x141   :  { %4047 = vmatpush1.bf16.msra.mxu1 %v4046_v3  ;;  %3921 = vmatprep.subr.bf16.mxu0 %v3920_v7  ;;  %v1499_v3 = vld [vmem:[#allocation9 + $0x948] sm:$0xff]  ;;  %v1229_v7 = vld [vmem:[#allocation9 + $0xd50] sm:$0xff] }
 0x142   :  { %4049 = vmatprep.subr.bf16.mxu1 %v4048_v11  ;;  %v4068_v8 = vpack.c.bf16 %v1501_v5, %v1499_v3  ;;  %v3942_v9 = vpack.c.bf16 %v1229_v7, %v1227_v6  ;;  %v1500_v11 = vld [vmem:[#allocation9 + $0x950] sm:$0xff]  ;;  %v1518_v6 = vld [vmem:[#allocation9 + $0x9e0] sm:$0xff] }
 0x143   :  { %v1249_v5 = vld [vmem:[#allocation9 + $0xdf0] sm:$0xff] }
 0x144   :  { %3923 = vmatpush1.bf16.msra.mxu0 %v3922_v12  ;;  %v4070_v12 = vpack.c.bf16 %v1500_v11, %v1498_v10  ;;  %v1252_v10 = vld [vmem:[#allocation9 + $0xe08] sm:$0xff]  ;;  %v1254_v11 = vld [vmem:[#allocation9 + $0xe18] sm:$0xff] }
 0x145   :  { %4051 = vmatpush1.bf16.msra.mxu1 %v4050_v15  ;;  %3925 = vmatprep.subr.bf16.mxu0 %v3924_v19  ;;  %v3944_v15 = vpack.c.bf16 %v1234_v14, %v1232_v13  ;;  %v4072_v19 = vpack.c.bf16 %v1505_v17, %v1503_v16  ;;  %v3964_v13 = vpack.c.bf16 %v1254_v11, %v1252_v10  ;;  %v1525_v14 = vld [vmem:[#allocation9 + $0xa18] sm:$0xff] }
 0x146   :  { %4053 = vmatprep.subr.bf16.mxu1 %v4052_v22  ;;  %v3946_v22 = vpack.c.bf16 %v1233_v20, %v1231_v18 }
 0x148   :  { %3927 = vmatpush1.bf16.msra.mxu0 %v3926_v23  ;;  %v4074_v23 = vpack.c.bf16 %v1504_v63, %v1502_v21 }
 0x149   :  { %4055 = vmatpush1.bf16.msra.mxu1 %v4054_v26  ;;  %3929 = vmatprep.subr.bf16.mxu0 %v3928_v30  ;;  %v1507_v26 = vld [vmem:[#allocation9 + $0x988] sm:$0xff]  ;;  %v1237_v30 = vld [vmem:[#allocation9 + $0xd90] sm:$0xff] }
 0x14a   :  { %4057 = vmatprep.subr.bf16.mxu1 %v4056_v34  ;;  %v4076_v31 = vpack.c.bf16 %v1509_v28, %v1507_v26  ;;  %v3950_v32 = vpack.c.bf16 %v1237_v30, %v1235_v29  ;;  %v1508_v34 = vld [vmem:[#allocation9 + $0x990] sm:$0xff] }
 0x14c   :  { %3931 = vmatpush1.bf16.msra.mxu0 %v3930_v35  ;;  %v4078_v35 = vpack.c.bf16 %v1508_v34, %v1506_v33 }
 0x14d   :  { %4059 = vmatpush1.bf16.msra.mxu1 %v4058_v38  ;;  %3933 = vmatprep.subr.bf16.mxu0 %v3932_v42  ;;  %v1511_v38 = vld [vmem:[#allocation9 + $0x9a8] sm:$0xff]  ;;  %v1241_v42 = vld [vmem:[#allocation9 + $0xdb0] sm:$0xff] }
 0x14e   :  { %4061 = vmatprep.subr.bf16.mxu1 %v4060_v46  ;;  %v4080_v43 = vpack.c.bf16 %v1513_v40, %v1511_v38  ;;  %v3954_v44 = vpack.c.bf16 %v1241_v42, %v1239_v41  ;;  %v1512_v46 = vld [vmem:[#allocation9 + $0x9b0] sm:$0xff] }
 0x150   :  { %3935 = vmatpush1.bf16.msra.mxu0 %v3934_v47  ;;  %v4082_v47 = vpack.c.bf16 %v1512_v46, %v1510_v45 }
 0x151   :  { %4063 = vmatpush1.bf16.msra.mxu1 %v4062_v50  ;;  %3937 = vmatprep.subr.bf16.mxu0 %v3936_v54  ;;  %v1515_v50 = vld [vmem:[#allocation9 + $0x9c8] sm:$0xff]  ;;  %v1245_v54 = vld [vmem:[#allocation9 + $0xdd0] sm:$0xff] }
 0x152   :  { %4065 = vmatprep.subr.bf16.mxu1 %v4064_v58  ;;  %v4084_v55 = vpack.c.bf16 %v1517_v52, %v1515_v50  ;;  %v3958_v56 = vpack.c.bf16 %v1245_v54, %v1243_v53  ;;  %v1516_v58 = vld [vmem:[#allocation9 + $0x9d0] sm:$0xff] }
 0x153   :  { %v4086_v60 = vpack.c.bf16 %v1516_v58, %v1514_v57 }
 0x154   :  { %3939 = vmatpush1.bf16.msra.mxu0 %v3938_v59  ;;  %v1248_v59 = vld [vmem:[#allocation9 + $0xde8] sm:$0xff] }
 0x155   :  { %4067 = vmatpush1.bf16.msra.mxu1 %v4066_v62  ;;  %3941 = vmatprep.subr.bf16.mxu0 %v3940_v4  ;;  %v1519_v62 = vld [vmem:[#allocation9 + $0x9e8] sm:$0xff]  ;;  %v3960_v2 = vpack.c.bf16 %v1250_v61, %v1248_v59  ;;  %v1247_v4 = vld [vmem:[#allocation9 + $0xde0] sm:$0xff] }
 0x156   :  { %4069 = vmatprep.subr.bf16.mxu1 %v4068_v8  ;;  %v4088_v3 = vpack.c.bf16 %v1521_v1, %v1519_v62  ;;  %v3962_v7 = vpack.c.bf16 %v1249_v5, %v1247_v4  ;;  %v1520_v8 = vld [vmem:[#allocation9 + $0x9f0] sm:$0xff] }
 0x158   :  { %3943 = vmatpush1.bf16.msra.mxu0 %v3942_v9  ;;  %v4090_v9 = vpack.c.bf16 %v1520_v8, %v1518_v6 }
 0x159   :  { %4071 = vmatpush1.bf16.msra.mxu1 %v4070_v12  ;;  %3945 = vmatprep.subr.bf16.mxu0 %v3944_v15  ;;  %v1523_v12 = vld [vmem:[#allocation9 + $0xa08] sm:$0xff] }
 0x15a   :  { %4073 = vmatprep.subr.bf16.mxu1 %v4072_v19  ;;  %v4092_v15 = vpack.c.bf16 %v1525_v14, %v1523_v12 }
 0x15c   :  { %3947 = vmatpush1.bf16.msra.mxu0 %v3946_v22 }
 0x15d   :  { %4075 = vmatpush1.bf16.msra.mxu1 %v4074_v23  ;;  %3949 = vmatprep.subr.bf16.mxu0 %v3948_v27 }
 0x15e   :  { %4077 = vmatprep.subr.bf16.mxu1 %v4076_v31 }
 0x160   :  { %3951 = vmatpush1.bf16.msra.mxu0 %v3950_v32 }
 0x161   :  { %4079 = vmatpush1.bf16.msra.mxu1 %v4078_v35  ;;  %3953 = vmatprep.subr.bf16.mxu0 %v3952_v39 }
 0x162   :  { %4081 = vmatprep.subr.bf16.mxu1 %v4080_v43 }
 0x164   :  { %3955 = vmatpush1.bf16.msra.mxu0 %v3954_v44 }
 0x165   :  { %4083 = vmatpush1.bf16.msra.mxu1 %v4082_v47  ;;  %3957 = vmatprep.subr.bf16.mxu0 %v3956_v51 }
 0x166   :  { %4085 = vmatprep.subr.bf16.mxu1 %v4084_v55 }
 0x168   :  { %3959 = vmatpush1.bf16.msra.mxu0 %v3958_v56 }
 0x169   :  { %4087 = vmatpush1.bf16.msra.mxu1 %v4086_v60  ;;  %3961 = vmatprep.subr.bf16.mxu0 %v3960_v2 }
 0x16a   :  { %4089 = vmatprep.subr.bf16.mxu1 %v4088_v3 }
 0x16c   :  { %3963 = vmatpush1.bf16.msra.mxu0 %v3962_v7 }
 0x16d   :  { %4091 = vmatpush1.bf16.msra.mxu1 %v4090_v9  ;;  %3965 = vmatprep.subr.bf16.mxu0 %v3964_v13 }
 0x16e   :  { %4093 = vmatprep.subr.bf16.mxu1 %v4092_v15 }
 0x1d2   :  { %v5276_v16 = vpop.f32.mrb[0].mxu0 }
 0x1d3   :  { %v5278_v17 = vpop.f32.mrb[0].mxu1  ;;  %v5280_v18 = vpop.f32.mrb[1].mxu0  ;;  %v923_v20 = vmul.f32 %v5276_v16, %v5276_v16 }
 0x1d4   :  { %v5282_v19 = vpop.f32.mrb[1].mxu1  ;;  %v925_v63 = vmul.f32 %v5278_v17, %v5278_v17  ;;  %v924_v22 = vmul.f32 %v5280_v18, %v5280_v18 }
 0x1d5   :  { %v926_v32 = vmul.f32 %v5282_v19, %v5282_v19 }
 0x1e2   :  { %v5286_v21 = vpop.f32.mrb[2].mxu0 }
 0x1e3   :  { %v911_v23 = vadd.f32 %v5286_v21, %v5276_v16  ;;  %v927_v24 = vmul.f32 %v5286_v21, %v5286_v21  ;;  %v5296_v25 = vpop.f32.mrb[2].mxu1  ;;  %v5298_v26 = vpop.f32.mrb[3].mxu0 }
 0x1e4   :  { %v913_v27 = vadd.f32 %v5296_v25, %v5278_v17  ;;  %v929_v28 = vmul.f32 %v5296_v25, %v5296_v25  ;;  %v912_v29 = vadd.f32 %v5298_v26, %v5280_v18  ;;  %v928_v30 = vmul.f32 %v5298_v26, %v5298_v26  ;;  %v5308_v31 = vpop.f32.mrb[3].mxu1 }
 0x1e5   :  { %v931_v33 = vadd.f32 %v927_v24, %v923_v20  ;;  %v914_v34 = vadd.f32 %v5308_v31, %v5282_v19  ;;  %v930_v35 = vmul.f32 %v5308_v31, %v5308_v31 }
 0x1e6   :  { %v933_v36 = vadd.f32 %v929_v28, %v925_v63  ;;  %v932_v37 = vadd.f32 %v928_v30, %v924_v22 }
 0x1e7   :  { %v934_v38 = vadd.f32 %v930_v35, %v926_v32 }
 0x1f2   :  { %v5316_v39 = vpop.f32.mrb[4].mxu0 }
 0x1f3   :  { %v915_v40 = vadd.f32 %v911_v23, %v5316_v39  ;;  %v935_v41 = vmul.f32 %v5316_v39, %v5316_v39  ;;  %v5321_v42 = vpop.f32.mrb[4].mxu1  ;;  %v5323_v43 = vpop.f32.mrb[5].mxu0 }
 0x1f4   :  { %v917_v44 = vadd.f32 %v913_v27, %v5321_v42  ;;  %v937_v45 = vmul.f32 %v5321_v42, %v5321_v42  ;;  %v916_v46 = vadd.f32 %v912_v29, %v5323_v43  ;;  %v936_v47 = vmul.f32 %v5323_v43, %v5323_v43  ;;  %v5331_v48 = vpop.f32.mrb[5].mxu1 }
 0x1f5   :  { %v939_v49 = vadd.f32 %v935_v41, %v931_v33  ;;  %v918_v50 = vadd.f32 %v914_v34, %v5331_v48  ;;  %v938_v51 = vmul.f32 %v5331_v48, %v5331_v48 }
 0x1f6   :  { %v941_v52 = vadd.f32 %v937_v45, %v933_v36  ;;  %v940_v53 = vadd.f32 %v936_v47, %v932_v37 }
 0x1f7   :  { %v942_v54 = vadd.f32 %v938_v51, %v934_v38 }
 0x202   :  { %v5336_v55 = vpop.f32.mrb[6].mxu0 }
 0x203   :  { %v919_v56 = vadd.f32 %v915_v40, %v5336_v55  ;;  %v943_v57 = vmul.f32 %v5336_v55, %v5336_v55  ;;  %v5341_v58 = vpop.f32.mrb[6].mxu1  ;;  %v5343_v59 = vpop.f32.mrb[7].mxu0 }
 0x204   :  { %v921_v60 = vadd.f32 %v917_v44, %v5341_v58  ;;  %v945_v61 = vmul.f32 %v5341_v58, %v5341_v58  ;;  %v920_v62 = vadd.f32 %v916_v46, %v5343_v59  ;;  %v944_v1 = vmul.f32 %v5343_v59, %v5343_v59  ;;  %v5351_v2 = vpop.f32.mrb[7].mxu1 }
 0x205   :  { %v947_v3 = vadd.f32 %v943_v57, %v939_v49  ;;  %v952_v4 = vsel %vm951_vm1, %v919_v56, 0.0  ;;  %v922_v5 = vadd.f32 %v918_v50, %v5351_v2  ;;  %v946_v6 = vmul.f32 %v5351_v2, %v5351_v2 }
 0x206   :  { %v953_v7 = vrot.slane %v952_v4, 4  ;;  %v949_v8 = vadd.f32 %v945_v61, %v941_v52  ;;  %v966_v9 = vsel %vm951_vm1, %v921_v60, 0.0  ;;  %v948_v10 = vadd.f32 %v944_v1, %v940_v53 }
 0x207   :  { %v984_v11 = vsel %vm951_vm1, %v947_v3, 0.0  ;;  %v967_v12 = vrot.slane %v966_v9, 4  ;;  %v959_v13 = vsel %vm951_vm1, %v920_v62, 0.0  ;;  %v950_v14 = vadd.f32 %v946_v6, %v942_v54 }
 0x208   :  { %v954_v15 = vadd.f32 %v953_v7, %v952_v4  ;;  %v985_v20 = vrot.slane %v984_v11, 4  ;;  %v998_v63 = vsel %vm951_vm1, %v949_v8, 0.0  ;;  %v960_v22 = vrot.slane %v959_v13, 4 }
 0x209   :  { %v968_v23 = vadd.f32 %v967_v12, %v966_v9  ;;  %v999_v24 = vrot.slane %v998_v63, 4  ;;  %v991_v27 = vsel %vm951_vm1, %v948_v10, 0.0  ;;  %v973_v28 = vsel %vm951_vm1, %v922_v5, 0.0 }
 0x20a   :  { %v955_v29 = vrot.slane %v954_v15, 2  ;;  %v986_v30 = vadd.f32 %v985_v20, %v984_v11  ;;  %v961_v32 = vadd.f32 %v960_v22, %v959_v13  ;;  %v992_v33 = vrot.slane %v991_v27, 4 }
 0x20b   :  { %v969_v34 = vrot.slane %v968_v23, 2  ;;  %v1000_v35 = vadd.f32 %v999_v24, %v998_v63  ;;  %v974_v36 = vrot.slane %v973_v28, 4  ;;  %v1005_v37 = vsel %vm951_vm1, %v950_v14, 0.0 }
 0x20c   :  { %v956_v38 = vadd.f32 %v955_v29, %v954_v15  ;;  %v987_v40 = vrot.slane %v986_v30, 2  ;;  %v962_v41 = vrot.slane %v961_v32, 2  ;;  %v993_v44 = vadd.f32 %v992_v33, %v991_v27 }
 0x20d   :  { %v970_v45 = vadd.f32 %v969_v34, %v968_v23  ;;  %v1001_v46 = vrot.slane %v1000_v35, 2  ;;  %v975_v47 = vadd.f32 %v974_v36, %v973_v28  ;;  %v1006_v49 = vrot.slane %v1005_v37, 4 }
 0x20e   :  { %v957_v50 = vrot.slane %v956_v38, 1  ;;  %v988_v51 = vadd.f32 %v987_v40, %v986_v30  ;;  %v963_v52 = vadd.f32 %v962_v41, %v961_v32  ;;  %v994_v53 = vrot.slane %v993_v44, 2 }
 0x20f   :  { %v971_v54 = vrot.slane %v970_v45, 1  ;;  %v1002_v56 = vadd.f32 %v1001_v46, %v1000_v35  ;;  %v976_v57 = vrot.slane %v975_v47, 2  ;;  %v1007_v60 = vadd.f32 %v1006_v49, %v1005_v37 }
 0x210   :  { %v958_v61 = vadd.f32 %v957_v50, %v956_v38  ;;  %v989_v62 = vrot.slane %v988_v51, 1  ;;  %v964_v1 = vrot.slane %v963_v52, 1  ;;  %v995_v3 = vadd.f32 %v994_v53, %v993_v44 }
 0x211   :  { %v972_v4 = vadd.f32 %v971_v54, %v970_v45  ;;  %v1003_v5 = vrot.slane %v1002_v56, 1  ;;  %v977_v6 = vadd.f32 %v976_v57, %v975_v47  ;;  %v1008_v7 = vrot.slane %v1007_v60, 2 }
 0x212   :  { %v980_v8 = vmul.f32 0.125, %v958_v61  ;;  %v990_v9 = vadd.f32 %v989_v62, %v988_v51  ;;  %v965_v10 = vadd.f32 %v964_v1, %v963_v52  ;;  %v996_v11 = vrot.slane %v995_v3, 1 }
 0x213   :  { %v982_v12 = vmul.f32 0.125, %v972_v4  ;;  %v1004_v13 = vadd.f32 %v1003_v5, %v1002_v56  ;;  %v978_v14 = vrot.slane %v977_v6, 1  ;;  %v1009_v15 = vadd.f32 %v1008_v7, %v1007_v60 }
 0x214   :  { %v1012_v20 = vmul.f32 0.125, %v990_v9  ;;  %v1016_v63 = vmul.f32 %v980_v8, %v980_v8  ;;  %v981_v22 = vmul.f32 0.125, %v965_v10  ;;  %v997_v23 = vadd.f32 %v996_v11, %v995_v3 }
 0x215   :  { %v1014_v24 = vmul.f32 0.125, %v1004_v13  ;;  %v1018_v27 = vmul.f32 %v982_v12, %v982_v12  ;;  %v979_v28 = vadd.f32 %v978_v14, %v977_v6  ;;  %v1010_v29 = vrot.slane %v1009_v15, 1  ;;  %v909_v6 = vld [vmem:[#allocation6] sm:$0xf] }
 0x216   :  { %v1020_v30 = vsub.f32 %v1012_v20, %v1016_v63  ;;  %v1013_v32 = vmul.f32 0.125, %v997_v23  ;;  %v1017_v33 = vmul.f32 %v981_v22, %v981_v22  ;;  %v5013_v49 = vmov 1966171168  }
 0x217   :  { %v1022_v34 = vsub.f32 %v1014_v24, %v1018_v27  ;;  %v983_v35 = vmul.f32 0.125, %v979_v28  ;;  %v1011_v36 = vadd.f32 %v1010_v29, %v1009_v15  ;;  %v1039_v50 = vunpack.c.l.s4 %v5013_v49 }
 0x218   :  { %v1024_v37 = vadd.f32 1e-05, %v1020_v30  ;;  %v1021_v38 = vsub.f32 %v1013_v32, %v1017_v33  ;;  %v1041_v51 = vlaneseq }
 0x219   :  { %v1026_v40 = vadd.f32 1e-05, %v1022_v34  ;;  %v1015_v41 = vmul.f32 0.125, %v1011_v36  ;;  %v1019_v44 = vmul.f32 %v983_v35, %v983_v35  ;;  %v1040_v52 = vunpack.c.0.s8 %v1039_v50 }
 0x21a   :  { %4668 = vrsqrt.f32 %v1024_v37  ;;  %v1025_v45 = vadd.f32 1e-05, %v1021_v38  ;;  %v1042_v53 = vshrl.u32 %v1041_v51, 7 }
 0x21b   :  { %v1023_v46 = vsub.f32 %v1015_v41, %v1019_v44  ;;  %v1251_v44 = vld [vmem:[#allocation9 + $0xe00] sm:$0xff] }
 0x21c   :  { %4670 = vrsqrt.f32 %v1025_v45  ;;  %v5364_v57 = vsub.s32 %v1040_v52, %v1042_v53  ;;  %v5368_v7 = vsub.s32 0, %v1042_v53  ;;  %v5371_v10 = vsub.s32 1, %v1042_v53  ;;  %v1253_v45 = vld [vmem:[#allocation9 + $0xe10] sm:$0xff] }
 0x21d   :  { %4672 = vrsqrt.f32 %v1026_v40  ;;  %v1027_v47 = vadd.f32 1e-05, %v1023_v46  ;;  %v1073_v11 = vsub.s32 2, %v1042_v53  ;;  %v1077_v13 = vsub.s32 3, %v1042_v53  ;;  %v1522_v46 = vld [vmem:[#allocation9 + $0xa00] sm:$0xff] }
 0x21e   :  { %v3966_v50 = vpack.c.bf16 %v1253_v45, %v1251_v44  ;;  %v1535_v44 = vld [vmem:[#allocation9 + $0xa68] sm:$0xff] }
 0x21f   :  { %4674 = vrsqrt.f32 %v1027_v47 }
 0x224   :  { %v4669_v54 = vpop.eup %4668 }
 0x226   :  { %v4671_v56 = vpop.eup %4670 }
 0x227   :  { %v4673_v60 = vpop.eup %4672  ;;  %v1036_v61 = vcombine.low %v4669_v54, %v4671_v56  ;;  %v1258_v56 = vld [vmem:[#allocation9 + $0xe38] sm:$0xff] }
 0x229   :  { %v4675_v62 = vpop.eup %4674  ;;  %v1044_v1 = vrot.slane %v1036_v61, %v5364_v57 }
 0x22a   :  { %v1037_v3 = vcombine.low %v4673_v60, %v4675_v62  ;;  %v1527_v62 = vld [vmem:[#allocation9 + $0xa28] sm:$0xff] }
 0x22c   :  { %v1051_v4 = vrot.slane %v1037_v3, %v5364_v57  ;;  %v1255_v3 = vld [vmem:[#allocation9 + $0xe20] sm:$0xff] }
 0x22e   :  { %v1052_v5 = vcombine.low %v1044_v1, %v1051_v4  ;;  %v1529_v1 = vld [vmem:[#allocation9 + $0xa38] sm:$0xff] }
 0x230   :  { %v1059_v9 = vrot.slane %v1052_v5, %v5364_v57 }
 0x232   :  { %v1061_v14 = vmul.f32 %v1059_v9, %v909_v6 }
 0x234   :  { %v1066_v15 = vrot.slane %v1061_v14, %v5368_v7  ;;  %v1070_v20 = vrot.slane %v1061_v14, %v5371_v10  ;;  %v1074_v63 = vrot.slane %v1061_v14, %v1073_v11  ;;  %v1078_v23 = vrot.slane %v1061_v14, %v1077_v13  ;;  %v1257_v14 = vld [vmem:[#allocation9 + $0xe30] sm:$0xff] }
 0x236   :  { %v1083_v24 = vmul.f32 %v1066_v15, %v980_v8  ;;  %v1084_v27 = vmul.f32 %v1070_v20, %v981_v22  ;;  %v1085_v28 = vmul.f32 %v1074_v63, %v982_v12  ;;  %v1086_v29 = vmul.f32 %v1078_v23, %v983_v35 }
 0x237   :  { %v5376_v30 = vmul.f32 %v1078_v23, %v5351_v2  ;;  %v1118_v32 = vmul.f32 %v1070_v20, %v5280_v18  ;;  %v1151_v33 = vmul.f32 %v1070_v20, %v5298_v26  ;;  %v1117_v34 = vmul.f32 %v1066_v15, %v5276_v16 }
 0x238   :  { %v1091_v36 = vcombine.low %v1083_v24, %v1084_v27  ;;  %v1092_v37 = vcombine.low %v1085_v28, %v1086_v29  ;;  %v1150_v38 = vmul.f32 %v1066_v15, %v5286_v21  ;;  %v1120_v40 = vmul.f32 %v1078_v23, %v5282_v19  ;;  %v910_v19 = vld [vmem:[#allocation7] sm:$0xf]  ;;  %v1531_v28 = vld [vmem:[#allocation9 + $0xa48] sm:$0xff] }
 0x239   :  { %v1153_v8 = vmul.f32 %v1078_v23, %v5308_v31  ;;  %v1119_v12 = vmul.f32 %v1074_v63, %v5278_v17  ;;  %v1152_v22 = vmul.f32 %v1074_v63, %v5296_v25  ;;  %v1163_v2 = vmul.f32 %v1070_v20, %v5323_v43  ;;  %v1262_v24 = vld [vmem:[#allocation9 + $0xe58] sm:$0xff] }
 0x23a   :  { %v1099_v18 = vrot.slane %v1091_v36, %v5364_v57  ;;  %v1106_v26 = vrot.slane %v1092_v37, %v5364_v57  ;;  %v1175_v16 = vmul.f32 %v1070_v20, %v5343_v59  ;;  %v1162_v41 = vmul.f32 %v1066_v15, %v5316_v39  ;;  %v1524_v39 = vld [vmem:[#allocation9 + $0xa10] sm:$0xff]  ;;  %v1533_v29 = vld [vmem:[#allocation9 + $0xa58] sm:$0xff] }
 0x23b   :  { %v5392_v21 = vmul.f32 %v1066_v15, %v5336_v55  ;;  %v5395_v31 = vmul.f32 %v1078_v23, %v5331_v48  ;;  %v5398_v17 = vmul.f32 %v1074_v63, %v5321_v42  ;;  %v5402_v43 = vmul.f32 %v1074_v63, %v5341_v58  ;;  %v1256_v58 = vld [vmem:[#allocation9 + $0xe28] sm:$0xff]  ;;  %v1526_v15 = vld [vmem:[#allocation9 + $0xa20] sm:$0xff]  ;;  %v1528_v63 = vld [vmem:[#allocation9 + $0xa30] sm:$0xff] }
 0x23c   :  { %v1107_v35 = vcombine.low %v1099_v18, %v1106_v26  ;;  %v4094_v42 = vpack.c.bf16 %v1524_v39, %v1522_v46  ;;  %v3968_v20 = vpack.c.bf16 %v1258_v56, %v1256_v58  ;;  %v1260_v23 = vld [vmem:[#allocation9 + $0xe48] sm:$0xff]  ;;  %v4096_v27 = vpack.c.bf16 %v1529_v1, %v1527_v62  ;;  %v1532_v26 = vld [vmem:[#allocation9 + $0xa50] sm:$0xff]  ;;  %v1263_v39 = vld [vmem:[#allocation9 + $0xe60] sm:$0xff] }
 0x23d   :  { %v3970_v37 = vpack.c.bf16 %v1257_v14, %v1255_v3  ;;  %v4100_v18 = vpack.c.bf16 %v1533_v29, %v1531_v28  ;;  %v1267_v58 = vld [vmem:[#allocation9 + $0xe80] sm:$0xff]  ;;  %v1269_v56 = vld [vmem:[#allocation9 + $0xe90] sm:$0xff]  ;;  %v1272_v62 = vld [vmem:[#allocation9 + $0xea8] sm:$0xff] }
 0x23e   :  { %v1114_v25 = vrot.slane %v1107_v35, %v5364_v57  ;;  %v1274_v1 = vld [vmem:[#allocation9 + $0xeb8] sm:$0xff]  ;;  %v1543_v3 = vld [vmem:[#allocation9 + $0xaa8] sm:$0xff]  ;;  %v1273_v14 = vld [vmem:[#allocation9 + $0xeb0] sm:$0xff] }
 0x23f   :  { %v1547_v28 = vld [vmem:[#allocation9 + $0xac8] sm:$0xff]  ;;  %v1549_v29 = vld [vmem:[#allocation9 + $0xad8] sm:$0xff] }
 0x240   :  { %v1116_v59 = vsub.f32 %v910_v19, %v1114_v25  ;;  %v1266_v25 = vld [vmem:[#allocation9 + $0xe78] sm:$0xff] }
 0x242   :  { %v1129_v55 = vrot.slane %v1116_v59, %v5371_v10  ;;  %v1125_v47 = vrot.slane %v1116_v59, %v5368_v7  ;;  %v1137_v49 = vrot.slane %v1116_v59, %v1077_v13  ;;  %v5406_v48 = vrot.slane %v1116_v59, %v1073_v11  ;;  %v1537_v59 = vld [vmem:[#allocation9 + $0xa78] sm:$0xff] }
 0x244   :  { %v1143_v51 = vadd.f32 %v1129_v55, %v1118_v32  ;;  %v1155_v52 = vadd.f32 %v1151_v33, %v1129_v55  ;;  %v1142_v53 = vadd.f32 %v1125_v47, %v1117_v34  ;;  %v1154_v54 = vadd.f32 %v1150_v38, %v1125_v47 }
 0x245   :  { %v1145_v60 = vadd.f32 %v1137_v49, %v1120_v40  ;;  %v1157_v61 = vadd.f32 %v1153_v8, %v1137_v49  ;;  %v5409_v4 = vadd.f32 %v5406_v48, %v1119_v12  ;;  %v5412_v5 = vadd.f32 %v1152_v22, %v5406_v48  ;;  %v1259_v8 = vld [vmem:[#allocation9 + $0xe40] sm:$0xff]  ;;  %v1261_v12 = vld [vmem:[#allocation9 + $0xe50] sm:$0xff] }
 0x246   :  { %v1147_v6 = vmax.f32 %v1143_v51, 0.0  ;;  %v1159_v9 = vmax.f32 %v1155_v52, 0.0  ;;  %v1146_v11 = vmax.f32 %v1142_v53, 0.0  ;;  %v1158_v13 = vmax.f32 %v1154_v54, 0.0  ;;  %v1270_v51 = vld [vmem:[#allocation9 + $0xe98] sm:$0xff] }
 0x247   :  { %v5414_v32 = vadd.f32 %v1163_v2, %v1129_v55  ;;  %v5416_v33 = vadd.f32 %v1175_v16, %v1129_v55  ;;  %v1149_v34 = vmax.f32 %v1145_v60, 0.0  ;;  %v1161_v36 = vmax.f32 %v1157_v61, 0.0  ;;  %v1530_v2 = vld [vmem:[#allocation9 + $0xa40] sm:$0xff]  ;;  %v1264_v16 = vld [vmem:[#allocation9 + $0xe68] sm:$0xff]  ;;  %v1265_v55 = vld [vmem:[#allocation9 + $0xe70] sm:$0xff] }
 0x248   :  { %1379 = vmatprep.mubr.f32.mxu0 %v1147_v6  ;;  %1650 = vmatprep.mubr.f32.mxu1 %v1159_v9  ;;  %v4098_v38 = vpack.c.bf16 %v1528_v63, %v1526_v15  ;;  %v3972_v40 = vpack.c.bf16 %v1262_v24, %v1260_v23  ;;  %v5418_v22 = vadd.f32 %v1162_v41, %v1125_v47  ;;  %v1541_v52 = vld [vmem:[#allocation9 + $0xa98] sm:$0xff]  ;;  %v1538_v60 = vld [vmem:[#allocation9 + $0xa80] sm:$0xff]  ;;  %v1540_v61 = vld [vmem:[#allocation9 + $0xa90] sm:$0xff] }
 0x249   :  { %1380 = vmatmul.mubr.f32.vlgmr.msra.gmra.mrb[8].mxu0 %v1146_v11  ;;  %1651 = vmatmul.mubr.f32.vlgmr.msra.gmra.mrb[8].mxu1 %v1158_v13  ;;  %v5421_v35 = vadd.f32 %v5392_v21, %v1125_v47  ;;  %v5424_v19 = vadd.f32 %v5395_v31, %v1137_v49  ;;  %v5427_v41 = vadd.f32 %v5376_v30, %v1137_v49  ;;  %v1534_v30 = vld [vmem:[#allocation9 + $0xa60] sm:$0xff]  ;;  %v1536_v49 = vld [vmem:[#allocation9 + $0xa70] sm:$0xff]  ;;  %v1545_v6 = vld [vmem:[#allocation9 + $0xab8] sm:$0xff] }
 0x24a   :  { %3967 = vmatpush1.bf16.msra.mxu0 %v3966_v50  ;;  %4095 = vmatpush1.bf16.msra.mxu1 %v4094_v42  ;;  %v5431_v45 = vadd.f32 %v5398_v17, %v5406_v48  ;;  %v3974_v46 = vpack.c.bf16 %v1261_v12, %v1259_v8  ;;  %v4102_v21 = vpack.c.bf16 %v1532_v26, %v1530_v2  ;;  %v1268_v42 = vld [vmem:[#allocation9 + $0xe88] sm:$0xff]  ;;  %v1271_v13 = vld [vmem:[#allocation9 + $0xea0] sm:$0xff]  ;;  %v1544_v23 = vld [vmem:[#allocation9 + $0xab0] sm:$0xff] }
 0x24b   :  { %1450 = vmatprep.mubr.f32.mxu0 %v1149_v34  ;;  %1721 = vmatprep.mubr.f32.mxu1 %v1161_v36  ;;  %v5435_v31 = vadd.f32 %v5402_v43, %v5406_v48  ;;  %v3976_v47 = vpack.c.bf16 %v1266_v25, %v1264_v16  ;;  %v4104_v50 = vpack.c.bf16 %v1537_v59, %v1535_v44  ;;  %v1539_v17 = vld [vmem:[#allocation9 + $0xa88] sm:$0xff]  ;;  %v1542_v63 = vld [vmem:[#allocation9 + $0xaa0] sm:$0xff]  ;;  %v1282_v26 = vld [vmem:[#allocation9 + $0xef8] sm:$0xff] }
 0x24c   :  { %3969 = vmatprep.subr.bf16.mxu0 %v3968_v20  ;;  %4097 = vmatprep.subr.bf16.mxu1 %v4096_v27  ;;  %v3978_v53 = vpack.c.bf16 %v1265_v55, %v1263_v39  ;;  %v4106_v54 = vpack.c.bf16 %v1536_v49, %v1534_v30  ;;  %v3980_v43 = vpack.c.bf16 %v1270_v51, %v1268_v42  ;;  %v1276_v24 = vld [vmem:[#allocation9 + $0xec8] sm:$0xff]  ;;  %v1278_v27 = vld [vmem:[#allocation9 + $0xed8] sm:$0xff]  ;;  %v1546_v12 = vld [vmem:[#allocation9 + $0xac0] sm:$0xff] }
 0x24d   :  { %v4108_v48 = vpack.c.bf16 %v1541_v52, %v1539_v17  ;;  %v3982_v9 = vpack.c.bf16 %v1269_v56, %v1267_v58  ;;  %v4110_v11 = vpack.c.bf16 %v1540_v61, %v1538_v60  ;;  %v3984_v15 = vpack.c.bf16 %v1274_v1, %v1272_v62  ;;  %v1280_v2 = vld [vmem:[#allocation9 + $0xee8] sm:$0xff]  ;;  %v1553_v25 = vld [vmem:[#allocation9 + $0xaf8] sm:$0xff] }
 0x24e   :  { %3971 = vmatpush1.bf16.msra.mxu0 %v3970_v37  ;;  %4099 = vmatpush1.bf16.msra.mxu1 %v4098_v38  ;;  %v4112_v20 = vpack.c.bf16 %v1545_v6, %v1543_v3  ;;  %v3986_v34 = vpack.c.bf16 %v1273_v14, %v1271_v13  ;;  %v4114_v36 = vpack.c.bf16 %v1544_v23, %v1542_v63  ;;  %v1275_v37 = vld [vmem:[#allocation9 + $0xec0] sm:$0xff]  ;;  %v1277_v38 = vld [vmem:[#allocation9 + $0xed0] sm:$0xff]  ;;  %v1551_v16 = vld [vmem:[#allocation9 + $0xae8] sm:$0xff] }
 0x24f   :  { %3973 = vmatprep.subr.bf16.mxu0 %v3972_v40  ;;  %4101 = vmatprep.subr.bf16.mxu1 %v4100_v18  ;;  %v3988_v40 = vpack.c.bf16 %v1278_v27, %v1276_v24  ;;  %v4116_v8 = vpack.c.bf16 %v1549_v29, %v1547_v28  ;;  %v1548_v18 = vld [vmem:[#allocation9 + $0xad0] sm:$0xff]  ;;  %v3990_v44 = vpack.c.bf16 %v1277_v38, %v1275_v37  ;;  %v1284_v30 = vld [vmem:[#allocation9 + $0xf08] sm:$0xff]  ;;  %v1286_v49 = vld [vmem:[#allocation9 + $0xf18] sm:$0xff] }
 0x250   :  { %v4118_v59 = vpack.c.bf16 %v1548_v18, %v1546_v12  ;;  %v3992_v39 = vpack.c.bf16 %v1282_v26, %v1280_v2  ;;  %v4120_v55 = vpack.c.bf16 %v1553_v25, %v1551_v16  ;;  %v1555_v42 = vld [vmem:[#allocation9 + $0xb08] sm:$0xff]  ;;  %v1557_v51 = vld [vmem:[#allocation9 + $0xb18] sm:$0xff]  ;;  %v3996_v58 = vpack.c.bf16 %v1286_v49, %v1284_v30 }
 0x251   :  { %v4124_v56 = vpack.c.bf16 %v1557_v51, %v1555_v42  ;;  %v1288_v60 = vld [vmem:[#allocation9 + $0xf28] sm:$0xff]  ;;  %v1290_v61 = vld [vmem:[#allocation9 + $0xf38] sm:$0xff] }
 0x252   :  { %3975 = vmatpush1.bf16.msra.mxu0 %v3974_v46  ;;  %4103 = vmatpush1.bf16.msra.mxu1 %v4102_v21  ;;  %v1279_v46 = vld [vmem:[#allocation9 + $0xee0] sm:$0xff]  ;;  %v1281_v21 = vld [vmem:[#allocation9 + $0xef0] sm:$0xff]  ;;  %v1559_v62 = vld [vmem:[#allocation9 + $0xb28] sm:$0xff]  ;;  %v4000_v13 = vpack.c.bf16 %v1290_v61, %v1288_v60 }
 0x253   :  { %3977 = vmatprep.subr.bf16.mxu0 %v3976_v47  ;;  %4105 = vmatprep.subr.bf16.mxu1 %v4104_v50  ;;  %v1550_v47 = vld [vmem:[#allocation9 + $0xae0] sm:$0xff]  ;;  %v1552_v50 = vld [vmem:[#allocation9 + $0xaf0] sm:$0xff]  ;;  %v3994_v17 = vpack.c.bf16 %v1281_v21, %v1279_v46  ;;  %v1561_v1 = vld [vmem:[#allocation9 + $0xb38] sm:$0xff] }
 0x254   :  { %v4122_v52 = vpack.c.bf16 %v1552_v50, %v1550_v47  ;;  %v4128_v14 = vpack.c.bf16 %v1561_v1, %v1559_v62  ;;  %v1292_v63 = vld [vmem:[#allocation9 + $0xf48] sm:$0xff]  ;;  %v1294_v23 = vld [vmem:[#allocation9 + $0xf58] sm:$0xff] }
 0x255   :  { %v1563_v24 = vld [vmem:[#allocation9 + $0xb48] sm:$0xff]  ;;  %v1565_v27 = vld [vmem:[#allocation9 + $0xb58] sm:$0xff]  ;;  %v4004_v37 = vpack.c.bf16 %v1294_v23, %v1292_v63 }
 0x256   :  { %3979 = vmatpush1.bf16.msra.mxu0 %v3978_v53  ;;  %4107 = vmatpush1.bf16.msra.mxu1 %v4106_v54  ;;  %v1283_v53 = vld [vmem:[#allocation9 + $0xf00] sm:$0xff]  ;;  %v1285_v54 = vld [vmem:[#allocation9 + $0xf10] sm:$0xff]  ;;  %v4132_v38 = vpack.c.bf16 %v1565_v27, %v1563_v24  ;;  %v1296_v12 = vld [vmem:[#allocation9 + $0xf68] sm:$0xff] }
 0x257   :  { %3981 = vmatprep.subr.bf16.mxu0 %v3980_v43  ;;  %4109 = vmatprep.subr.bf16.mxu1 %v4108_v48  ;;  %v1554_v43 = vld [vmem:[#allocation9 + $0xb00] sm:$0xff]  ;;  %v1556_v48 = vld [vmem:[#allocation9 + $0xb10] sm:$0xff]  ;;  %v3998_v3 = vpack.c.bf16 %v1285_v54, %v1283_v53  ;;  %v1298_v18 = vld [vmem:[#allocation9 + $0xf78] sm:$0xff] }
 0x258   :  { %v4126_v6 = vpack.c.bf16 %v1556_v48, %v1554_v43  ;;  %v1567_v2 = vld [vmem:[#allocation9 + $0xb68] sm:$0xff]  ;;  %v1569_v26 = vld [vmem:[#allocation9 + $0xb78] sm:$0xff]  ;;  %v4008_v46 = vpack.c.bf16 %v1298_v18, %v1296_v12 }
 0x259   :  { %v4136_v21 = vpack.c.bf16 %v1569_v26, %v1567_v2  ;;  %v1300_v47 = vld [vmem:[#allocation9 + $0xf88] sm:$0xff]  ;;  %v1302_v50 = vld [vmem:[#allocation9 + $0xf98] sm:$0xff] }
 0x25a   :  { %3983 = vmatpush1.bf16.msra.mxu0 %v3982_v9  ;;  %4111 = vmatpush1.bf16.msra.mxu1 %v4110_v11  ;;  %v1287_v9 = vld [vmem:[#allocation9 + $0xf20] sm:$0xff]  ;;  %v1289_v11 = vld [vmem:[#allocation9 + $0xf30] sm:$0xff]  ;;  %v1571_v30 = vld [vmem:[#allocation9 + $0xb88] sm:$0xff]  ;;  %v4012_v53 = vpack.c.bf16 %v1302_v50, %v1300_v47 }
 0x25b   :  { %3985 = vmatprep.subr.bf16.mxu0 %v3984_v15  ;;  %4113 = vmatprep.subr.bf16.mxu1 %v4112_v20  ;;  %v1558_v15 = vld [vmem:[#allocation9 + $0xb20] sm:$0xff]  ;;  %v1560_v20 = vld [vmem:[#allocation9 + $0xb30] sm:$0xff]  ;;  %v4002_v28 = vpack.c.bf16 %v1289_v11, %v1287_v9  ;;  %v1573_v49 = vld [vmem:[#allocation9 + $0xb98] sm:$0xff] }
 0x25c   :  { %v4130_v29 = vpack.c.bf16 %v1560_v20, %v1558_v15  ;;  %v4140_v54 = vpack.c.bf16 %v1573_v49, %v1571_v30  ;;  %v1304_v43 = vld [vmem:[#allocation9 + $0xfa8] sm:$0xff]  ;;  %v1306_v48 = vld [vmem:[#allocation9 + $0xfb8] sm:$0xff] }
 0x25d   :  { %v1575_v60 = vld [vmem:[#allocation9 + $0xba8] sm:$0xff]  ;;  %v1577_v61 = vld [vmem:[#allocation9 + $0xbb8] sm:$0xff]  ;;  %v4016_v9 = vpack.c.bf16 %v1306_v48, %v1304_v43 }
 0x25e   :  { %3987 = vmatpush1.bf16.msra.mxu0 %v3986_v34  ;;  %4115 = vmatpush1.bf16.msra.mxu1 %v4114_v36  ;;  %v1291_v34 = vld [vmem:[#allocation9 + $0xf40] sm:$0xff]  ;;  %v1293_v36 = vld [vmem:[#allocation9 + $0xf50] sm:$0xff]  ;;  %v4144_v11 = vpack.c.bf16 %v1577_v61, %v1575_v60  ;;  %v1308_v15 = vld [vmem:[#allocation9 + $0xfc8] sm:$0xff]  ;;  %v1148_v61 = vmax.f32 %v5409_v4, 0.0 }
 0x25f   :  { %3989 = vmatprep.subr.bf16.mxu0 %v3988_v40  ;;  %4117 = vmatprep.subr.bf16.mxu1 %v4116_v8  ;;  %v1562_v40 = vld [vmem:[#allocation9 + $0xb40] sm:$0xff]  ;;  %v1564_v8 = vld [vmem:[#allocation9 + $0xb50] sm:$0xff]  ;;  %v4006_v16 = vpack.c.bf16 %v1293_v36, %v1291_v34  ;;  %v1310_v20 = vld [vmem:[#allocation9 + $0xfd8] sm:$0xff] }
 0x260   :  { %v4134_v25 = vpack.c.bf16 %v1564_v8, %v1562_v40  ;;  %v1579_v63 = vld [vmem:[#allocation9 + $0xbc8] sm:$0xff]  ;;  %v1581_v23 = vld [vmem:[#allocation9 + $0xbd8] sm:$0xff]  ;;  %v4020_v34 = vpack.c.bf16 %v1310_v20, %v1308_v15  ;;  %v2005_v15 = vld [vmem:[#allocation9 + $0x30] sm:$0xff] }
 0x261   :  { %v4148_v36 = vpack.c.bf16 %v1581_v23, %v1579_v63  ;;  %v1312_v40 = vld [vmem:[#allocation9 + $0xfe8] sm:$0xff]  ;;  %v1314_v8 = vld [vmem:[#allocation9 + $0xff8] sm:$0xff]  ;;  %v1183_v23 = vmax.f32 %v5416_v33, 0.0 }
 0x262   :  { %3991 = vmatpush1.bf16.msra.mxu0 %v3990_v44  ;;  %4119 = vmatpush1.bf16.msra.mxu1 %v4118_v59  ;;  %v1295_v44 = vld [vmem:[#allocation9 + $0xf60] sm:$0xff]  ;;  %v1297_v59 = vld [vmem:[#allocation9 + $0xf70] sm:$0xff]  ;;  %v1583_v12 = vld [vmem:[#allocation9 + $0xbe8] sm:$0xff] }
 0x263   :  { %3993 = vmatprep.subr.bf16.mxu0 %v3992_v39  ;;  %4121 = vmatprep.subr.bf16.mxu1 %v4120_v55  ;;  %v1566_v39 = vld [vmem:[#allocation9 + $0xb60] sm:$0xff]  ;;  %v1568_v55 = vld [vmem:[#allocation9 + $0xb70] sm:$0xff]  ;;  %v4010_v42 = vpack.c.bf16 %v1297_v59, %v1295_v44  ;;  %v1585_v18 = vld [vmem:[#allocation9 + $0xbf8] sm:$0xff]  ;;  %v4024_v44 = vpack.c.bf16 %v1314_v8, %v1312_v40 }
 0x264   :  { %v4138_v51 = vpack.c.bf16 %v1568_v55, %v1566_v39  ;;  %v4152_v59 = vpack.c.bf16 %v1585_v18, %v1583_v12  ;;  %v1730_v39 = vld [vmem:[#allocation9 + $0x408] sm:$0xff]  ;;  %v1732_v55 = vld [vmem:[#allocation9 + $0x418] sm:$0xff] }
 0x265   :  { %v2000_v47 = vld [vmem:[#allocation9 + $0x8] sm:$0xff]  ;;  %v2002_v50 = vld [vmem:[#allocation9 + $0x18] sm:$0xff] }
 0x266   :  { %3995 = vmatpush1.bf16.msra.mxu0 %v3994_v17  ;;  %4123 = vmatpush1.bf16.msra.mxu1 %v4122_v52  ;;  %v1299_v17 = vld [vmem:[#allocation9 + $0xf80] sm:$0xff]  ;;  %v1301_v52 = vld [vmem:[#allocation9 + $0xf90] sm:$0xff]  ;;  %v2004_v43 = vld [vmem:[#allocation9 + $0x28] sm:$0xff] }
 0x267   :  { %3997 = vmatprep.subr.bf16.mxu0 %v3996_v58  ;;  %4125 = vmatprep.subr.bf16.mxu1 %v4124_v56  ;;  %v1570_v58 = vld [vmem:[#allocation9 + $0xb80] sm:$0xff]  ;;  %v1572_v56 = vld [vmem:[#allocation9 + $0xb90] sm:$0xff]  ;;  %v4014_v62 = vpack.c.bf16 %v1301_v52, %v1299_v17  ;;  %v2006_v48 = vld [vmem:[#allocation9 + $0x38] sm:$0xff] }
 0x268   :  { %v4142_v1 = vpack.c.bf16 %v1572_v56, %v1570_v58  ;;  %v1729_v17 = vld [vmem:[#allocation9 + $0x400] sm:$0xff]  ;;  %v1731_v52 = vld [vmem:[#allocation9 + $0x410] sm:$0xff]  ;;  %v1734_v58 = vld [vmem:[#allocation9 + $0x428] sm:$0xff] }
 0x269   :  { %v1736_v56 = vld [vmem:[#allocation9 + $0x438] sm:$0xff]  ;;  %v4158_v60 = vpack.c.bf16 %v1731_v52, %v1729_v17  ;;  %v1738_v20 = vld [vmem:[#allocation9 + $0x448] sm:$0xff]  ;;  %v2017_v52 = vld [vmem:[#allocation9 + $0x90] sm:$0xff] }
 0x26a   :  { %3999 = vmatpush1.bf16.msra.mxu0 %v3998_v3  ;;  %4127 = vmatpush1.bf16.msra.mxu1 %v4126_v6  ;;  %v1303_v3 = vld [vmem:[#allocation9 + $0xfa0] sm:$0xff]  ;;  %v1305_v6 = vld [vmem:[#allocation9 + $0xfb0] sm:$0xff]  ;;  %v1740_v63 = vld [vmem:[#allocation9 + $0x458] sm:$0xff] }
 0x26b   :  { %4001 = vmatprep.subr.bf16.mxu0 %v4000_v13  ;;  %4129 = vmatprep.subr.bf16.mxu1 %v4128_v14  ;;  %v1574_v13 = vld [vmem:[#allocation9 + $0xba0] sm:$0xff]  ;;  %v1576_v14 = vld [vmem:[#allocation9 + $0xbb0] sm:$0xff]  ;;  %v4018_v24 = vpack.c.bf16 %v1305_v6, %v1303_v3  ;;  %v2008_v4 = vld [vmem:[#allocation9 + $0x48] sm:$0xff] }
 0x26c   :  { %v4146_v27 = vpack.c.bf16 %v1576_v14, %v1574_v13  ;;  %v1733_v3 = vld [vmem:[#allocation9 + $0x420] sm:$0xff]  ;;  %v1735_v6 = vld [vmem:[#allocation9 + $0x430] sm:$0xff]  ;;  %v4160_v13 = vpack.c.bf16 %v1736_v56, %v1734_v58  ;;  %v4288_v14 = vpack.c.bf16 %v2006_v48, %v2004_v43  ;;  %v1744_v40 = vld [vmem:[#allocation9 + $0x478] sm:$0xff] }
 0x26d   :  { %v2012_v8 = vld [vmem:[#allocation9 + $0x68] sm:$0xff]  ;;  %v2014_v33 = vld [vmem:[#allocation9 + $0x78] sm:$0xff] }
 0x26e   :  { %4003 = vmatpush1.bf16.msra.mxu0 %v4002_v28  ;;  %4131 = vmatpush1.bf16.msra.mxu1 %v4130_v29  ;;  %v1307_v28 = vld [vmem:[#allocation9 + $0xfc0] sm:$0xff]  ;;  %v1309_v29 = vld [vmem:[#allocation9 + $0xfd0] sm:$0xff]  ;;  %v2020_v58 = vld [vmem:[#allocation9 + $0xa8] sm:$0xff] }
 0x26f   :  { %4005 = vmatprep.subr.bf16.mxu0 %v4004_v37  ;;  %4133 = vmatprep.subr.bf16.mxu1 %v4132_v38  ;;  %v1578_v37 = vld [vmem:[#allocation9 + $0xbc0] sm:$0xff]  ;;  %v1580_v38 = vld [vmem:[#allocation9 + $0xbd0] sm:$0xff]  ;;  %v4022_v2 = vpack.c.bf16 %v1309_v29, %v1307_v28  ;;  %v4164_v28 = vpack.c.bf16 %v1740_v63, %v1738_v20  ;;  %v2022_v56 = vld [vmem:[#allocation9 + $0xb8] sm:$0xff] }
 0x270   :  { %v4150_v26 = vpack.c.bf16 %v1580_v38, %v1578_v37  ;;  %v1737_v29 = vld [vmem:[#allocation9 + $0x440] sm:$0xff]  ;;  %v2009_v37 = vld [vmem:[#allocation9 + $0x50] sm:$0xff]  ;;  %v1742_v38 = vld [vmem:[#allocation9 + $0x468] sm:$0xff] }
 0x272   :  { %4007 = vmatpush1.bf16.msra.mxu0 %v4006_v16  ;;  %4135 = vmatpush1.bf16.msra.mxu1 %v4134_v25  ;;  %v1311_v16 = vld [vmem:[#allocation9 + $0xfe0] sm:$0xff]  ;;  %v1313_v25 = vld [vmem:[#allocation9 + $0xff0] sm:$0xff] }
 0x273   :  { %4009 = vmatprep.subr.bf16.mxu0 %v4008_v46  ;;  %4137 = vmatprep.subr.bf16.mxu1 %v4136_v21  ;;  %v1582_v46 = vld [vmem:[#allocation9 + $0xbe0] sm:$0xff]  ;;  %v1584_v21 = vld [vmem:[#allocation9 + $0xbf0] sm:$0xff]  ;;  %v4026_v30 = vpack.c.bf16 %v1313_v25, %v1311_v16 }
 0x274   :  { %v4154_v49 = vpack.c.bf16 %v1584_v21, %v1582_v46  ;;  %v1743_v16 = vld [vmem:[#allocation9 + $0x470] sm:$0xff]  ;;  %v2011_v25 = vld [vmem:[#allocation9 + $0x60] sm:$0xff]  ;;  %v1746_v46 = vld [vmem:[#allocation9 + $0x488] sm:$0xff] }
 0x275   :  { %v1748_v21 = vld [vmem:[#allocation9 + $0x498] sm:$0xff] }
 0x276   :  { %4011 = vmatpush1.bf16.msra.mxu0 %v4010_v42  ;;  %4139 = vmatpush1.bf16.msra.mxu1 %v4138_v51  ;;  %v4156_v42 = vpack.c.bf16 %v1732_v55, %v1730_v39  ;;  %v4284_v51 = vpack.c.bf16 %v2002_v50, %v2000_v47  ;;  %v2016_v39 = vld [vmem:[#allocation9 + $0x88] sm:$0xff]  ;;  %v2018_v55 = vld [vmem:[#allocation9 + $0x98] sm:$0xff] }
 0x277   :  { %4013 = vmatprep.subr.bf16.mxu0 %v4012_v53  ;;  %4141 = vmatprep.subr.bf16.mxu1 %v4140_v54  ;;  %v1999_v53 = vld [vmem:[#allocation9] sm:$0xff]  ;;  %v2001_v54 = vld [vmem:[#allocation9 + $0x10] sm:$0xff]  ;;  %v4300_v17 = vpack.c.bf16 %v2018_v55, %v2016_v39 }
 0x278   :  { %v1763_v39 = vld [vmem:[#allocation9 + $0x510] sm:$0xff]  ;;  %v2031_v55 = vld [vmem:[#allocation9 + $0x100] sm:$0xff] }
 0x27a   :  { %4015 = vmatpush1.bf16.msra.mxu0 %v4014_v62  ;;  %4143 = vmatpush1.bf16.msra.mxu1 %v4142_v1  ;;  %v1160_v62 = vmax.f32 %v5412_v5, 0.0  ;;  %v4286_v1 = vpack.c.bf16 %v2001_v54, %v1999_v53  ;;  %v4162_v5 = vpack.c.bf16 %v1735_v6, %v1733_v3  ;;  %v1750_v53 = vld [vmem:[#allocation9 + $0x4a8] sm:$0xff]  ;;  %v1752_v54 = vld [vmem:[#allocation9 + $0x4b8] sm:$0xff]  ;;  %v4304_v3 = vpack.c.bf16 %v2022_v56, %v2020_v58  ;;  %v2021_v6 = vld [vmem:[#allocation9 + $0xb0] sm:$0xff] }
 0x27b   :  { %4017 = vmatprep.subr.bf16.mxu0 %v4016_v9  ;;  %4145 = vmatprep.subr.bf16.mxu1 %v4144_v11  ;;  %v2003_v9 = vld [vmem:[#allocation9 + $0x20] sm:$0xff]  ;;  %v1171_v11 = vmax.f32 %v5414_v32, 0.0  ;;  %v1739_v32 = vld [vmem:[#allocation9 + $0x450] sm:$0xff] }
 0x27c   :  { %v4166_v12 = vpack.c.bf16 %v1739_v32, %v1737_v29  ;;  %v1760_v29 = vld [vmem:[#allocation9 + $0x4f8] sm:$0xff]  ;;  %v2028_v32 = vld [vmem:[#allocation9 + $0xe8] sm:$0xff]  ;;  %v1767_v58 = vld [vmem:[#allocation9 + $0x530] sm:$0xff] }
 0x27d   :  { %v2035_v56 = vld [vmem:[#allocation9 + $0x120] sm:$0xff] }
 0x27e   :  { %4019 = vmatpush1.bf16.msra.mxu0 %v4018_v24  ;;  %4147 = vmatpush1.bf16.msra.mxu1 %v4146_v27  ;;  %v2010_v24 = vld [vmem:[#allocation9 + $0x58] sm:$0xff]  ;;  %v4290_v27 = vpack.c.bf16 %v2005_v15, %v2003_v9  ;;  %v1754_v9 = vld [vmem:[#allocation9 + $0x4c8] sm:$0xff] }
 0x27f   :  { %4021 = vmatprep.subr.bf16.mxu0 %v4020_v34  ;;  %4149 = vmatprep.subr.bf16.mxu1 %v4148_v36  ;;  %v2007_v34 = vld [vmem:[#allocation9 + $0x40] sm:$0xff]  ;;  %v4292_v36 = vpack.c.bf16 %v2010_v24, %v2008_v4  ;;  %v1755_v4 = vld [vmem:[#allocation9 + $0x4d0] sm:$0xff] }
 0x280   :  { %v4294_v18 = vpack.c.bf16 %v2009_v37, %v2007_v34  ;;  %v2023_v24 = vld [vmem:[#allocation9 + $0xc0] sm:$0xff]  ;;  %v2030_v34 = vld [vmem:[#allocation9 + $0xf8] sm:$0xff] }
 0x282   :  { %4023 = vmatpush1.bf16.msra.mxu0 %v4022_v2  ;;  %4151 = vmatpush1.bf16.msra.mxu1 %v4150_v26  ;;  %v4168_v2 = vpack.c.bf16 %v1744_v40, %v1742_v38  ;;  %v1741_v26 = vld [vmem:[#allocation9 + $0x460] sm:$0xff] }
 0x283   :  { %4025 = vmatprep.subr.bf16.mxu0 %v4024_v44  ;;  %4153 = vmatprep.subr.bf16.mxu1 %v4152_v59  ;;  %v4296_v44 = vpack.c.bf16 %v2014_v33, %v2012_v8  ;;  %v2013_v59 = vld [vmem:[#allocation9 + $0x70] sm:$0xff]  ;;  %v4170_v47 = vpack.c.bf16 %v1743_v16, %v1741_v26  ;;  %v1757_v40 = vld [vmem:[#allocation9 + $0x4e0] sm:$0xff]  ;;  %v1764_v26 = vld [vmem:[#allocation9 + $0x518] sm:$0xff] }
 0x284   :  { %v4298_v50 = vpack.c.bf16 %v2013_v59, %v2011_v25  ;;  %v1759_v8 = vld [vmem:[#allocation9 + $0x4f0] sm:$0xff]  ;;  %v2027_v33 = vld [vmem:[#allocation9 + $0xe0] sm:$0xff]  ;;  %v2032_v16 = vld [vmem:[#allocation9 + $0x108] sm:$0xff] }
 0x285   :  { %v2034_v25 = vld [vmem:[#allocation9 + $0x118] sm:$0xff] }
 0x286   :  { %4027 = vmatpush1.bf16.msra.mxu0 %v4026_v30  ;;  %4155 = vmatpush1.bf16.msra.mxu1 %v4154_v49  ;;  %v4172_v30 = vpack.c.bf16 %v1748_v21, %v1746_v46  ;;  %v1745_v49 = vld [vmem:[#allocation9 + $0x480] sm:$0xff] }
 0x287   :  { %4157 = vmatprep.subr.bf16.mxu0 %v4156_v42  ;;  %4285 = vmatprep.subr.bf16.mxu1 %v4284_v51  ;;  %v1747_v42 = vld [vmem:[#allocation9 + $0x490] sm:$0xff]  ;;  %v2015_v51 = vld [vmem:[#allocation9 + $0x80] sm:$0xff] }
 0x288   :  { %v4174_v43 = vpack.c.bf16 %v1747_v42, %v1745_v49  ;;  %v4302_v48 = vpack.c.bf16 %v2017_v52, %v2015_v51  ;;  %v1761_v21 = vld [vmem:[#allocation9 + $0x500] sm:$0xff]  ;;  %v1768_v49 = vld [vmem:[#allocation9 + $0x538] sm:$0xff]  ;;  %v2036_v42 = vld [vmem:[#allocation9 + $0x128] sm:$0xff] }
 0x289   :  { %1451 = vmatmul.mubr.f32.vlgmr.msra.gmra.mrb[8].mxu0 %v1148_v61  ;;  %1722 = vmatmul.mubr.f32.vlgmr.msra.gmra.mrb[8].mxu1 %v1160_v62  ;;  %v1749_v61 = vld [vmem:[#allocation9 + $0x4a0] sm:$0xff]  ;;  %v1751_v62 = vld [vmem:[#allocation9 + $0x4b0] sm:$0xff]  ;;  %v2038_v51 = vld [vmem:[#allocation9 + $0x138] sm:$0xff] }
 0x28a   :  { %4159 = vmatpush1.bf16.msra.mxu0 %v4158_v60  ;;  %1921 = vmatprep.mubr.f32.mxu0 %v1171_v11  ;;  %v4176_v60 = vpack.c.bf16 %v1752_v54, %v1750_v53  ;;  %v1756_v11 = vld [vmem:[#allocation9 + $0x4d8] sm:$0xff]  ;;  %v4178_v15 = vpack.c.bf16 %v1751_v62, %v1749_v61  ;;  %v1765_v54 = vld [vmem:[#allocation9 + $0x520] sm:$0xff]  ;;  %v2040_v62 = vld [vmem:[#allocation9 + $0x148] sm:$0xff] }
 0x28b   :  { %4287 = vmatpush1.bf16.msra.mxu1 %v4286_v1  ;;  %2191 = vmatprep.mubr.f32.mxu1 %v1183_v23  ;;  %v2019_v1 = vld [vmem:[#allocation9 + $0xa0] sm:$0xff]  ;;  %v4180_v63 = vpack.c.bf16 %v1756_v11, %v1754_v9  ;;  %v1772_v61 = vld [vmem:[#allocation9 + $0x558] sm:$0xff] }
 0x28c   :  { %4161 = vmatprep.subr.bf16.mxu0 %v4160_v13  ;;  %4289 = vmatprep.subr.bf16.mxu1 %v4288_v14  ;;  %v2024_v13 = vld [vmem:[#allocation9 + $0xc8] sm:$0xff]  ;;  %v2026_v14 = vld [vmem:[#allocation9 + $0xd8] sm:$0xff]  ;;  %v4306_v20 = vpack.c.bf16 %v2021_v6, %v2019_v1  ;;  %v1753_v23 = vld [vmem:[#allocation9 + $0x4c0] sm:$0xff] }
 0x28d   :  { %v2042_v1 = vld [vmem:[#allocation9 + $0x158] sm:$0xff]  ;;  %v1769_v11 = vld [vmem:[#allocation9 + $0x540] sm:$0xff] }
 0x28e   :  { %4163 = vmatpush1.bf16.msra.mxu0 %v4162_v5  ;;  %v4308_v5 = vpack.c.bf16 %v2026_v14, %v2024_v13  ;;  %v1771_v13 = vld [vmem:[#allocation9 + $0x550] sm:$0xff]  ;;  %v2039_v14 = vld [vmem:[#allocation9 + $0x140] sm:$0xff] }
 0x28f   :  { %4291 = vmatpush1.bf16.msra.mxu1 %v4290_v27  ;;  %4165 = vmatprep.subr.bf16.mxu0 %v4164_v28  ;;  %v2025_v27 = vld [vmem:[#allocation9 + $0xd0] sm:$0xff]  ;;  %v1758_v28 = vld [vmem:[#allocation9 + $0x4e8] sm:$0xff] }
 0x290   :  { %4293 = vmatprep.subr.bf16.mxu1 %v4292_v36  ;;  %v4182_v36 = vpack.c.bf16 %v1755_v4, %v1753_v23  ;;  %v4310_v37 = vpack.c.bf16 %v2025_v27, %v2023_v24  ;;  %v4184_v38 = vpack.c.bf16 %v1760_v29, %v1758_v28  ;;  %v1776_v23 = vld [vmem:[#allocation9 + $0x578] sm:$0xff]  ;;  %v2044_v4 = vld [vmem:[#allocation9 + $0x168] sm:$0xff]  ;;  %v1773_v29 = vld [vmem:[#allocation9 + $0x560] sm:$0xff] }
 0x291   :  { %v2046_v24 = vld [vmem:[#allocation9 + $0x178] sm:$0xff] }
 0x292   :  { %4167 = vmatpush1.bf16.msra.mxu0 %v4166_v12  ;;  %v4312_v12 = vpack.c.bf16 %v2030_v34, %v2028_v32  ;;  %v1775_v32 = vld [vmem:[#allocation9 + $0x570] sm:$0xff]  ;;  %v2043_v34 = vld [vmem:[#allocation9 + $0x160] sm:$0xff] }
 0x293   :  { %4295 = vmatpush1.bf16.msra.mxu1 %v4294_v18  ;;  %4169 = vmatprep.subr.bf16.mxu0 %v4168_v2  ;;  %v2029_v18 = vld [vmem:[#allocation9 + $0xf0] sm:$0xff]  ;;  %v1762_v2 = vld [vmem:[#allocation9 + $0x508] sm:$0xff] }
 0x294   :  { %4297 = vmatprep.subr.bf16.mxu1 %v4296_v44  ;;  %v4186_v44 = vpack.c.bf16 %v1759_v8, %v1757_v40  ;;  %v4314_v59 = vpack.c.bf16 %v2029_v18, %v2027_v33  ;;  %v4188_v46 = vpack.c.bf16 %v1764_v26, %v1762_v2  ;;  %v1780_v40 = vld [vmem:[#allocation9 + $0x598] sm:$0xff]  ;;  %v2048_v8 = vld [vmem:[#allocation9 + $0x188] sm:$0xff]  ;;  %v1777_v26 = vld [vmem:[#allocation9 + $0x580] sm:$0xff] }
 0x295   :  { %v2050_v33 = vld [vmem:[#allocation9 + $0x198] sm:$0xff] }
 0x296   :  { %4171 = vmatpush1.bf16.msra.mxu0 %v4170_v47  ;;  %v4316_v47 = vpack.c.bf16 %v2034_v25, %v2032_v16  ;;  %v1779_v16 = vld [vmem:[#allocation9 + $0x590] sm:$0xff]  ;;  %v2047_v25 = vld [vmem:[#allocation9 + $0x180] sm:$0xff] }
 0x297   :  { %4299 = vmatpush1.bf16.msra.mxu1 %v4298_v50  ;;  %4173 = vmatprep.subr.bf16.mxu0 %v4172_v30  ;;  %v2033_v50 = vld [vmem:[#allocation9 + $0x110] sm:$0xff]  ;;  %v1766_v30 = vld [vmem:[#allocation9 + $0x528] sm:$0xff] }
 0x298   :  { %4301 = vmatprep.subr.bf16.mxu1 %v4300_v17  ;;  %v4190_v17 = vpack.c.bf16 %v1763_v39, %v1761_v21  ;;  %v4318_v52 = vpack.c.bf16 %v2033_v50, %v2031_v55  ;;  %v4192_v53 = vpack.c.bf16 %v1768_v49, %v1766_v30  ;;  %v1784_v21 = vld [vmem:[#allocation9 + $0x5b8] sm:$0xff]  ;;  %v2052_v39 = vld [vmem:[#allocation9 + $0x1a8] sm:$0xff]  ;;  %v1781_v49 = vld [vmem:[#allocation9 + $0x5a0] sm:$0xff] }
 0x299   :  { %v2054_v55 = vld [vmem:[#allocation9 + $0x1b8] sm:$0xff] }
 0x29a   :  { %4175 = vmatpush1.bf16.msra.mxu0 %v4174_v43  ;;  %v4320_v43 = vpack.c.bf16 %v2038_v51, %v2036_v42  ;;  %v1783_v42 = vld [vmem:[#allocation9 + $0x5b0] sm:$0xff]  ;;  %v2051_v51 = vld [vmem:[#allocation9 + $0x1a0] sm:$0xff] }
 0x29b   :  { %4303 = vmatpush1.bf16.msra.mxu1 %v4302_v48  ;;  %4177 = vmatprep.subr.bf16.mxu0 %v4176_v60  ;;  %v2037_v48 = vld [vmem:[#allocation9 + $0x130] sm:$0xff]  ;;  %v1770_v60 = vld [vmem:[#allocation9 + $0x548] sm:$0xff] }
 0x29c   :  { %4305 = vmatprep.subr.bf16.mxu1 %v4304_v3  ;;  %v4194_v3 = vpack.c.bf16 %v1767_v58, %v1765_v54  ;;  %v4322_v6 = vpack.c.bf16 %v2037_v48, %v2035_v56  ;;  %v4196_v9 = vpack.c.bf16 %v1772_v61, %v1770_v60  ;;  %v1788_v54 = vld [vmem:[#allocation9 + $0x5d8] sm:$0xff]  ;;  %v2056_v58 = vld [vmem:[#allocation9 + $0x1c8] sm:$0xff]  ;;  %v1785_v61 = vld [vmem:[#allocation9 + $0x5c0] sm:$0xff] }
 0x29d   :  { %v2058_v56 = vld [vmem:[#allocation9 + $0x1d8] sm:$0xff] }
 0x29e   :  { %4179 = vmatpush1.bf16.msra.mxu0 %v4178_v15  ;;  %v4324_v15 = vpack.c.bf16 %v2042_v1, %v2040_v62  ;;  %v1787_v62 = vld [vmem:[#allocation9 + $0x5d0] sm:$0xff]  ;;  %v2055_v1 = vld [vmem:[#allocation9 + $0x1c0] sm:$0xff] }
 0x29f   :  { %4307 = vmatpush1.bf16.msra.mxu1 %v4306_v20  ;;  %4181 = vmatprep.subr.bf16.mxu0 %v4180_v63  ;;  %v2041_v20 = vld [vmem:[#allocation9 + $0x150] sm:$0xff]  ;;  %v1774_v63 = vld [vmem:[#allocation9 + $0x568] sm:$0xff] }
 0x2a0   :  { %4309 = vmatprep.subr.bf16.mxu1 %v4308_v5  ;;  %v4198_v5 = vpack.c.bf16 %v1771_v13, %v1769_v11  ;;  %v4326_v27 = vpack.c.bf16 %v2041_v20, %v2039_v14  ;;  %v4200_v28 = vpack.c.bf16 %v1776_v23, %v1774_v63  ;;  %v1792_v11 = vld [vmem:[#allocation9 + $0x5f8] sm:$0xff]  ;;  %v2060_v13 = vld [vmem:[#allocation9 + $0x1e8] sm:$0xff]  ;;  %v1789_v23 = vld [vmem:[#allocation9 + $0x5e0] sm:$0xff] }
 0x2a1   :  { %v2062_v14 = vld [vmem:[#allocation9 + $0x1f8] sm:$0xff] }
 0x2a2   :  { %4183 = vmatpush1.bf16.msra.mxu0 %v4182_v36  ;;  %v4328_v36 = vpack.c.bf16 %v2046_v24, %v2044_v4  ;;  %v1791_v4 = vld [vmem:[#allocation9 + $0x5f0] sm:$0xff]  ;;  %v2059_v24 = vld [vmem:[#allocation9 + $0x1e0] sm:$0xff] }
 0x2a3   :  { %4311 = vmatpush1.bf16.msra.mxu1 %v4310_v37  ;;  %4185 = vmatprep.subr.bf16.mxu0 %v4184_v38  ;;  %v2045_v37 = vld [vmem:[#allocation9 + $0x170] sm:$0xff]  ;;  %v1778_v38 = vld [vmem:[#allocation9 + $0x588] sm:$0xff] }
 0x2a4   :  { %4313 = vmatprep.subr.bf16.mxu1 %v4312_v12  ;;  %v4202_v12 = vpack.c.bf16 %v1775_v32, %v1773_v29  ;;  %v4330_v18 = vpack.c.bf16 %v2045_v37, %v2043_v34  ;;  %v4204_v2 = vpack.c.bf16 %v1780_v40, %v1778_v38  ;;  %v1796_v29 = vld [vmem:[#allocation9 + $0x618] sm:$0xff]  ;;  %v2064_v32 = vld [vmem:[#allocation9 + $0x208] sm:$0xff]  ;;  %v1793_v40 = vld [vmem:[#allocation9 + $0x600] sm:$0xff] }
 0x2a5   :  { %v2066_v34 = vld [vmem:[#allocation9 + $0x218] sm:$0xff] }
 0x2a6   :  { %4187 = vmatpush1.bf16.msra.mxu0 %v4186_v44  ;;  %v4332_v44 = vpack.c.bf16 %v2050_v33, %v2048_v8  ;;  %v1795_v8 = vld [vmem:[#allocation9 + $0x610] sm:$0xff]  ;;  %v4348_v33 = vpack.c.bf16 %v2066_v34, %v2064_v32  ;;  %v2079_v34 = vld [vmem:[#allocation9 + $0x280] sm:$0xff] }
 0x2a7   :  { %4315 = vmatpush1.bf16.msra.mxu1 %v4314_v59  ;;  %4189 = vmatprep.subr.bf16.mxu0 %v4188_v46  ;;  %v2049_v59 = vld [vmem:[#allocation9 + $0x190] sm:$0xff]  ;;  %v1782_v46 = vld [vmem:[#allocation9 + $0x5a8] sm:$0xff] }
 0x2a8   :  { %4317 = vmatprep.subr.bf16.mxu1 %v4316_v47  ;;  %v4206_v47 = vpack.c.bf16 %v1779_v16, %v1777_v26  ;;  %v4334_v50 = vpack.c.bf16 %v2049_v59, %v2047_v25  ;;  %v4208_v30 = vpack.c.bf16 %v1784_v21, %v1782_v46  ;;  %v1800_v26 = vld [vmem:[#allocation9 + $0x638] sm:$0xff]  ;;  %v4222_v16 = vpack.c.bf16 %v1795_v8, %v1793_v40  ;;  %v2068_v25 = vld [vmem:[#allocation9 + $0x228] sm:$0xff]  ;;  %v1797_v21 = vld [vmem:[#allocation9 + $0x620] sm:$0xff] }
 0x2a9   :  { %v1170_v59 = vmax.f32 %v5418_v22, 0.0  ;;  %v1185_v22 = vmax.f32 %v5427_v41, 0.0  ;;  %v1811_v32 = vld [vmem:[#allocation9 + $0x690] sm:$0xff]  ;;  %v1816_v40 = vld [vmem:[#allocation9 + $0x6b8] sm:$0xff]  ;;  %v2084_v8 = vld [vmem:[#allocation9 + $0x2a8] sm:$0xff] }
 0x2aa   :  { %4191 = vmatpush1.bf16.msra.mxu0 %v4190_v17  ;;  %v4336_v17 = vpack.c.bf16 %v2054_v55, %v2052_v39  ;;  %v1799_v39 = vld [vmem:[#allocation9 + $0x630] sm:$0xff]  ;;  %v2067_v55 = vld [vmem:[#allocation9 + $0x220] sm:$0xff] }
 0x2ab   :  { %4319 = vmatpush1.bf16.msra.mxu1 %v4318_v52  ;;  %4193 = vmatprep.subr.bf16.mxu0 %v4192_v53  ;;  %v2053_v52 = vld [vmem:[#allocation9 + $0x1b0] sm:$0xff]  ;;  %v1786_v53 = vld [vmem:[#allocation9 + $0x5c8] sm:$0xff] }
 0x2ac   :  { %4321 = vmatprep.subr.bf16.mxu1 %v4320_v43  ;;  %v4210_v43 = vpack.c.bf16 %v1783_v42, %v1781_v49  ;;  %v4338_v48 = vpack.c.bf16 %v2053_v52, %v2051_v51  ;;  %v4212_v60 = vpack.c.bf16 %v1788_v54, %v1786_v53  ;;  %v1802_v49 = vld [vmem:[#allocation9 + $0x648] sm:$0xff]  ;;  %v1804_v42 = vld [vmem:[#allocation9 + $0x658] sm:$0xff]  ;;  %v1173_v51 = vmax.f32 %v5424_v19, 0.0 }
 0x2ad   :  { %v2072_v52 = vld [vmem:[#allocation9 + $0x248] sm:$0xff]  ;;  %v2074_v53 = vld [vmem:[#allocation9 + $0x258] sm:$0xff]  ;;  %v4226_v54 = vpack.c.bf16 %v1799_v39, %v1797_v21 }
 0x2ae   :  { %4195 = vmatpush1.bf16.msra.mxu0 %v4194_v3  ;;  %v4340_v3 = vpack.c.bf16 %v2058_v56, %v2056_v58  ;;  %v1801_v56 = vld [vmem:[#allocation9 + $0x640] sm:$0xff]  ;;  %v1806_v19 = vld [vmem:[#allocation9 + $0x668] sm:$0xff]  ;;  %v1820_v21 = vld [vmem:[#allocation9 + $0x6d8] sm:$0xff] }
 0x2af   :  { %4323 = vmatpush1.bf16.msra.mxu1 %v4322_v6  ;;  %4197 = vmatprep.subr.bf16.mxu0 %v4196_v9  ;;  %v2057_v6 = vld [vmem:[#allocation9 + $0x1d0] sm:$0xff]  ;;  %v1790_v9 = vld [vmem:[#allocation9 + $0x5e8] sm:$0xff] }
 0x2b0   :  { %4325 = vmatprep.subr.bf16.mxu1 %v4324_v15  ;;  %v4214_v15 = vpack.c.bf16 %v1787_v62, %v1785_v61  ;;  %v4342_v20 = vpack.c.bf16 %v2057_v6, %v2055_v1  ;;  %v4216_v63 = vpack.c.bf16 %v1792_v11, %v1790_v9  ;;  %v2073_v61 = vld [vmem:[#allocation9 + $0x250] sm:$0xff]  ;;  %v1808_v62 = vld [vmem:[#allocation9 + $0x678] sm:$0xff]  ;;  %v2076_v1 = vld [vmem:[#allocation9 + $0x268] sm:$0xff] }
 0x2b1   :  { %v4232_v9 = vpack.c.bf16 %v1808_v62, %v1806_v19  ;;  %v1805_v11 = vld [vmem:[#allocation9 + $0x660] sm:$0xff]  ;;  %v2088_v39 = vld [vmem:[#allocation9 + $0x2c8] sm:$0xff]  ;;  %v2093_v62 = vld [vmem:[#allocation9 + $0x2f0] sm:$0xff] }
 0x2b2   :  { %4199 = vmatpush1.bf16.msra.mxu0 %v4198_v5  ;;  %v4344_v5 = vpack.c.bf16 %v2062_v14, %v2060_v13  ;;  %v1807_v13 = vld [vmem:[#allocation9 + $0x670] sm:$0xff]  ;;  %v2075_v14 = vld [vmem:[#allocation9 + $0x260] sm:$0xff] }
 0x2b3   :  { %4327 = vmatpush1.bf16.msra.mxu1 %v4326_v27  ;;  %4201 = vmatprep.subr.bf16.mxu0 %v4200_v28  ;;  %v2061_v27 = vld [vmem:[#allocation9 + $0x1f0] sm:$0xff]  ;;  %v1794_v28 = vld [vmem:[#allocation9 + $0x608] sm:$0xff] }
 0x2b4   :  { %4329 = vmatprep.subr.bf16.mxu1 %v4328_v36  ;;  %v4218_v36 = vpack.c.bf16 %v1791_v4, %v1789_v23  ;;  %v4346_v37 = vpack.c.bf16 %v2061_v27, %v2059_v24  ;;  %v4220_v38 = vpack.c.bf16 %v1796_v29, %v1794_v28  ;;  %v1812_v23 = vld [vmem:[#allocation9 + $0x698] sm:$0xff]  ;;  %v2080_v4 = vld [vmem:[#allocation9 + $0x288] sm:$0xff]  ;;  %v1809_v29 = vld [vmem:[#allocation9 + $0x680] sm:$0xff] }
 0x2b5   :  { %v2082_v24 = vld [vmem:[#allocation9 + $0x298] sm:$0xff] }
 0x2b6   :  { %4203 = vmatpush1.bf16.msra.mxu0 %v4202_v12  ;;  %v2063_v12 = vld [vmem:[#allocation9 + $0x200] sm:$0xff] }
 0x2b7   :  { %4331 = vmatpush1.bf16.msra.mxu1 %v4330_v18  ;;  %4205 = vmatprep.subr.bf16.mxu0 %v4204_v2  ;;  %v2065_v18 = vld [vmem:[#allocation9 + $0x210] sm:$0xff]  ;;  %v1798_v2 = vld [vmem:[#allocation9 + $0x628] sm:$0xff] }
 0x2b8   :  { %4333 = vmatprep.subr.bf16.mxu1 %v4332_v44  ;;  %v2070_v44 = vld [vmem:[#allocation9 + $0x238] sm:$0xff]  ;;  %v4350_v46 = vpack.c.bf16 %v2065_v18, %v2063_v12  ;;  %v4238_v12 = vpack.c.bf16 %v1811_v32, %v1809_v29 }
 0x2ba   :  { %4207 = vmatpush1.bf16.msra.mxu0 %v4206_v47  ;;  %v1182_v47 = vmax.f32 %v5421_v35, 0.0  ;;  %v4228_v35 = vpack.c.bf16 %v1804_v42, %v1802_v49  ;;  %v1817_v49 = vld [vmem:[#allocation9 + $0x6c0] sm:$0xff]  ;;  %v1819_v42 = vld [vmem:[#allocation9 + $0x6d0] sm:$0xff] }
 0x2bb   :  { %4335 = vmatpush1.bf16.msra.mxu1 %v4334_v50  ;;  %4209 = vmatprep.subr.bf16.mxu0 %v4208_v30  ;;  %v4224_v50 = vpack.c.bf16 %v1800_v26, %v1798_v2  ;;  %v2069_v30 = vld [vmem:[#allocation9 + $0x230] sm:$0xff]  ;;  %v1813_v26 = vld [vmem:[#allocation9 + $0x6a0] sm:$0xff] }
 0x2bc   :  { %4337 = vmatprep.subr.bf16.mxu1 %v4336_v17  ;;  %v4352_v17 = vpack.c.bf16 %v2070_v44, %v2068_v25  ;;  %v4354_v58 = vpack.c.bf16 %v2069_v30, %v2067_v55  ;;  %v2083_v25 = vld [vmem:[#allocation9 + $0x2a0] sm:$0xff]  ;;  %v2090_v55 = vld [vmem:[#allocation9 + $0x2d8] sm:$0xff] }
 0x2be   :  { %4211 = vmatpush1.bf16.msra.mxu0 %v4210_v43  ;;  %v1803_v43 = vld [vmem:[#allocation9 + $0x650] sm:$0xff] }
 0x2bf   :  { %4339 = vmatpush1.bf16.msra.mxu1 %v4338_v48  ;;  %4213 = vmatprep.subr.bf16.mxu0 %v4212_v60  ;;  %v2071_v48 = vld [vmem:[#allocation9 + $0x240] sm:$0xff]  ;;  %v4356_v60 = vpack.c.bf16 %v2074_v53, %v2072_v52  ;;  %v4230_v6 = vpack.c.bf16 %v1803_v43, %v1801_v56  ;;  %v2089_v52 = vld [vmem:[#allocation9 + $0x2d0] sm:$0xff]  ;;  %v1822_v53 = vld [vmem:[#allocation9 + $0x6e8] sm:$0xff] }
 0x2c0   :  { %4341 = vmatprep.subr.bf16.mxu1 %v4340_v3  ;;  %v2078_v3 = vld [vmem:[#allocation9 + $0x278] sm:$0xff]  ;;  %v4358_v41 = vpack.c.bf16 %v2073_v61, %v2071_v48  ;;  %v1821_v48 = vld [vmem:[#allocation9 + $0x6e0] sm:$0xff] }
 0x2c1   :  { %v2091_v61 = vld [vmem:[#allocation9 + $0x2e0] sm:$0xff] }
 0x2c2   :  { %4215 = vmatpush1.bf16.msra.mxu0 %v4214_v15  ;;  %v4360_v15 = vpack.c.bf16 %v2078_v3, %v2076_v1  ;;  %v1826_v1 = vld [vmem:[#allocation9 + $0x708] sm:$0xff]  ;;  %v1828_v3 = vld [vmem:[#allocation9 + $0x718] sm:$0xff] }
 0x2c3   :  { %4343 = vmatpush1.bf16.msra.mxu1 %v4342_v20  ;;  %4217 = vmatprep.subr.bf16.mxu0 %v4216_v63  ;;  %v2077_v20 = vld [vmem:[#allocation9 + $0x270] sm:$0xff]  ;;  %v1810_v63 = vld [vmem:[#allocation9 + $0x688] sm:$0xff] }
 0x2c4   :  { %4345 = vmatprep.subr.bf16.mxu1 %v4344_v5  ;;  %v4234_v5 = vpack.c.bf16 %v1807_v13, %v1805_v11  ;;  %v4362_v27 = vpack.c.bf16 %v2077_v20, %v2075_v14  ;;  %v4236_v28 = vpack.c.bf16 %v1812_v23, %v1810_v63  ;;  %v4378_v11 = vpack.c.bf16 %v2093_v62, %v2091_v61  ;;  %v1825_v14 = vld [vmem:[#allocation9 + $0x700] sm:$0xff]  ;;  %v2097_v23 = vld [vmem:[#allocation9 + $0x310] sm:$0xff] }
 0x2c5   :  { %v4252_v13 = vpack.c.bf16 %v1828_v3, %v1826_v1  ;;  %v2095_v20 = vld [vmem:[#allocation9 + $0x300] sm:$0xff]  ;;  %v2113_v3 = vld [vmem:[#allocation9 + $0x390] sm:$0xff] }
 0x2c6   :  { %4219 = vmatpush1.bf16.msra.mxu0 %v4218_v36  ;;  %v4364_v36 = vpack.c.bf16 %v2082_v24, %v2080_v4  ;;  %v1830_v4 = vld [vmem:[#allocation9 + $0x728] sm:$0xff]  ;;  %v1832_v24 = vld [vmem:[#allocation9 + $0x738] sm:$0xff]  ;;  %v4382_v29 = vpack.c.bf16 %v2097_v23, %v2095_v20  ;;  %v1841_v61 = vld [vmem:[#allocation9 + $0x780] sm:$0xff] }
 0x2c7   :  { %4347 = vmatpush1.bf16.msra.mxu1 %v4346_v37  ;;  %4221 = vmatprep.subr.bf16.mxu0 %v4220_v38  ;;  %v2081_v37 = vld [vmem:[#allocation9 + $0x290] sm:$0xff]  ;;  %v1814_v38 = vld [vmem:[#allocation9 + $0x6a8] sm:$0xff]  ;;  %v4256_v32 = vpack.c.bf16 %v1832_v24, %v1830_v4  ;;  %v2111_v62 = vld [vmem:[#allocation9 + $0x380] sm:$0xff] }
 0x2c8   :  { %4349 = vmatprep.subr.bf16.mxu1 %v4348_v33  ;;  %v2086_v33 = vld [vmem:[#allocation9 + $0x2b8] sm:$0xff]  ;;  %v4366_v18 = vpack.c.bf16 %v2081_v37, %v2079_v34  ;;  %v4240_v2 = vpack.c.bf16 %v1816_v40, %v1814_v38  ;;  %v1829_v34 = vld [vmem:[#allocation9 + $0x720] sm:$0xff]  ;;  %v2101_v40 = vld [vmem:[#allocation9 + $0x330] sm:$0xff] }
 0x2c9   :  { %1922 = vmatmul.mubr.f32.vlgmr.msra.gmra.mrb[10].mxu0 %v1170_v59  ;;  %v4368_v44 = vpack.c.bf16 %v2086_v33, %v2084_v8  ;;  %v2085_v59 = vld [vmem:[#allocation9 + $0x2b0] sm:$0xff]  ;;  %v2099_v37 = vld [vmem:[#allocation9 + $0x320] sm:$0xff]  ;;  %v1834_v8 = vld [vmem:[#allocation9 + $0x748] sm:$0xff] }
 0x2ca   :  { %2192 = vmatmul.mubr.f32.vlgmr.msra.gmra.mrb[10].mxu1 %v1182_v47  ;;  %4223 = vmatpush1.bf16.msra.mxu0 %v4222_v16  ;;  %v1815_v16 = vld [vmem:[#allocation9 + $0x6b0] sm:$0xff]  ;;  %v1836_v33 = vld [vmem:[#allocation9 + $0x758] sm:$0xff]  ;;  %v1845_v20 = vld [vmem:[#allocation9 + $0x7a0] sm:$0xff] }
 0x2cb   :  { %1992 = vmatprep.mubr.f32.mxu0 %v1173_v51  ;;  %4351 = vmatpush1.bf16.msra.mxu1 %v4350_v46  ;;  %v1818_v46 = vld [vmem:[#allocation9 + $0x6c8] sm:$0xff]  ;;  %v4242_v47 = vpack.c.bf16 %v1815_v16, %v1813_v26  ;;  %v2087_v51 = vld [vmem:[#allocation9 + $0x2c0] sm:$0xff]  ;;  %v4386_v26 = vpack.c.bf16 %v2101_v40, %v2099_v37  ;;  %v4260_v16 = vpack.c.bf16 %v1836_v33, %v1834_v8  ;;  %v2117_v24 = vld [vmem:[#allocation9 + $0x3b0] sm:$0xff] }
 0x2cc   :  { %2262 = vmatprep.mubr.f32.mxu1 %v1185_v22  ;;  %4225 = vmatprep.subr.bf16.mxu0 %v4224_v50  ;;  %v4370_v50 = vpack.c.bf16 %v2085_v59, %v2083_v25  ;;  %v4244_v30 = vpack.c.bf16 %v1820_v21, %v1818_v46  ;;  %v1824_v22 = vld [vmem:[#allocation9 + $0x6f8] sm:$0xff]  ;;  %v4374_v56 = vpack.c.bf16 %v2089_v52, %v2087_v51  ;;  %v1833_v25 = vld [vmem:[#allocation9 + $0x740] sm:$0xff]  ;;  %v2105_v21 = vld [vmem:[#allocation9 + $0x350] sm:$0xff] }
 0x2cd   :  { %4353 = vmatprep.subr.bf16.mxu1 %v4352_v17  ;;  %v4372_v17 = vpack.c.bf16 %v2090_v55, %v2088_v39  ;;  %v4248_v43 = vpack.c.bf16 %v1824_v22, %v1822_v53  ;;  %v2103_v59 = vld [vmem:[#allocation9 + $0x340] sm:$0xff]  ;;  %v1838_v39 = vld [vmem:[#allocation9 + $0x768] sm:$0xff]  ;;  %v1840_v55 = vld [vmem:[#allocation9 + $0x778] sm:$0xff] }
 0x2ce   :  { %4227 = vmatpush1.bf16.msra.mxu0 %v4226_v54  ;;  %v2092_v54 = vld [vmem:[#allocation9 + $0x2e8] sm:$0xff]  ;;  %v1837_v51 = vld [vmem:[#allocation9 + $0x760] sm:$0xff]  ;;  %v2109_v22 = vld [vmem:[#allocation9 + $0x370] sm:$0xff] }
 0x2cf   :  { %4355 = vmatpush1.bf16.msra.mxu1 %v4354_v58  ;;  %4229 = vmatprep.subr.bf16.mxu0 %v4228_v35  ;;  %v2094_v58 = vld [vmem:[#allocation9 + $0x2f8] sm:$0xff]  ;;  %v4246_v35 = vpack.c.bf16 %v1819_v42, %v1817_v49  ;;  %v4390_v49 = vpack.c.bf16 %v2105_v21, %v2103_v59  ;;  %v4264_v42 = vpack.c.bf16 %v1840_v55, %v1838_v39  ;;  %v2107_v52 = vld [vmem:[#allocation9 + $0x360] sm:$0xff]  ;;  %v2121_v33 = vld [vmem:[#allocation9 + $0x3d0] sm:$0xff] }
 0x2d0   :  { %4357 = vmatprep.subr.bf16.mxu1 %v4356_v60  ;;  %v1823_v60 = vld [vmem:[#allocation9 + $0x6f0] sm:$0xff]  ;;  %v4376_v19 = vpack.c.bf16 %v2094_v58, %v2092_v54  ;;  %v1842_v54 = vld [vmem:[#allocation9 + $0x788] sm:$0xff]  ;;  %v1844_v58 = vld [vmem:[#allocation9 + $0x798] sm:$0xff] }
 0x2d1   :  { %v2115_v23 = vld [vmem:[#allocation9 + $0x3a0] sm:$0xff]  ;;  %v2125_v55 = vld [vmem:[#allocation9 + $0x3f0] sm:$0xff] }
 0x2d2   :  { %4231 = vmatpush1.bf16.msra.mxu0 %v4230_v6  ;;  %v2096_v6 = vld [vmem:[#allocation9 + $0x308] sm:$0xff]  ;;  %v1849_v37 = vld [vmem:[#allocation9 + $0x7c0] sm:$0xff] }
 0x2d3   :  { %4359 = vmatpush1.bf16.msra.mxu1 %v4358_v41  ;;  %4233 = vmatprep.subr.bf16.mxu0 %v4232_v9  ;;  %v2098_v41 = vld [vmem:[#allocation9 + $0x318] sm:$0xff]  ;;  %v4250_v9 = vpack.c.bf16 %v1823_v60, %v1821_v48  ;;  %v4394_v48 = vpack.c.bf16 %v2109_v22, %v2107_v52  ;;  %v4268_v60 = vpack.c.bf16 %v1844_v58, %v1842_v54  ;;  %v2119_v40 = vld [vmem:[#allocation9 + $0x3c0] sm:$0xff] }
 0x2d4   :  { %4361 = vmatprep.subr.bf16.mxu1 %v4360_v15  ;;  %v1827_v15 = vld [vmem:[#allocation9 + $0x710] sm:$0xff]  ;;  %v4380_v63 = vpack.c.bf16 %v2098_v41, %v2096_v6  ;;  %v1846_v6 = vld [vmem:[#allocation9 + $0x7a8] sm:$0xff]  ;;  %v1848_v41 = vld [vmem:[#allocation9 + $0x7b8] sm:$0xff] }
 0x2d5   :  { %v1853_v59 = vld [vmem:[#allocation9 + $0x7e0] sm:$0xff] }
 0x2d6   :  { %4235 = vmatpush1.bf16.msra.mxu0 %v4234_v5  ;;  %v2100_v5 = vld [vmem:[#allocation9 + $0x328] sm:$0xff]  ;;  %v2123_v39 = vld [vmem:[#allocation9 + $0x3e0] sm:$0xff] }
 0x2d7   :  { %4363 = vmatpush1.bf16.msra.mxu1 %v4362_v27  ;;  %4237 = vmatprep.subr.bf16.mxu0 %v4236_v28  ;;  %v2102_v27 = vld [vmem:[#allocation9 + $0x338] sm:$0xff]  ;;  %v4254_v28 = vpack.c.bf16 %v1827_v15, %v1825_v14  ;;  %v4398_v14 = vpack.c.bf16 %v2113_v3, %v2111_v62  ;;  %v4272_v15 = vpack.c.bf16 %v1848_v41, %v1846_v6  ;;  %v2418_v62 = vld [vmem:[#allocation13 + $0x300] sm:$0xff] }
 0x2d8   :  { %4365 = vmatprep.subr.bf16.mxu1 %v4364_v36  ;;  %v1831_v36 = vld [vmem:[#allocation9 + $0x730] sm:$0xff]  ;;  %v4384_v38 = vpack.c.bf16 %v2102_v27, %v2100_v5  ;;  %v1850_v5 = vld [vmem:[#allocation9 + $0x7c8] sm:$0xff]  ;;  %v1852_v27 = vld [vmem:[#allocation9 + $0x7d8] sm:$0xff] }
 0x2d9   :  { %v2521_v41 = vld [vmem:[#allocation13 + $0x200] sm:$0xff] }
 0x2da   :  { %4239 = vmatpush1.bf16.msra.mxu0 %v4238_v12  ;;  %v2104_v12 = vld [vmem:[#allocation9 + $0x348] sm:$0xff] }
 0x2db   :  { %4367 = vmatpush1.bf16.msra.mxu1 %v4366_v18  ;;  %4241 = vmatprep.subr.bf16.mxu0 %v4240_v2  ;;  %v2106_v18 = vld [vmem:[#allocation9 + $0x358] sm:$0xff]  ;;  %v4258_v2 = vpack.c.bf16 %v1831_v36, %v1829_v34  ;;  %v4402_v34 = vpack.c.bf16 %v2117_v24, %v2115_v23  ;;  %v4276_v36 = vpack.c.bf16 %v1852_v27, %v1850_v5 }
 0x2dc   :  { %4369 = vmatprep.subr.bf16.mxu1 %v4368_v44  ;;  %v1835_v44 = vld [vmem:[#allocation9 + $0x750] sm:$0xff]  ;;  %v4388_v46 = vpack.c.bf16 %v2106_v18, %v2104_v12  ;;  %v1854_v12 = vld [vmem:[#allocation9 + $0x7e8] sm:$0xff]  ;;  %v1856_v18 = vld [vmem:[#allocation9 + $0x7f8] sm:$0xff] }
 0x2dd   :  { %v2420_v23 = vld [vmem:[#allocation13 + $0x310] sm:$0xff] }
 0x2de   :  { %4243 = vmatpush1.bf16.msra.mxu0 %v4242_v47  ;;  %v2108_v47 = vld [vmem:[#allocation9 + $0x368] sm:$0xff]  ;;  %v2523_v27 = vld [vmem:[#allocation13 + $0x210] sm:$0xff] }
 0x2df   :  { %4371 = vmatpush1.bf16.msra.mxu1 %v4370_v50  ;;  %4245 = vmatprep.subr.bf16.mxu0 %v4244_v30  ;;  %v2110_v50 = vld [vmem:[#allocation9 + $0x378] sm:$0xff]  ;;  %v4262_v30 = vpack.c.bf16 %v1835_v44, %v1833_v25  ;;  %v4406_v25 = vpack.c.bf16 %v2121_v33, %v2119_v40  ;;  %v4280_v44 = vpack.c.bf16 %v1856_v18, %v1854_v12  ;;  %v2422_v40 = vld [vmem:[#allocation13 + $0x320] sm:$0xff] }
 0x2e0   :  { %4373 = vmatprep.subr.bf16.mxu1 %v4372_v17  ;;  %v1839_v17 = vld [vmem:[#allocation9 + $0x770] sm:$0xff]  ;;  %v4392_v53 = vpack.c.bf16 %v2110_v50, %v2108_v47  ;;  %v4410_v50 = vpack.c.bf16 %v2125_v55, %v2123_v39  ;;  %v2525_v18 = vld [vmem:[#allocation13 + $0x220] sm:$0xff]  ;;  %v2425_v39 = vld [vmem:[#allocation13 + $0x338] sm:$0xff] }
 0x2e2   :  { %4247 = vmatpush1.bf16.msra.mxu0 %v4246_v35  ;;  %v2112_v35 = vld [vmem:[#allocation9 + $0x388] sm:$0xff] }
 0x2e3   :  { %4375 = vmatpush1.bf16.msra.mxu1 %v4374_v56  ;;  %4249 = vmatprep.subr.bf16.mxu0 %v4248_v43  ;;  %v2114_v56 = vld [vmem:[#allocation9 + $0x398] sm:$0xff]  ;;  %v4266_v43 = vpack.c.bf16 %v1839_v17, %v1837_v51 }
 0x2e4   :  { %4377 = vmatprep.subr.bf16.mxu1 %v4376_v19  ;;  %v1843_v19 = vld [vmem:[#allocation9 + $0x790] sm:$0xff]  ;;  %v4396_v1 = vpack.c.bf16 %v2114_v56, %v2112_v35 }
 0x2e6   :  { %4251 = vmatpush1.bf16.msra.mxu0 %v4250_v9  ;;  %v2116_v9 = vld [vmem:[#allocation9 + $0x3a8] sm:$0xff] }
 0x2e7   :  { %4379 = vmatpush1.bf16.msra.mxu1 %v4378_v11  ;;  %4253 = vmatprep.subr.bf16.mxu0 %v4252_v13  ;;  %v2118_v11 = vld [vmem:[#allocation9 + $0x3b8] sm:$0xff]  ;;  %v4270_v13 = vpack.c.bf16 %v1843_v19, %v1841_v61  ;;  %v2538_v19 = vld [vmem:[#allocation13 + $0x288] sm:$0xff] }
 0x2e8   :  { %4381 = vmatprep.subr.bf16.mxu1 %v4380_v63  ;;  %v1847_v63 = vld [vmem:[#allocation9 + $0x7b0] sm:$0xff]  ;;  %v4400_v4 = vpack.c.bf16 %v2118_v11, %v2116_v9 }
 0x2e9   :  { %v2522_v9 = vld [vmem:[#allocation13 + $0x208] sm:$0xff] }
 0x2ea   :  { %4255 = vmatpush1.bf16.msra.mxu0 %v4254_v28  ;;  %v2120_v28 = vld [vmem:[#allocation9 + $0x3c8] sm:$0xff]  ;;  %v4446_v11 = vpack.c.bf16 %v2522_v9, %v2521_v41 }
 0x2eb   :  { %4383 = vmatpush1.bf16.msra.mxu1 %v4382_v29  ;;  %4257 = vmatprep.subr.bf16.mxu0 %v4256_v32  ;;  %v2122_v29 = vld [vmem:[#allocation9 + $0x3d8] sm:$0xff]  ;;  %v4274_v32 = vpack.c.bf16 %v1847_v63, %v1845_v20 }
 0x2ec   :  { %4385 = vmatprep.subr.bf16.mxu1 %v4384_v38  ;;  %v1851_v38 = vld [vmem:[#allocation9 + $0x7d0] sm:$0xff]  ;;  %v4404_v8 = vpack.c.bf16 %v2122_v29, %v2120_v28  ;;  %v2540_v63 = vld [vmem:[#allocation13 + $0x298] sm:$0xff] }
 0x2ed   :  { %v2524_v28 = vld [vmem:[#allocation13 + $0x218] sm:$0xff] }
 0x2ee   :  { %4259 = vmatpush1.bf16.msra.mxu0 %v4258_v2  ;;  %v2124_v2 = vld [vmem:[#allocation9 + $0x3e8] sm:$0xff]  ;;  %v4450_v29 = vpack.c.bf16 %v2524_v28, %v2523_v27 }
 0x2ef   :  { %4387 = vmatpush1.bf16.msra.mxu1 %v4386_v26  ;;  %4261 = vmatprep.subr.bf16.mxu0 %v4260_v16  ;;  %v2126_v26 = vld [vmem:[#allocation9 + $0x3f8] sm:$0xff]  ;;  %v4278_v16 = vpack.c.bf16 %v1851_v38, %v1849_v37  ;;  %v2542_v38 = vld [vmem:[#allocation13 + $0x2a8] sm:$0xff]  ;;  %v2549_v27 = vld [vmem:[#allocation13 + $0x2e0] sm:$0xff] }
 0x2f0   :  { %4389 = vmatprep.subr.bf16.mxu1 %v4388_v46  ;;  %v1855_v46 = vld [vmem:[#allocation9 + $0x7f0] sm:$0xff]  ;;  %v4408_v21 = vpack.c.bf16 %v2126_v26, %v2124_v2 }
 0x2f1   :  { %v4282_v47 = vpack.c.bf16 %v1855_v46, %v1853_v59  ;;  %v2526_v2 = vld [vmem:[#allocation13 + $0x228] sm:$0xff]  ;;  %v2544_v46 = vld [vmem:[#allocation13 + $0x2b8] sm:$0xff] }
 0x2f2   :  { %4263 = vmatpush1.bf16.msra.mxu0 %v4262_v30  ;;  %v1172_v30 = vmax.f32 %v5431_v45, 0.0  ;;  %v4454_v26 = vpack.c.bf16 %v2526_v2, %v2525_v18  ;;  %v2552_v18 = vld [vmem:[#allocation13 + $0x2f8] sm:$0xff] }
 0x2f3   :  { %4391 = vmatpush1.bf16.msra.mxu1 %v4390_v49  ;;  %4265 = vmatprep.subr.bf16.mxu0 %v4264_v42  ;;  %v1184_v49 = vmax.f32 %v5435_v31, 0.0 }
 0x2f4   :  { %4393 = vmatprep.subr.bf16.mxu1 %v4392_v53 }
 0x2f6   :  { %4267 = vmatpush1.bf16.msra.mxu0 %v4266_v43  ;;  %v2434_v43 = vld [vmem:[#allocation13 + $0x380] sm:$0xff] }
 0x2f7   :  { %4395 = vmatpush1.bf16.msra.mxu1 %v4394_v48  ;;  %4269 = vmatprep.subr.bf16.mxu0 %v4268_v60  ;;  %v2435_v48 = vld [vmem:[#allocation13 + $0x388] sm:$0xff]  ;;  %v2537_v60 = vld [vmem:[#allocation13 + $0x280] sm:$0xff] }
 0x2f8   :  { %4397 = vmatprep.subr.bf16.mxu1 %v4396_v1  ;;  %v4412_v61 = vpack.c.bf16 %v2435_v48, %v2434_v43  ;;  %v2419_v1 = vld [vmem:[#allocation13 + $0x308] sm:$0xff]  ;;  %v4444_v3 = vpack.c.bf16 %v2538_v19, %v2537_v60  ;;  %v2426_v60 = vld [vmem:[#allocation13 + $0x340] sm:$0xff] }
 0x2f9   :  { %v4414_v6 = vpack.c.bf16 %v2419_v1, %v2418_v62  ;;  %v2529_v19 = vld [vmem:[#allocation13 + $0x240] sm:$0xff]  ;;  %v2530_v1 = vld [vmem:[#allocation13 + $0x248] sm:$0xff] }
 0x2fa   :  { %4271 = vmatpush1.bf16.msra.mxu0 %v4270_v13  ;;  %v2436_v13 = vld [vmem:[#allocation13 + $0x390] sm:$0xff]  ;;  %v4462_v41 = vpack.c.bf16 %v2530_v1, %v2529_v19 }
 0x2fb   :  { %4399 = vmatpush1.bf16.msra.mxu1 %v4398_v14  ;;  %4273 = vmatprep.subr.bf16.mxu0 %v4272_v15  ;;  %v2437_v14 = vld [vmem:[#allocation13 + $0x398] sm:$0xff]  ;;  %v2539_v15 = vld [vmem:[#allocation13 + $0x290] sm:$0xff] }
 0x2fc   :  { %4401 = vmatprep.subr.bf16.mxu1 %v4400_v4  ;;  %v4416_v20 = vpack.c.bf16 %v2437_v14, %v2436_v13  ;;  %v2421_v4 = vld [vmem:[#allocation13 + $0x318] sm:$0xff]  ;;  %v4448_v24 = vpack.c.bf16 %v2540_v63, %v2539_v15  ;;  %v2428_v14 = vld [vmem:[#allocation13 + $0x350] sm:$0xff] }
 0x2fd   :  { %v4418_v5 = vpack.c.bf16 %v2421_v4, %v2420_v23  ;;  %v2548_v13 = vld [vmem:[#allocation13 + $0x2d8] sm:$0xff]  ;;  %v2531_v63 = vld [vmem:[#allocation13 + $0x250] sm:$0xff] }
 0x2fe   :  { %4275 = vmatpush1.bf16.msra.mxu0 %v4274_v32  ;;  %v2438_v32 = vld [vmem:[#allocation13 + $0x3a0] sm:$0xff]  ;;  %v2532_v23 = vld [vmem:[#allocation13 + $0x258] sm:$0xff] }
 0x2ff   :  { %4403 = vmatpush1.bf16.msra.mxu1 %v4402_v34  ;;  %4277 = vmatprep.subr.bf16.mxu0 %v4276_v36  ;;  %v2439_v34 = vld [vmem:[#allocation13 + $0x3a8] sm:$0xff]  ;;  %v2541_v36 = vld [vmem:[#allocation13 + $0x2a0] sm:$0xff]  ;;  %v4466_v28 = vpack.c.bf16 %v2532_v23, %v2531_v63 }
 0x300   :  { %4405 = vmatprep.subr.bf16.mxu1 %v4404_v8  ;;  %v4420_v37 = vpack.c.bf16 %v2439_v34, %v2438_v32  ;;  %v2423_v8 = vld [vmem:[#allocation13 + $0x328] sm:$0xff]  ;;  %v4452_v33 = vpack.c.bf16 %v2542_v38, %v2541_v36  ;;  %v2430_v34 = vld [vmem:[#allocation13 + $0x360] sm:$0xff] }
 0x301   :  { %v4422_v12 = vpack.c.bf16 %v2423_v8, %v2422_v40  ;;  %v2550_v32 = vld [vmem:[#allocation13 + $0x2e8] sm:$0xff]  ;;  %v2533_v38 = vld [vmem:[#allocation13 + $0x260] sm:$0xff]  ;;  %v2448_v8 = vld [vmem:[#allocation13 + $0x3f0] sm:$0xff] }
 0x302   :  { %4279 = vmatpush1.bf16.msra.mxu0 %v4278_v16  ;;  %v2440_v16 = vld [vmem:[#allocation13 + $0x3b0] sm:$0xff]  ;;  %v2431_v36 = vld [vmem:[#allocation13 + $0x368] sm:$0xff] }
 0x303   :  { %4407 = vmatpush1.bf16.msra.mxu1 %v4406_v25  ;;  %4281 = vmatprep.subr.bf16.mxu0 %v4280_v44  ;;  %v2441_v25 = vld [vmem:[#allocation13 + $0x3b8] sm:$0xff]  ;;  %v2543_v44 = vld [vmem:[#allocation13 + $0x2b0] sm:$0xff]  ;;  %v2534_v40 = vld [vmem:[#allocation13 + $0x268] sm:$0xff]  ;;  %v4438_v2 = vpack.c.bf16 %v2431_v36, %v2430_v34 }
 0x304   :  { %4409 = vmatprep.subr.bf16.mxu1 %v4408_v21  ;;  %v4424_v59 = vpack.c.bf16 %v2441_v25, %v2440_v16  ;;  %v2424_v21 = vld [vmem:[#allocation13 + $0x330] sm:$0xff]  ;;  %v4456_v55 = vpack.c.bf16 %v2544_v46, %v2543_v44  ;;  %v2433_v44 = vld [vmem:[#allocation13 + $0x378] sm:$0xff] }
 0x305   :  { %v2432_v25 = vld [vmem:[#allocation13 + $0x370] sm:$0xff] }
 0x306   :  { %4283 = vmatpush1.bf16.msra.mxu0 %v4282_v47  ;;  %v4426_v47 = vpack.c.bf16 %v2425_v39, %v2424_v21  ;;  %v2536_v21 = vld [vmem:[#allocation13 + $0x278] sm:$0xff]  ;;  %v2640_v39 = vld [vmem:[#allocation13 + $0x180] sm:$0xff] }
 0x307   :  { %4411 = vmatpush1.bf16.msra.mxu1 %v4410_v50  ;;  %4413 = vmatprep.subr.bf16.mxu0 %v4412_v61  ;;  %v2527_v50 = vld [vmem:[#allocation13 + $0x230] sm:$0xff]  ;;  %v2427_v61 = vld [vmem:[#allocation13 + $0x348] sm:$0xff] }
 0x308   :  { %4445 = vmatprep.subr.bf16.mxu1 %v4444_v3  ;;  %v4430_v62 = vpack.c.bf16 %v2427_v61, %v2426_v60  ;;  %v2444_v3 = vld [vmem:[#allocation13 + $0x3d0] sm:$0xff] }
 0x309   :  { %1993 = vmatmul.mubr.f32.vlgmr.msra.gmra.mrb[10].mxu0 %v1172_v30  ;;  %v2528_v30 = vld [vmem:[#allocation13 + $0x238] sm:$0xff] }
 0x30a   :  { %2263 = vmatmul.mubr.f32.vlgmr.msra.gmra.mrb[10].mxu1 %v1184_v49  ;;  %4415 = vmatpush3.bf16.msra.mxu0 %v4414_v6  ;;  %v2442_v49 = vld [vmem:[#allocation13 + $0x3c0] sm:$0xff]  ;;  %v2445_v6 = vld [vmem:[#allocation13 + $0x3d8] sm:$0xff] }
 0x30b   :  { %4447 = vmatpush3.bf16.msra.mxu1 %v4446_v11  ;;  %4417 = vmatprep.subr.bf16.mxu0 %v4416_v20  ;;  %v4432_v9 = vpack.c.bf16 %v2445_v6, %v2444_v3  ;;  %v2547_v11 = vld [vmem:[#allocation13 + $0x2d0] sm:$0xff]  ;;  %v2429_v20 = vld [vmem:[#allocation13 + $0x358] sm:$0xff] }
 0x30c   :  { %4449 = vmatprep.subr.bf16.mxu1 %v4448_v24  ;;  %v4464_v15 = vpack.c.bf16 %v2548_v13, %v2547_v11  ;;  %v4434_v4 = vpack.c.bf16 %v2429_v20, %v2428_v14  ;;  %v2446_v24 = vld [vmem:[#allocation13 + $0x3e0] sm:$0xff] }
 0x30e   :  { %4419 = vmatpush3.bf16.msra.mxu0 %v4418_v5  ;;  %v2447_v5 = vld [vmem:[#allocation13 + $0x3e8] sm:$0xff] }
 0x30f   :  { %4451 = vmatpush3.bf16.msra.mxu1 %v4450_v29  ;;  %4421 = vmatprep.subr.bf16.mxu0 %v4420_v37  ;;  %v4436_v29 = vpack.c.bf16 %v2447_v5, %v2446_v24  ;;  %v4468_v37 = vpack.c.bf16 %v2550_v32, %v2549_v27 }
 0x310   :  { %4453 = vmatprep.subr.bf16.mxu1 %v4452_v33  ;;  %v2449_v33 = vld [vmem:[#allocation13 + $0x3f8] sm:$0xff] }
 0x311   :  { %v4440_v16 = vpack.c.bf16 %v2449_v33, %v2448_v8 }
 0x312   :  { %4423 = vmatpush3.bf16.msra.mxu0 %v4422_v12  ;;  %v2551_v12 = vld [vmem:[#allocation13 + $0x2f0] sm:$0xff] }
 0x313   :  { %4455 = vmatpush3.bf16.msra.mxu1 %v4454_v26  ;;  %4425 = vmatprep.subr.bf16.mxu0 %v4424_v59  ;;  %v4470_v26 = vpack.c.bf16 %v2534_v40, %v2533_v38  ;;  %v2535_v59 = vld [vmem:[#allocation13 + $0x270] sm:$0xff]  ;;  %v4472_v46 = vpack.c.bf16 %v2552_v18, %v2551_v12 }
 0x314   :  { %4457 = vmatprep.subr.bf16.mxu1 %v4456_v55  ;;  %v2641_v55 = vld [vmem:[#allocation13 + $0x188] sm:$0xff] }
 0x316   :  { %4427 = vmatpush3.bf16.msra.mxu0 %v4426_v47  ;;  %v2742_v47 = vld [vmem:[#allocation13 + $0x80] sm:$0xff] }
 0x35c   :  { %v5447_v42 = vpop.f32.mrb[8].mxu0  ;;  %v5449_v51 = vpop.f32.mrb[8].mxu1 }
 0x35d   :  { %v2277_v17 = vmul.f32 %v5447_v42, %v5447_v42  ;;  %v5455_v52 = vadd.f32 %v5449_v51, %v5447_v42  ;;  %v2279_v53 = vmul.f32 %v5449_v51, %v5449_v51  ;;  %v5459_v22 = vpop.f32.mrb[9].mxu0  ;;  %v5461_v45 = vpop.f32.mrb[9].mxu1 }
 0x35e   :  { %v2278_v31 = vmul.f32 %v5459_v22, %v5459_v22  ;;  %v5467_v54 = vadd.f32 %v5461_v45, %v5459_v22  ;;  %v2280_v58 = vmul.f32 %v5461_v45, %v5461_v45 }
 0x35f   :  { %v5471_v35 = vadd.f32 %v2279_v53, %v2277_v17  ;;  %v4458_v17 = vpack.c.bf16 %v2528_v30, %v2527_v50  ;;  %v2443_v53 = vld [vmem:[#allocation13 + $0x3c8] sm:$0xff]  ;;  %v4442_v30 = vpack.c.bf16 %v2433_v44, %v2432_v25 }
 0x360   :  { %v5473_v56 = vadd.f32 %v2280_v58, %v2278_v31  ;;  %v2545_v31 = vld [vmem:[#allocation13 + $0x2c0] sm:$0xff]  ;;  %v2546_v58 = vld [vmem:[#allocation13 + $0x2c8] sm:$0xff]  ;;  %v4428_v43 = vpack.c.bf16 %v2443_v53, %v2442_v49  ;;  %v4474_v49 = vpack.c.bf16 %v2536_v21, %v2535_v59 }
 0x361   :  { %v4460_v48 = vpack.c.bf16 %v2546_v58, %v2545_v31  ;;  %4459 = vmatpush3.bf16.msra.mxu1 %v4458_v17  ;;  %v2743_v50 = vld [vmem:[#allocation13 + $0x88] sm:$0xff]  ;;  %v4476_v17 = vpack.c.bf16 %v2641_v55, %v2640_v39 }
 0x362   :  { %4429 = vmatprep.subr.bf16.mxu0 %v4428_v43  ;;  %v4508_v53 = vpack.c.bf16 %v2743_v50, %v2742_v47 }
 0x363   :  { %4461 = vmatprep.subr.bf16.mxu1 %v4460_v48  ;;  %4431 = vmatpush3.bf16.msra.mxu0 %v4430_v62 }
 0x364   :  { %4433 = vmatprep.subr.bf16.mxu0 %v4432_v9 }
 0x365   :  { %4463 = vmatpush3.bf16.msra.mxu1 %v4462_v41 }
 0x366   :  { %4465 = vmatprep.subr.bf16.mxu1 %v4464_v15 }
 0x367   :  { %4435 = vmatpush3.bf16.msra.mxu0 %v4434_v4 }
 0x368   :  { %4437 = vmatprep.subr.bf16.mxu0 %v4436_v29 }
 0x369   :  { %4467 = vmatpush3.bf16.msra.mxu1 %v4466_v28 }
 0x36a   :  { %4469 = vmatprep.subr.bf16.mxu1 %v4468_v37 }
 0x36b   :  { %4439 = vmatpush3.bf16.msra.mxu0 %v4438_v2 }
 0x36c   :  { %4441 = vmatprep.subr.bf16.mxu0 %v4440_v16 }
 0x36d   :  { %4471 = vmatpush3.bf16.msra.mxu1 %v4470_v26 }
 0x36e   :  { %4473 = vmatprep.subr.bf16.mxu1 %v4472_v46 }
 0x36f   :  { %4443 = vmatpush3.bf16.msra.mxu0 %v4442_v30 }
 0x370   :  { %4477 = vmatprep.subr.bf16.mxu0 %v4476_v17 }
 0x371   :  { %4475 = vmatpush3.bf16.msra.mxu1 %v4474_v49 }
 0x372   :  { %4509 = vmatprep.subr.bf16.mxu1 %v4508_v53 }
 0x3dc   :  { %v5475_v31 = vpop.f32.mrb[10].mxu0 }
 0x3dd   :  { %v2273_v58 = vadd.f32 %v5455_v52, %v5475_v31  ;;  %v2283_v43 = vmul.f32 %v5475_v31, %v5475_v31  ;;  %v5481_v48 = vpop.f32.mrb[10].mxu1  ;;  %v5483_v60 = vpop.f32.mrb[11].mxu0 }
 0x3de   :  { %v2274_v61 = vadd.f32 %v5467_v54, %v5483_v60  ;;  %v2284_v19 = vmul.f32 %v5483_v60, %v5483_v60  ;;  %v2266_v62 = vpop.f32.mrb[11].mxu1  ;;  %v2287_v52 = vmul.f32 %v5481_v48, %v5481_v48 }
 0x3df   :  { %v2285_v1 = vadd.f32 %v2283_v43, %v5471_v35  ;;  %v2275_v3 = vadd.f32 %v2273_v58, %v5481_v48  ;;  %v2288_v9 = vmul.f32 %v2266_v62, %v2266_v62 }
 0x3e0   :  { %v2286_v6 = vadd.f32 %v2284_v19, %v5473_v56  ;;  %v2276_v41 = vadd.f32 %v2274_v61, %v2266_v62  ;;  %v2269_v61 = vld [vmem:[#allocation10] sm:$0x3] }
 0x3e1   :  { %v2289_v11 = vadd.f32 %v2287_v52, %v2285_v1  ;;  %v2291_v13 = vsel %vm951_vm1, %v2275_v3, 0.0 }
 0x3e2   :  { %v2292_v14 = vrot.slane %v2291_v13, 4  ;;  %v2290_v54 = vadd.f32 %v2288_v9, %v2286_v6  ;;  %v2298_v15 = vsel %vm951_vm1, %v2276_v41, 0.0 }
 0x3e3   :  { %v2307_v20 = vsel %vm951_vm1, %v2289_v11, 0.0  ;;  %v2299_v63 = vrot.slane %v2298_v15, 4 }
 0x3e4   :  { %v2293_v35 = vadd.f32 %v2292_v14, %v2291_v13  ;;  %v2308_v23 = vrot.slane %v2307_v20, 4  ;;  %v2314_v4 = vsel %vm951_vm1, %v2290_v54, 0.0 }
 0x3e5   :  { %v2300_v24 = vadd.f32 %v2299_v63, %v2298_v15  ;;  %v2315_v5 = vrot.slane %v2314_v4, 4 }
 0x3e6   :  { %v2294_v27 = vrot.slane %v2293_v35, 2  ;;  %v2309_v56 = vadd.f32 %v2308_v23, %v2307_v20 }
 0x3e7   :  { %v2301_v28 = vrot.slane %v2300_v24, 2  ;;  %v2316_v29 = vadd.f32 %v2315_v5, %v2314_v4  ;;  %v2270_v4 = vld [vmem:[#allocation12] sm:$0x3]  ;;  %v2625_v5 = vld [vmem:[#allocation13 + $0x108] sm:$0xff] }
 0x3e8   :  { %v2295_v32 = vadd.f32 %v2294_v27, %v2293_v35  ;;  %v2310_v34 = vrot.slane %v2309_v56, 2  ;;  %v2727_v27 = vld [vmem:[#allocation13 + $0x8] sm:$0xff] }
 0x3e9   :  { %v2302_v36 = vadd.f32 %v2301_v28, %v2300_v24  ;;  %v2317_v37 = vrot.slane %v2316_v29, 2  ;;  %v2624_v24 = vld [vmem:[#allocation13 + $0x100] sm:$0xff] }
 0x3ea   :  { %v2296_v38 = vrot.slane %v2295_v32, 1  ;;  %v2311_v40 = vadd.f32 %v2310_v34, %v2309_v56 }
 0x3eb   :  { %v2303_v8 = vrot.slane %v2302_v36, 1  ;;  %v2318_v33 = vadd.f32 %v2317_v37, %v2316_v29  ;;  %v2643_v37 = vld [vmem:[#allocation13 + $0x198] sm:$0xff] }
 0x3ec   :  { %v2297_v12 = vadd.f32 %v2296_v38, %v2295_v32  ;;  %v2312_v18 = vrot.slane %v2311_v40, 1  ;;  %v2642_v32 = vld [vmem:[#allocation13 + $0x190] sm:$0xff]  ;;  %v2745_v38 = vld [vmem:[#allocation13 + $0x98] sm:$0xff] }
 0x3ed   :  { %v2304_v2 = vadd.f32 %v2303_v8, %v2302_v36  ;;  %v2319_v26 = vrot.slane %v2318_v33, 1 }
 0x3ee   :  { %v2305_v16 = vmul.f32 0.125, %v2297_v12  ;;  %v2313_v25 = vadd.f32 %v2312_v18, %v2311_v40 }
 0x3ef   :  { %v2306_v44 = vmul.f32 0.125, %v2304_v2  ;;  %v2320_v59 = vadd.f32 %v2319_v26, %v2318_v33  ;;  %v2626_v2 = vld [vmem:[#allocation13 + $0x110] sm:$0xff]  ;;  %v2627_v26 = vld [vmem:[#allocation13 + $0x118] sm:$0xff] }
 0x3f0   :  { %v2321_v46 = vmul.f32 0.125, %v2313_v25  ;;  %v2323_v21 = vmul.f32 %v2305_v16, %v2305_v16  ;;  %v2729_v25 = vld [vmem:[#allocation13 + $0x18] sm:$0xff] }
 0x3f1   :  { %v2322_v39 = vmul.f32 0.125, %v2320_v59  ;;  %v2324_v55 = vmul.f32 %v2306_v44, %v2306_v44  ;;  %v4480_v59 = vpack.c.bf16 %v2643_v37, %v2642_v32  ;;  %v2634_v32 = vld [vmem:[#allocation13 + $0x150] sm:$0xff] }
 0x3f2   :  { %v2325_v47 = vsub.f32 %v2321_v46, %v2323_v21  ;;  %v2645_v21 = vld [vmem:[#allocation13 + $0x1a8] sm:$0xff] }
 0x3f3   :  { %v2326_v50 = vsub.f32 %v2322_v39, %v2324_v55  ;;  %v2746_v39 = vld [vmem:[#allocation13 + $0xa0] sm:$0xff]  ;;  %v2747_v55 = vld [vmem:[#allocation13 + $0xa8] sm:$0xff] }
 0x3f4   :  { %v2327_v30 = vadd.f32 1e-05, %v2325_v47 }
 0x3f5   :  { %v2328_v49 = vadd.f32 1e-05, %v2326_v50 }
 0x3f6   :  { %4676 = vrsqrt.f32 %v2327_v30  ;;  %v4482_v30 = vpack.c.bf16 %v2627_v26, %v2626_v2 }
 0x3f7   :  { %4678 = vrsqrt.f32 %v2328_v49 }
 0x400   :  { %v4677_v17 = vpop.eup %4676 }
 0x401   :  { %v4679_v53 = vpop.eup %4678 }
 0x402   :  { %v2333_v58 = vcombine.low %v4677_v17, %v4679_v53  ;;  %v2628_v17 = vld [vmem:[#allocation13 + $0x120] sm:$0xff]  ;;  %v2629_v53 = vld [vmem:[#allocation13 + $0x128] sm:$0xff] }
 0x404   :  { %v2340_v43 = vrot.slane %v2333_v58, %v5364_v57 }
 0x406   :  { %v2347_v19 = vrot.slane %v2340_v43, %v5364_v57  ;;  %v4516_v43 = vpack.c.bf16 %v2747_v55, %v2746_v39  ;;  %v2654_v39 = vld [vmem:[#allocation13 + $0x1f0] sm:$0xff]  ;;  %v2655_v55 = vld [vmem:[#allocation13 + $0x1f8] sm:$0xff] }
 0x408   :  { %v2349_v1 = vmul.f32 %v2347_v19, %v2269_v61  ;;  %v2730_v61 = vld [vmem:[#allocation13 + $0x20] sm:$0xff]  ;;  %v2731_v19 = vld [vmem:[#allocation13 + $0x28] sm:$0xff] }
 0x40a   :  { %v2354_v3 = vrot.slane %v2349_v1, %v5368_v7  ;;  %v2358_v52 = vrot.slane %v2349_v1, %v5371_v10  ;;  %v2646_v1 = vld [vmem:[#allocation13 + $0x1b0] sm:$0xff] }
 0x40c   :  { %v2361_v6 = vmul.f32 %v2354_v3, %v2305_v16  ;;  %v2362_v41 = vmul.f32 %v2358_v52, %v2306_v44  ;;  %v2412_v9 = vmul.f32 %v2358_v52, %v2266_v62  ;;  %v2383_v11 = vmul.f32 %v2358_v52, %v5459_v22  ;;  %v2728_v16 = vld [vmem:[#allocation13 + $0x10] sm:$0xff]  ;;  %v2644_v44 = vld [vmem:[#allocation13 + $0x1a0] sm:$0xff] }
 0x40d   :  { %v2400_v13 = vmul.f32 %v2358_v52, %v5461_v45  ;;  %v2382_v14 = vmul.f32 %v2354_v3, %v5447_v42  ;;  %v2399_v54 = vmul.f32 %v2354_v3, %v5449_v51  ;;  %v2406_v15 = vmul.f32 %v2358_v52, %v5483_v60  ;;  %v2726_v45 = vld [vmem:[#allocation13] sm:$0xff]  ;;  %v2748_v52 = vld [vmem:[#allocation13 + $0xb0] sm:$0xff] }
 0x40e   :  { %v2365_v20 = vcombine.low %v2361_v6, %v2362_v41  ;;  %v2405_v63 = vmul.f32 %v2354_v3, %v5475_v31  ;;  %v2411_v35 = vmul.f32 %v2354_v3, %v5481_v48  ;;  %v4478_v60 = vpack.c.bf16 %v2625_v5, %v2624_v24  ;;  %v2647_v3 = vld [vmem:[#allocation13 + $0x1b8] sm:$0xff]  ;;  %v2633_v5 = vld [vmem:[#allocation13 + $0x148] sm:$0xff] }
 0x40f   :  { %v4510_v56 = vpack.c.bf16 %v2727_v27, %v2726_v45  ;;  %v4514_v49 = vpack.c.bf16 %v2729_v25, %v2728_v16  ;;  %v4484_v58 = vpack.c.bf16 %v2645_v21, %v2644_v44  ;;  %v2749_v6 = vld [vmem:[#allocation13 + $0xb8] sm:$0xff]  ;;  %v4486_v41 = vpack.c.bf16 %v2629_v53, %v2628_v17  ;;  %v2636_v16 = vld [vmem:[#allocation13 + $0x160] sm:$0xff]  ;;  %v2637_v25 = vld [vmem:[#allocation13 + $0x168] sm:$0xff] }
 0x410   :  { %v2372_v23 = vrot.slane %v2365_v20, %v5364_v57  ;;  %v2733_v20 = vld [vmem:[#allocation13 + $0x38] sm:$0xff]  ;;  %v2739_v21 = vld [vmem:[#allocation13 + $0x68] sm:$0xff]  ;;  %v2638_v17 = vld [vmem:[#allocation13 + $0x170] sm:$0xff]  ;;  %v4504_v53 = vpack.c.bf16 %v2655_v55, %v2654_v39 }
 0x411   :  { %v3403_v39 = vld [vmem:[%s5791_s10 + $0x178] sm:$0xff] }
 0x412   :  { %v2379_v62 = vrot.slane %v2372_v23, %v5364_v57  ;;  %v2744_v57 = vld [vmem:[#allocation13 + $0x90] sm:$0xff]  ;;  %v2750_v23 = vld [vmem:[#allocation13 + $0xc0] sm:$0xff] }
 0x413   :  { %v4512_v46 = vpack.c.bf16 %v2745_v38, %v2744_v57  ;;  %v2736_v57 = vld [vmem:[#allocation13 + $0x50] sm:$0xff]  ;;  %v2737_v38 = vld [vmem:[#allocation13 + $0x58] sm:$0xff] }
 0x414   :  { %v2381_v22 = vsub.f32 %v2270_v4, %v2379_v62  ;;  %v2751_v4 = vld [vmem:[#allocation13 + $0xc8] sm:$0xff]  ;;  %v4530_v26 = vpack.c.bf16 %v2737_v38, %v2736_v57 }
 0x415   :  { %v4524_v27 = vpack.c.bf16 %v2751_v4, %v2750_v23  ;;  %v3376_v4 = vld [vmem:[%s5791_s10 + $0x1a0] sm:$0xff]  ;;  %v3383_v57 = vld [vmem:[%s5791_s10 + $0x1d8] sm:$0xff]  ;;  %v3398_v38 = vld [vmem:[%s5791_s10 + $0x150] sm:$0xff] }
 0x416   :  { %v2392_v42 = vrot.slane %v2381_v22, %v5371_v10  ;;  %v2388_v51 = vrot.slane %v2381_v22, %v5368_v7  ;;  %v2632_v22 = vld [vmem:[#allocation13 + $0x140] sm:$0xff] }
 0x418   :  { %v2396_v28 = vadd.f32 %v2392_v42, %v2383_v11  ;;  %v2402_v31 = vadd.f32 %v2400_v13, %v2392_v42  ;;  %v2395_v29 = vadd.f32 %v2388_v51, %v2382_v14  ;;  %v2401_v48 = vadd.f32 %v2399_v54, %v2388_v51  ;;  %v2630_v11 = vld [vmem:[#allocation13 + $0x130] sm:$0xff]  ;;  %v2631_v13 = vld [vmem:[#allocation13 + $0x138] sm:$0xff] }
 0x419   :  { %v2408_v34 = vadd.f32 %v2406_v15, %v2392_v42  ;;  %v2414_v36 = vadd.f32 %v2412_v9, %v2392_v42  ;;  %v5513_v40 = vadd.f32 %v2405_v63, %v2388_v51  ;;  %v5515_v8 = vadd.f32 %v2411_v35, %v2388_v51  ;;  %v2732_v15 = vld [vmem:[#allocation13 + $0x30] sm:$0xff]  ;;  %v2648_v63 = vld [vmem:[#allocation13 + $0x1c0] sm:$0xff]  ;;  %v2649_v35 = vld [vmem:[#allocation13 + $0x1c8] sm:$0xff] }
 0x41a   :  { %v2398_v33 = vmax.f32 %v2396_v28, 0.0  ;;  %v2404_v10 = vmax.f32 %v2402_v31, 0.0  ;;  %v2397_v12 = vmax.f32 %v2395_v29, 0.0  ;;  %v2403_v18 = vmax.f32 %v2401_v48, 0.0  ;;  %v2734_v42 = vld [vmem:[#allocation13 + $0x40] sm:$0xff]  ;;  %v2735_v51 = vld [vmem:[#allocation13 + $0x48] sm:$0xff] }
 0x41b   :  { %v2410_v47 = vmax.f32 %v2408_v34, 0.0  ;;  %v2416_v50 = vmax.f32 %v2414_v36, 0.0  ;;  %v4518_v9 = vpack.c.bf16 %v2731_v19, %v2730_v61  ;;  %v4488_v14 = vpack.c.bf16 %v2647_v3, %v2646_v1  ;;  %v2752_v28 = vld [vmem:[#allocation13 + $0xd0] sm:$0xff]  ;;  %v2753_v31 = vld [vmem:[#allocation13 + $0xd8] sm:$0xff] }
 0x41c   :  { %2514 = vmatprep.mubr.f32.mxu0 %v2398_v33  ;;  %2617 = vmatprep.mubr.f32.mxu1 %v2404_v10  ;;  %v4520_v54 = vpack.c.bf16 %v2749_v6, %v2748_v52  ;;  %v4490_v62 = vpack.c.bf16 %v2631_v13, %v2630_v11  ;;  %v4522_v24 = vpack.c.bf16 %v2733_v20, %v2732_v15  ;;  %v2635_v34 = vld [vmem:[#allocation13 + $0x158] sm:$0xff]  ;;  %v2652_v33 = vld [vmem:[#allocation13 + $0x1e0] sm:$0xff]  ;;  %v2653_v10 = vld [vmem:[#allocation13 + $0x1e8] sm:$0xff]  ;;  %v2409_v52 = vmax.f32 %v5513_v40, 0.0 }
 0x41d   :  { %2515 = vmatmul.mubr.f32.vlgmr.msra.gmra.mrb[12].mxu0 %v2397_v12  ;;  %2618 = vmatmul.mubr.f32.vlgmr.msra.gmra.mrb[12].mxu1 %v2403_v18  ;;  %v4492_v45 = vpack.c.bf16 %v2649_v35, %v2648_v63  ;;  %v4494_v29 = vpack.c.bf16 %v2633_v5, %v2632_v22  ;;  %v4526_v48 = vpack.c.bf16 %v2735_v51, %v2734_v42  ;;  %v2754_v12 = vld [vmem:[#allocation13 + $0xe0] sm:$0xff]  ;;  %v2755_v18 = vld [vmem:[#allocation13 + $0xe8] sm:$0xff]  ;;  %v2740_v61 = vld [vmem:[#allocation13 + $0x70] sm:$0xff]  ;;  %v2415_v6 = vmax.f32 %v5515_v8, 0.0 }
 0x41e   :  { %4479 = vmatpush3.bf16.msra.mxu0 %v4478_v60  ;;  %4511 = vmatpush3.bf16.msra.mxu1 %v4510_v56  ;;  %v2650_v60 = vld [vmem:[#allocation13 + $0x1d0] sm:$0xff]  ;;  %v2651_v56 = vld [vmem:[#allocation13 + $0x1d8] sm:$0xff]  ;;  %v4528_v37 = vpack.c.bf16 %v2753_v31, %v2752_v28  ;;  %v4498_v2 = vpack.c.bf16 %v2635_v34, %v2634_v32  ;;  %v4500_v44 = vpack.c.bf16 %v2653_v10, %v2652_v33  ;;  %v5014_v8 = vmov 0.0|0.0   ;;  %v3390_v20 = vld [vmem:[%s5791_s10 + $0x110] sm:$0xff] }
 0x41f   :  { %2720 = vmatprep.mubr.f32.mxu0 %v2410_v47  ;;  %2822 = vmatprep.mubr.f32.mxu1 %v2416_v50  ;;  %v4496_v36 = vpack.c.bf16 %v2651_v56, %v2650_v60  ;;  %v2756_v47 = vld [vmem:[#allocation13 + $0xf0] sm:$0xff]  ;;  %v2757_v50 = vld [vmem:[#allocation13 + $0xf8] sm:$0xff]  ;;  %v3394_v51 = vld [vmem:[%s5791_s10 + $0x130] sm:$0xff] }
 0x420   :  { %4481 = vmatprep.subr.bf16.mxu0 %v4480_v59  ;;  %4513 = vmatprep.subr.bf16.mxu1 %v4512_v46  ;;  %v4532_v59 = vpack.c.bf16 %v2755_v18, %v2754_v12  ;;  %v2738_v46 = vld [vmem:[#allocation13 + $0x60] sm:$0xff]  ;;  %v2741_v19 = vld [vmem:[#allocation13 + $0x78] sm:$0xff]  ;;  %v3375_v15 = vld [vmem:[%s5791_s10 + $0x198] sm:$0xff] }
 0x421   :  { %v4538_v3 = vpack.c.bf16 %v2741_v19, %v2740_v61  ;;  %v3388_v11 = vld [vmem:[%s5791_s10 + $0x100] sm:$0xff]  ;;  %v3389_v40 = vld [vmem:[%s5791_s10 + $0x108] sm:$0xff]  ;;  %v3391_v35 = vld [vmem:[%s5791_s10 + $0x118] sm:$0xff] }
 0x422   :  { %4483 = vmatpush3.bf16.msra.mxu0 %v4482_v30  ;;  %4515 = vmatpush3.bf16.msra.mxu1 %v4514_v49  ;;  %v4502_v30 = vpack.c.bf16 %v2637_v25, %v2636_v16  ;;  %v4534_v49 = vpack.c.bf16 %v2739_v21, %v2738_v46  ;;  %v4568_v23 = vpack.c.bf16 %v3391_v35, %v3390_v20  ;;  %v3393_v5 = vld [vmem:[%s5791_s10 + $0x128] sm:$0xff]  ;;  %v3379_v42 = vld [vmem:[%s5791_s10 + $0x1b8] sm:$0xff]  ;;  %v3380_v31 = vld [vmem:[%s5791_s10 + $0x1c0] sm:$0xff] }
 0x423   :  { %4485 = vmatprep.subr.bf16.mxu0 %v4484_v58  ;;  %4517 = vmatprep.subr.bf16.mxu1 %v4516_v43  ;;  %v4536_v58 = vpack.c.bf16 %v2757_v50, %v2756_v47  ;;  %v2639_v43 = vld [vmem:[#allocation13 + $0x178] sm:$0xff]  ;;  %v3395_v56 = vld [vmem:[%s5791_s10 + $0x138] sm:$0xff]  ;;  %v3402_v21 = vld [vmem:[%s5791_s10 + $0x170] sm:$0xff] }
 0x424   :  { %v4506_v1 = vpack.c.bf16 %v2639_v43, %v2638_v17  ;;  %v4574_v28 = vpack.c.bf16 %v3395_v56, %v3394_v51  ;;  %v3397_v34 = vld [vmem:[%s5791_s10 + $0x148] sm:$0xff]  ;;  %v3399_v10 = vld [vmem:[%s5791_s10 + $0x158] sm:$0xff]  ;;  %v3384_v18 = vld [vmem:[%s5791_s10 + $0x1e0] sm:$0xff]  ;;  %v4586_v47 = vpack.c.bf16 %v3403_v39, %v3402_v21 }
 0x425   :  { %v4580_v12 = vpack.c.bf16 %v3399_v10, %v3398_v38  ;;  %v3401_v25 = vld [vmem:[%s5791_s10 + $0x168] sm:$0xff] }
 0x426   :  { %4487 = vmatpush3.bf16.msra.mxu0 %v4486_v41  ;;  %4519 = vmatpush3.bf16.msra.mxu1 %v4518_v9  ;;  %v3372_v41 = vld [vmem:[%s5791_s10 + $0x180] sm:$0xff]  ;;  %v3373_v9 = vld [vmem:[%s5791_s10 + $0x188] sm:$0xff] }
 0x427   :  { %4489 = vmatprep.subr.bf16.mxu0 %v4488_v14  ;;  %4521 = vmatprep.subr.bf16.mxu1 %v4520_v54  ;;  %v4541_v13 = vpack.c.bf16 %v3373_v9, %v3372_v41  ;;  %v4565_v14 = vpack.c.bf16 %v3389_v40, %v3388_v11  ;;  %v3374_v54 = vld [vmem:[%s5791_s10 + $0x190] sm:$0xff] }
 0x428   :  { %v4544_v63 = vpack.c.bf16 %v3375_v15, %v3374_v54 }
 0x42a   :  { %4491 = vmatpush3.bf16.msra.mxu0 %v4490_v62  ;;  %4523 = vmatpush3.bf16.msra.mxu1 %v4522_v24  ;;  %v3377_v62 = vld [vmem:[%s5791_s10 + $0x1a8] sm:$0xff]  ;;  %v3392_v24 = vld [vmem:[%s5791_s10 + $0x120] sm:$0xff] }
 0x42b   :  { %4493 = vmatprep.subr.bf16.mxu0 %v4492_v45  ;;  %4525 = vmatprep.subr.bf16.mxu1 %v4524_v27  ;;  %v4547_v22 = vpack.c.bf16 %v3377_v62, %v3376_v4  ;;  %v4571_v45 = vpack.c.bf16 %v3393_v5, %v3392_v24  ;;  %v3378_v27 = vld [vmem:[%s5791_s10 + $0x1b0] sm:$0xff] }
 0x42c   :  { %v4550_v60 = vpack.c.bf16 %v3379_v42, %v3378_v27 }
 0x42e   :  { %4495 = vmatpush3.bf16.msra.mxu0 %v4494_v29  ;;  %4527 = vmatpush3.bf16.msra.mxu1 %v4526_v48  ;;  %v3381_v29 = vld [vmem:[%s5791_s10 + $0x1c8] sm:$0xff]  ;;  %v3396_v48 = vld [vmem:[%s5791_s10 + $0x140] sm:$0xff] }
 0x42f   :  { %4497 = vmatprep.subr.bf16.mxu0 %v4496_v36  ;;  %4529 = vmatprep.subr.bf16.mxu1 %v4528_v37  ;;  %v4553_v32 = vpack.c.bf16 %v3381_v29, %v3380_v31  ;;  %v4577_v36 = vpack.c.bf16 %v3397_v34, %v3396_v48  ;;  %v3382_v37 = vld [vmem:[%s5791_s10 + $0x1d0] sm:$0xff]  ;;  %v2828_v34 = vld [vmem:[#allocation15] sm:$0x1] }
 0x430   :  { %v4556_v33 = vpack.c.bf16 %v3383_v57, %v3382_v37  ;;  %v2829_v57 = vld [vmem:[#allocation16] sm:$0x1] }
 0x432   :  { %4499 = vmatpush3.bf16.msra.mxu0 %v4498_v2  ;;  %4531 = vmatpush3.bf16.msra.mxu1 %v4530_v26  ;;  %v3385_v2 = vld [vmem:[%s5791_s10 + $0x1e8] sm:$0xff]  ;;  %v3400_v26 = vld [vmem:[%s5791_s10 + $0x160] sm:$0xff] }
 0x433   :  { %4501 = vmatprep.subr.bf16.mxu0 %v4500_v44  ;;  %4533 = vmatprep.subr.bf16.mxu1 %v4532_v59  ;;  %v4559_v16 = vpack.c.bf16 %v3385_v2, %v3384_v18  ;;  %v3386_v44 = vld [vmem:[%s5791_s10 + $0x1f0] sm:$0xff]  ;;  %v3387_v59 = vld [vmem:[%s5791_s10 + $0x1f8] sm:$0xff]  ;;  %v4583_v46 = vpack.c.bf16 %v3401_v25, %v3400_v26  ;;  %v3404_v26 = vld [vmem:[%s5791_s10 + $0x80] sm:$0xff] }
 0x434   :  { %v4562_v55 = vpack.c.bf16 %v3387_v59, %v3386_v44  ;;  %v3405_v44 = vld [vmem:[%s5791_s10 + $0x88] sm:$0xff]  ;;  %v3148_v59 = vld [vmem:[%s5791_s10] sm:$0xff] }
 0x436   :  { %4503 = vmatpush3.bf16.msra.mxu0 %v4502_v30  ;;  %4535 = vmatpush3.bf16.msra.mxu1 %v4534_v49 }
 0x437   :  { %4505 = vmatprep.subr.bf16.mxu0 %v4504_v53  ;;  %4537 = vmatprep.subr.bf16.mxu1 %v4536_v58 }
 0x43a   :  { %4507 = vmatpush3.bf16.msra.mxu0 %v4506_v1  ;;  %4539 = vmatpush3.bf16.msra.mxu1 %v4538_v3 }
 0x43b   :  { %4540 = vmatprep.subr.bf16.mxu0 %v5014_v8  ;;  %4564 = vmatprep.subr.bf16.mxu1 %v5014_v8 }
 0x43d   :  { %2721 = vmatmul.mubr.f32.vlgmr.msra.gmra.mrb[14].mxu0 %v2409_v52  ;;  %2823 = vmatmul.mubr.f32.vlgmr.msra.gmra.mrb[14].mxu1 %v2415_v6 }
 0x43e   :  { %4542 = vmatpush3.bf16.msra.mxu0 %v4541_v13  ;;  %4566 = vmatpush3.bf16.msra.mxu1 %v4565_v14 }
 0x43f   :  { %4543 = vmatprep.subr.bf16.mxu0 %v5014_v8  ;;  %4567 = vmatprep.subr.bf16.mxu1 %v5014_v8 }
 0x440   :  { %3664 = vmatprep.mubr.msk.f32.mxu0 %vm5015_vm2, %v5012_v0  ;;  %3699 = vmatprep.mubr.msk.f32.mxu1 %vm5015_vm2, %v5012_v0 }
 0x442   :  { %4545 = vmatpush3.bf16.msra.mxu0 %v4544_v63  ;;  %4569 = vmatpush3.bf16.msra.mxu1 %v4568_v23 }
 0x443   :  { %4546 = vmatprep.subr.bf16.mxu0 %v5014_v8  ;;  %4570 = vmatprep.subr.bf16.mxu1 %v5014_v8 }
 0x446   :  { %4548 = vmatpush3.bf16.msra.mxu0 %v4547_v22  ;;  %4572 = vmatpush3.bf16.msra.mxu1 %v4571_v45 }
 0x447   :  { %4549 = vmatprep.subr.bf16.mxu0 %v5014_v8  ;;  %4573 = vmatprep.subr.bf16.mxu1 %v5014_v8 }
 0x44a   :  { %4551 = vmatpush3.bf16.msra.mxu0 %v4550_v60  ;;  %4575 = vmatpush3.bf16.msra.mxu1 %v4574_v28 }
 0x44b   :  { %4552 = vmatprep.subr.bf16.mxu0 %v5014_v8  ;;  %4576 = vmatprep.subr.bf16.mxu1 %v5014_v8 }
 0x44e   :  { %4554 = vmatpush3.bf16.msra.mxu0 %v4553_v32  ;;  %4578 = vmatpush3.bf16.msra.mxu1 %v4577_v36 }
 0x44f   :  { %4555 = vmatprep.subr.bf16.mxu0 %v5014_v8  ;;  %4579 = vmatprep.subr.bf16.mxu1 %v5014_v8 }
 0x452   :  { %4557 = vmatpush3.bf16.msra.mxu0 %v4556_v33  ;;  %4581 = vmatpush3.bf16.msra.mxu1 %v4580_v12 }
 0x453   :  { %4558 = vmatprep.subr.bf16.mxu0 %v5014_v8  ;;  %4582 = vmatprep.subr.bf16.mxu1 %v5014_v8 }
 0x456   :  { %4560 = vmatpush3.bf16.msra.mxu0 %v4559_v16  ;;  %4584 = vmatpush3.bf16.msra.mxu1 %v4583_v46  ;;  %v3149_v46 = vld [vmem:[%s5791_s10 + $0x8] sm:$0xff] }
 0x457   :  { %4561 = vmatprep.subr.bf16.mxu0 %v5014_v8  ;;  %4585 = vmatprep.subr.bf16.mxu1 %v5014_v8 }
 0x45a   :  { %4563 = vmatpush3.bf16.msra.mxu0 %v4562_v55  ;;  %4587 = vmatpush3.bf16.msra.mxu1 %v4586_v47 }
 0x45b   :  { %4588 = vmatprep.subr.bf16.mxu0 %v5014_v8  ;;  %4612 = vmatprep.subr.bf16.mxu1 %v5014_v8 }
 0x4f0   :  { %v3456_v50 = vpop.f32.mrb[12].mxu0  ;;  %v3491_v30 = vpop.f32.mrb[12].mxu1 }
 0x4f1   :  { %v3457_v49 = vpop.f32.mrb[13].mxu0  ;;  %v3492_v17 = vpop.f32.mrb[13].mxu1 }
 0x4f2   :  { %v3458_v53 = vadd.f32 %v3457_v49, %v3456_v50  ;;  %v3493_v58 = vadd.f32 %v3492_v17, %v3491_v30  ;;  %v4589_v50 = vpack.c.bf16 %v3405_v44, %v3404_v26  ;;  %v4613_v30 = vpack.c.bf16 %v3149_v46, %v3148_v59  ;;  %v3406_v49 = vld [vmem:[%s5791_s10 + $0x90] sm:$0xff] }
 0x4f4   :  { %v2833_v43 = vmul.f32 %v3458_v53, %v3458_v53  ;;  %v2830_v61 = vadd.f32 %v3493_v58, %v3458_v53  ;;  %v2834_v19 = vmul.f32 %v3493_v58, %v3493_v58 }
 0x4f6   :  { %v2835_v1 = vadd.f32 %v2834_v19, %v2833_v43  ;;  %v3150_v43 = vld [vmem:[%s5791_s10 + $0x10] sm:$0xff] }
 0x510   :  { %v3526_v3 = vpop.f32.mrb[14].mxu0  ;;  %v3561_v52 = vpop.f32.mrb[14].mxu1 }
 0x511   :  { %v3527_v6 = vpop.f32.mrb[15].mxu0  ;;  %v3562_v41 = vpop.f32.mrb[15].mxu1 }
 0x512   :  { %v3528_v9 = vadd.f32 %v3527_v6, %v3526_v3  ;;  %v3563_v11 = vadd.f32 %v3562_v41, %v3561_v52  ;;  %v3408_v3 = vld [vmem:[%s5791_s10 + $0xa0] sm:$0xff]  ;;  %v3409_v52 = vld [vmem:[%s5791_s10 + $0xa8] sm:$0xff] }
 0x513   :  { %v3152_v6 = vld [vmem:[%s5791_s10 + $0x20] sm:$0xff]  ;;  %v3153_v41 = vld [vmem:[%s5791_s10 + $0x28] sm:$0xff] }
 0x514   :  { %v2831_v13 = vadd.f32 %v3528_v9, %v2830_v61  ;;  %v2836_v40 = vmul.f32 %v3528_v9, %v3528_v9  ;;  %v2838_v15 = vmul.f32 %v3563_v11, %v3563_v11  ;;  %v3151_v61 = vld [vmem:[%s5791_s10 + $0x18] sm:$0xff] }
 0x516   :  { %v2837_v14 = vadd.f32 %v2836_v40, %v2835_v1  ;;  %v2832_v54 = vadd.f32 %v3563_v11, %v2831_v13  ;;  %v4616_v1 = vpack.c.bf16 %v3151_v61, %v3150_v43  ;;  %v3410_v13 = vld [vmem:[%s5791_s10 + $0xb0] sm:$0xff]  ;;  %v3411_v40 = vld [vmem:[%s5791_s10 + $0xb8] sm:$0xff] }
 0x518   :  { %v2839_v20 = vadd.f32 %v2838_v15, %v2837_v14  ;;  %v2840_v63 = vsel %vm951_vm1, %v2832_v54, 0.0  ;;  %v3155_v14 = vld [vmem:[%s5791_s10 + $0x38] sm:$0xff]  ;;  %v4598_v54 = vpack.c.bf16 %v3411_v40, %v3410_v13 }
 0x519   :  { %v2841_v35 = vrot.slane %v2840_v63, 4 }
 0x51a   :  { %v2848_v23 = vsel %vm951_vm1, %v2839_v20, 0.0  ;;  %v3412_v20 = vld [vmem:[%s5791_s10 + $0xc0] sm:$0xff] }
 0x51b   :  { %v2842_v4 = vadd.f32 %v2841_v35, %v2840_v63  ;;  %v2849_v62 = vrot.slane %v2848_v23, 4  ;;  %v3413_v63 = vld [vmem:[%s5791_s10 + $0xc8] sm:$0xff]  ;;  %v3156_v35 = vld [vmem:[%s5791_s10 + $0x40] sm:$0xff] }
 0x51d   :  { %v2843_v24 = vrot.slane %v2842_v4, 2  ;;  %v2850_v22 = vadd.f32 %v2849_v62, %v2848_v23  ;;  %v3157_v23 = vld [vmem:[%s5791_s10 + $0x48] sm:$0xff] }
 0x51e   :  { %v4625_v62 = vpack.c.bf16 %v3157_v23, %v3156_v35  ;;  %v3235_v23 = vld [vmem:[#allocation19] sm:$0x1] }
 0x51f   :  { %v2844_v5 = vadd.f32 %v2843_v24, %v2842_v4  ;;  %v2851_v45 = vrot.slane %v2850_v22, 2  ;;  %v4601_v4 = vpack.c.bf16 %v3413_v63, %v3412_v20  ;;  %v3414_v24 = vld [vmem:[%s5791_s10 + $0xd0] sm:$0xff] }
 0x520   :  { %v3234_v20 = vld [vmem:[#allocation18] sm:$0x1] }
 0x521   :  { %v2845_v27 = vrot.slane %v2844_v5, 1  ;;  %v2852_v42 = vadd.f32 %v2851_v45, %v2850_v22  ;;  %v3415_v22 = vld [vmem:[%s5791_s10 + $0xd8] sm:$0xff] }
 0x522   :  { %v3159_v45 = vld [vmem:[%s5791_s10 + $0x58] sm:$0xff] }
 0x523   :  { %v2846_v51 = vadd.f32 %v2845_v27, %v2844_v5  ;;  %v2853_v60 = vrot.slane %v2852_v42, 1  ;;  %v3158_v5 = vld [vmem:[%s5791_s10 + $0x50] sm:$0xff]  ;;  %v4604_v27 = vpack.c.bf16 %v3415_v22, %v3414_v24 }
 0x525   :  { %v2847_v56 = vmul.f32 0.125, %v2846_v51  ;;  %v2854_v28 = vadd.f32 %v2853_v60, %v2852_v42  ;;  %v4628_v42 = vpack.c.bf16 %v3159_v45, %v3158_v5  ;;  %v3416_v51 = vld [vmem:[%s5791_s10 + $0xe0] sm:$0xff]  ;;  %v3417_v60 = vld [vmem:[%s5791_s10 + $0xe8] sm:$0xff] }
 0x527   :  { %v2855_v31 = vmul.f32 0.125, %v2854_v28  ;;  %v2856_v29 = vmul.f32 %v2847_v56, %v2847_v56  ;;  %v3161_v28 = vld [vmem:[%s5791_s10 + $0x68] sm:$0xff] }
 0x529   :  { %v2857_v48 = vsub.f32 %v2855_v31, %v2856_v29  ;;  %v4607_v31 = vpack.c.bf16 %v3417_v60, %v3416_v51 }
 0x52b   :  { %v2858_v32 = vadd.f32 1e-05, %v2857_v48  ;;  %v3418_v48 = vld [vmem:[%s5791_s10 + $0xf0] sm:$0xff] }
 0x52d   :  { %4680 = vrsqrt.f32 %v2858_v32  ;;  %v3419_v32 = vld [vmem:[%s5791_s10 + $0xf8] sm:$0xff] }
 0x537   :  { %v4681_v36 = vpop.eup %4680 }
 0x538   :  { %v2860_v37 = vmul.f32 %v4681_v36, %v2828_v34  ;;  %v3162_v34 = vld [vmem:[%s5791_s10 + $0x70] sm:$0xff]  ;;  %v3163_v36 = vld [vmem:[%s5791_s10 + $0x78] sm:$0xff] }
 0x53a   :  { %v2861_v38 = vmul.f32 %v2860_v37, %v2847_v56  ;;  %v2867_v33 = vrot.slane %v2860_v37, %v5368_v7  ;;  %v3160_v56 = vld [vmem:[%s5791_s10 + $0x60] sm:$0xff]  ;;  %v4610_v37 = vpack.c.bf16 %v3419_v32, %v3418_v48 }
 0x53b   :  { %v4631_v29 = vpack.c.bf16 %v3161_v28, %v3160_v56 }
 0x53c   :  { %v2862_v10 = vsub.f32 %v2829_v57, %v2861_v38  ;;  %v2884_v12 = vmul.f32 %v3563_v11, %v2867_v33  ;;  %v2869_v18 = vmul.f32 %v3458_v53, %v2867_v33  ;;  %v2878_v2 = vmul.f32 %v3493_v58, %v2867_v33  ;;  %v3407_v58 = vld [vmem:[%s5791_s10 + $0x98] sm:$0xff] }
 0x53d   :  { %v2881_v16 = vmul.f32 %v3528_v9, %v2867_v33  ;;  %v4592_v19 = vpack.c.bf16 %v3407_v58, %v3406_v49  ;;  %v4595_v9 = vpack.c.bf16 %v3409_v52, %v3408_v3  ;;  %v4619_v11 = vpack.c.bf16 %v3153_v41, %v3152_v6 }
 0x53e   :  { %v2874_v25 = vrot.slane %v2862_v10, %v5368_v7  ;;  %v4634_v57 = vpack.c.bf16 %v3163_v36, %v3162_v34 }
 0x540   :  { %v5653_v21 = vadd.f32 %v2884_v12, %v2874_v25  ;;  %v2876_v39 = vadd.f32 %v2874_v25, %v2869_v18  ;;  %v2879_v55 = vadd.f32 %v2878_v2, %v2874_v25  ;;  %v5655_v47 = vadd.f32 %v2881_v16, %v2874_v25 }
 0x542   :  { %v2877_v17 = vmax.f32 %v2876_v39, 0.0  ;;  %v2880_v53 = vmax.f32 %v2879_v55, 0.0  ;;  %v2883_v38 = vmax.f32 %v5655_v47, 0.0  ;;  %v2886_v33 = vmax.f32 %v5653_v21, 0.0 }
 0x544   :  { %3665 = vmatmul.mubr.f32.vlgmr.msra.gmra.mrb[16].mxu0 %v2877_v17  ;;  %3700 = vmatmul.mubr.f32.vlgmr.msra.gmra.mrb[16].mxu1 %v2880_v53 }
 0x545   :  { %4590 = vmatpush3.bf16.msra.mxu0 %v4589_v50  ;;  %4614 = vmatpush3.bf16.msra.mxu1 %v4613_v30 }
 0x546   :  { %4591 = vmatprep.subr.bf16.mxu0 %v5014_v8  ;;  %4615 = vmatprep.subr.bf16.mxu1 %v5014_v8 }
 0x547   :  { %3734 = vmatprep.mubr.msk.f32.mxu0 %vm5015_vm2, %v5012_v0  ;;  %3769 = vmatprep.mubr.msk.f32.mxu1 %vm5015_vm2, %v5012_v0  ;;  %v3154_v0 = vld [vmem:[%s5791_s10 + $0x30] sm:$0xff] }
 0x548   :  { %v4622_v15 = vpack.c.bf16 %v3155_v14, %v3154_v0 }
 0x549   :  { %4593 = vmatpush3.bf16.msra.mxu0 %v4592_v19  ;;  %4617 = vmatpush3.bf16.msra.mxu1 %v4616_v1 }
 0x54a   :  { %4594 = vmatprep.subr.bf16.mxu0 %v5014_v8  ;;  %4618 = vmatprep.subr.bf16.mxu1 %v5014_v8 }
 0x54d   :  { %4596 = vmatpush3.bf16.msra.mxu0 %v4595_v9  ;;  %4620 = vmatpush3.bf16.msra.mxu1 %v4619_v11 }
 0x54e   :  { %4597 = vmatprep.subr.bf16.mxu0 %v5014_v8  ;;  %4621 = vmatprep.subr.bf16.mxu1 %v5014_v8 }
 0x551   :  { %4599 = vmatpush3.bf16.msra.mxu0 %v4598_v54  ;;  %4623 = vmatpush3.bf16.msra.mxu1 %v4622_v15 }
 0x552   :  { %4600 = vmatprep.subr.bf16.mxu0 %v5014_v8  ;;  %4624 = vmatprep.subr.bf16.mxu1 %v5014_v8 }
 0x555   :  { %4602 = vmatpush3.bf16.msra.mxu0 %v4601_v4  ;;  %4626 = vmatpush3.bf16.msra.mxu1 %v4625_v62 }
 0x556   :  { %4603 = vmatprep.subr.bf16.mxu0 %v5014_v8  ;;  %4627 = vmatprep.subr.bf16.mxu1 %v5014_v8 }
 0x559   :  { %4605 = vmatpush3.bf16.msra.mxu0 %v4604_v27  ;;  %4629 = vmatpush3.bf16.msra.mxu1 %v4628_v42 }
 0x55a   :  { %4606 = vmatprep.subr.bf16.mxu0 %v5014_v8  ;;  %4630 = vmatprep.subr.bf16.mxu1 %v5014_v8 }
 0x55d   :  { %4608 = vmatpush3.bf16.msra.mxu0 %v4607_v31  ;;  %4632 = vmatpush3.bf16.msra.mxu1 %v4631_v29  ;;  %v3422_v31 = vld [vmem:[#allocation21 + $0x1] ss:$0 sm:$0xff]  ;;  %v3420_v29 = vld [vmem:[#allocation21 + $0x3] ss:$0 sm:$0xff] }
 0x55e   :  { %4609 = vmatprep.subr.bf16.mxu0 %v5014_v8  ;;  %4633 = vmatprep.subr.bf16.mxu1 %v5014_v8 }
 0x561   :  { %4611 = vmatpush3.bf16.msra.mxu0 %v4610_v37  ;;  %4635 = vmatpush3.bf16.msra.mxu1 %v4634_v57  ;;  %v3423_v37 = vld [vmem:[#allocation21] ss:$0 sm:$0xff]  ;;  %v3421_v57 = vld [vmem:[#allocation21 + $0x2] ss:$0 sm:$0xff] }
 0x564   :  { %3735 = vmatmul.mubr.f32.vlgmr.msra.gmra.mrb[18].mxu0 %v2883_v38  ;;  %3770 = vmatmul.mubr.f32.vlgmr.msra.gmra.mrb[18].mxu1 %v2886_v33 }
 0x617   :  { %v2970_v10 = vpop.f32.mrb[16].mxu0  ;;  %v3057_v12 = vpop.f32.mrb[16].mxu1 }
 0x618   :  { %v3239_v18 = vmul.f32 %v2970_v10, %v2970_v10  ;;  %v3236_v2 = vadd.f32 %v3057_v12, %v2970_v10  ;;  %v3240_v26 = vmul.f32 %v3057_v12, %v3057_v12  ;;  %v3666_v16 = vpop.f32.mrb[17].mxu0  ;;  %v3701_v25 = vpop.f32.mrb[17].mxu1 }
 0x61a   :  { %v3241_v44 = vadd.f32 %v3240_v26, %v3239_v18 }
 0x637   :  { %v3144_v59 = vpop.f32.mrb[18].mxu0  ;;  %v3230_v46 = vpop.f32.mrb[18].mxu1 }
 0x638   :  { %v3237_v39 = vadd.f32 %v3236_v2, %v3144_v59  ;;  %v3242_v8 = vmul.f32 %v3144_v59, %v3144_v59  ;;  %v3736_v55 = vpop.f32.mrb[19].mxu0  ;;  %v3771_v50 = vpop.f32.mrb[19].mxu1  ;;  %v3244_v21 = vmul.f32 %v3230_v46, %v3230_v46 }
 0x63a   :  { %v3243_v47 = vadd.f32 %v3242_v8, %v3241_v44  ;;  %v3238_v30 = vadd.f32 %v3237_v39, %v3230_v46 }
 0x63c   :  { %v3245_v49 = vadd.f32 %v3244_v21, %v3243_v47  ;;  %v3247_v17 = vsel %vm3246_vm3, %v3238_v30, 0.0 }
 0x63d   :  { %v3248_v53 = vrot.slane %v3247_v17, 4 }
 0x63e   :  { %v3255_v58 = vsel %vm3246_vm3, %v3245_v49, 0.0 }
 0x63f   :  { %v3249_v43 = vadd.f32 %v3248_v53, %v3247_v17  ;;  %v3256_v61 = vrot.slane %v3255_v58, 4 }
 0x641   :  { %v3250_v19 = vrot.slane %v3249_v43, 2  ;;  %v3257_v1 = vadd.f32 %v3256_v61, %v3255_v58 }
 0x643   :  { %v3251_v3 = vadd.f32 %v3250_v19, %v3249_v43  ;;  %v3258_v52 = vrot.slane %v3257_v1, 2 }
 0x645   :  { %v3252_v6 = vrot.slane %v3251_v3, 1  ;;  %v3259_v41 = vadd.f32 %v3258_v52, %v3257_v1 }
 0x647   :  { %v3253_v9 = vadd.f32 %v3252_v6, %v3251_v3  ;;  %v3260_v11 = vrot.slane %v3259_v41, 1 }
 0x649   :  { %v3254_v13 = vmul.f32 0.125, %v3253_v9  ;;  %v3261_v40 = vadd.f32 %v3260_v11, %v3259_v41 }
 0x64b   :  { %v3262_v0 = vmul.f32 0.125, %v3261_v40  ;;  %v3263_v14 = vmul.f32 %v3254_v13, %v3254_v13 }
 0x64d   :  { %v3264_v54 = vsub.f32 %v3262_v0, %v3263_v14 }
 0x64f   :  { %v3265_v15 = vadd.f32 1e-05, %v3264_v54 }
 0x651   :  { %4682 = vrsqrt.f32 %v3265_v15 }
 0x65b   :  { %v4683_v63 = vpop.eup %4682 }
 0x65c   :  { %v3267_v35 = vmul.f32 %v4683_v63, %v3234_v20 }
 0x65e   :  { %v3268_v4 = vmul.f32 %v3267_v35, %v3254_v13  ;;  %v3274_v62 = vrot.slane %v3267_v35, %v5368_v7 }
 0x660   :  { %v3291_v24 = vmul.f32 %v3274_v62, %v3230_v46  ;;  %v3269_v22 = vsub.f32 %v3235_v23, %v3268_v4  ;;  %v3288_v5 = vmul.f32 %v3274_v62, %v3144_v59  ;;  %v3276_v45 = vmul.f32 %v3274_v62, %v2970_v10 }
 0x661   :  { %v3285_v27 = vmul.f32 %v3274_v62, %v3057_v12 }
 0x662   :  { %v3281_v42 = vrot.slane %v3269_v22, %v5368_v7 }
 0x664   :  { %v3289_v51 = vadd.f32 %v3288_v5, %v3281_v42  ;;  %v3283_v60 = vadd.f32 %v3281_v42, %v3276_v45  ;;  %v3292_v56 = vadd.f32 %v3291_v24, %v3281_v42  ;;  %v3286_v28 = vadd.f32 %v3285_v27, %v3281_v42 }
 0x666   :  { %v3290_v48 = vmax.f32 %v3289_v51, 0.0  ;;  %v3284_v32 = vmax.f32 %v3283_v60, 0.0  ;;  %v3293_v34 = vmax.f32 %v3292_v56, 0.0  ;;  %v3287_v36 = vmax.f32 %v3286_v28, 0.0 }
 0x668   :  { %v3332_v38 = vmul.f32 %v3422_v31, %v3290_v48  ;;  %v3302_v33 = vmul.f32 %v3420_v29, %v3284_v32  ;;  %v3346_v12 = vmul.f32 %v3423_v37, %v3293_v34  ;;  %v3317_v7 = vmul.f32 %v3421_v57, %v3287_v36 }
 0x66a   :  { %v3333_v18 = vsel %vm3246_vm3, %v3332_v38, 0.0  ;;  %v3303_v10 = vsel %vm3246_vm3, %v3302_v33, 0.0  ;;  %v3347_v2 = vsel %vm3246_vm3, %v3346_v12, 0.0  ;;  %v3318_v26 = vsel %vm3246_vm3, %v3317_v7, 0.0 }
 0x66b   :  { %3334 = vadd.xlane.f32.xlu1 %v3333_v18  ;;  %3304 = vadd.xlane.f32.xlu0 %v3303_v10 }
 0x66f   :  { %3348 = vadd.xlane.f32.xlu1 %v3347_v2  ;;  %3319 = vadd.xlane.f32.xlu0 %v3318_v26 }
 0x6f8   :  { %v3335_v16 = vpop.xlane.xlu1 %3334  ;;  %v3305_v25 = vpop.xlane.xlu0 %3304 }
 0x6f9   :  { %4684 = vtanh.f32 %v3305_v25 }
 0x6fc   :  { %v3320_v44 = vpop.xlane.xlu0 %3319  ;;  %v3349_v59 = vpop.xlane.xlu1 %3348 }
 0x6fd   :  { %4686 = vtanh.f32 %v3320_v44 }
 0x6fe   :  { %4688 = vtanh.f32 %v3335_v16 }
 0x6ff   :  { %4690 = vtanh.f32 %v3349_v59 }
 0x703   :  { %v4685_v46 = vpop.eup %4684 }
 0x704   :  { %3308 = vst.msk [vmem:[%s5795_s14] sm:$0x3] %vm3307_vm4, %v4685_v46 }
 0x707   :  { %v4687_v39 = vpop.eup %4686 }
 0x708   :  { %v4689_v8 = vpop.eup %4688  ;;  %3323 = vst.msk [vmem:[%s5795_s14] sm:$0x3] %vm3322_vm5, %v4687_v39 }
 0x709   :  { %v4691_v55 = vpop.eup %4690  ;;  %3338 = vst.msk [vmem:[%s5795_s14] sm:$0x3] %vm3337_vm6, %v4689_v8 }
 0x70a   :  { %3352 = vst.msk [vmem:[%s5795_s14] sm:$0x3] %vm3351_vm7, %v4691_v55 }
 0x70b   :  { %3357 = vsyncpa [#allocation3], 1 }
 0x70c   :  { %3358 = vsyncpa [#allocation5], 1 }
 0x70d   :  { %3359 = vsyncpa [#allocation8], 1 }
 0x70e   :  { %3360 = vsyncpa [#allocation11], 1 }
 0x70f   :  { %3361 = vsyncpa [#allocation14], 1 }
 0x710   :  { %3362 = vsyncpa [#allocation17], 1 }
 0x711   :  { %3363 = vsyncpa [#allocation20], 1 }

</bundles_post_ra>
